<compile_context>
chip_gen: v7x
topology: tpu7x:2x2x1
jax: 0.10.0
libtpu: 0.0.40
codegen_flags: <defaults>
</compile_context>

<pallas_src>
import functools

import jax
import jax.numpy as jnp
import numpy as np
from jax.experimental import pallas as pl
from jax.experimental.pallas import tpu as pltpu

LN_EPS = 1e-5  # PyTorch nn.LayerNorm default

# Toggle for single-buffered projector constants (resolved by an eager probe
# in __main__; stays True on builds that accept pl.Buffered(1)).
_PROJ_SINGLE_BUFFER_CONSTS = True


# ----------------------------- small helpers ---------------------------------

def _ceil_to(x, m):
    return ((x + m - 1) // m) * m


@functools.lru_cache(maxsize=None)
def _vmem_limit():
    """Generation-aware scoped VMEM limit (v7x has only 64 MiB physical)."""
    cap = 128 * 1024 * 1024
    try:
        info = pltpu.get_tpu_info()
        cap = int(getattr(info, "vmem_capacity_bytes", cap))
    except Exception:
        pass
    if cap <= 64 * 1024 * 1024:        # v7x-class: leave headroom for compiler scratch
        return 48 * 1024 * 1024
    return 64 * 1024 * 1024            # v5e / v6e (128 MiB physical)


@functools.lru_cache(maxsize=None)
def _is_v5e():
    try:
        kind = jax.devices()[0].device_kind.lower()
    except Exception:
        return False
    return ("v5 lite" in kind) or ("v5e" in kind) or ("v5litepod" in kind)


def _gelu_exact(x):
    # exact GELU: 0.5 * x * (1 + erf(x / sqrt(2)))
    return 0.5 * x * (1.0 + jax.lax.erf(x * (1.0 / jnp.sqrt(2.0))))


def _layernorm(h, gamma, beta):
    # two-pass LayerNorm (matches PyTorch numerics better than E[x^2]-E[x]^2)
    mu = jnp.mean(h, axis=-1, keepdims=True)
    c = h - mu
    var = jnp.mean(c * c, axis=-1, keepdims=True)
    return c * jax.lax.rsqrt(var + LN_EPS) * gamma + beta


def _pick_tn(K, N, *, max_block_bytes=8 * 1024 * 1024, itemsize=2):
    """Largest 128-multiple divisor of N whose (K, tn) weight stripe fits the budget."""
    if N % 128 != 0:
        return N                                   # odd/small N: single full-width block
    budget_cols = max(128, max_block_bytes // (K * itemsize))
    for cand in (1024, 896, 768, 640, 512, 384, 256, 128):
        if cand <= N and cand <= budget_cols and N % cand == 0:
            return cand
    return N


# --------------------------------- kernels -----------------------------------

def _matmul_bias_kernel(x_ref, w_ref, b_ref, o_ref):
    """One (row-tile, column-tile) step of y = x @ W + b (full K per step)."""
    o_ref[...] = (jnp.dot(x_ref[...].astype(jnp.bfloat16), w_ref[...],
                          preferred_element_type=jnp.float32)
                  + b_ref[...]).astype(o_ref.dtype)


def _ln_gelu_kernel(*refs, add_residual):
    """y = GELU(LayerNorm(h)) [+ residual] over one row tile (full feature dim)."""
    if add_residual:
        h_ref, r_ref, g_ref, be_ref, o_ref = refs
    else:
        h_ref, g_ref, be_ref, o_ref = refs
    y = _gelu_exact(_layernorm(h_ref[...].astype(jnp.float32),
                               g_ref[...], be_ref[...]))
    if add_residual:
        y = y + r_ref[...]
    o_ref[...] = y.astype(o_ref.dtype)


def _projector_kernel(x_ref,
                      g0_ref, be0_ref, w0_ref, b0_ref,
                      g1_ref, be1_ref, w1_ref, b1_ref,
                      g2_ref, be2_ref, w2_ref, b2_ref,
                      o_ref):
    """Fused 3-stage projector: [LN -> GELU -> Linear] x3, weights resident in VMEM."""
    a0 = _gelu_exact(_layernorm(x_ref[...].astype(jnp.float32),
                                g0_ref[...], be0_ref[...]))
    h1 = jnp.dot(a0.astype(jnp.bfloat16), w0_ref[...],
                 preferred_element_type=jnp.float32) + b0_ref[...]
    a1 = _gelu_exact(_layernorm(h1, g1_ref[...], be1_ref[...]))
    h2 = jnp.dot(a1.astype(jnp.bfloat16), w1_ref[...],
                 preferred_element_type=jnp.float32) + b1_ref[...]
    a2 = _gelu_exact(_layernorm(h2, g2_ref[...], be2_ref[...]))
    y = jnp.dot(a2.astype(jnp.bfloat16), w2_ref[...],
                preferred_element_type=jnp.float32) + b2_ref[...]
    o_ref[...] = y.astype(o_ref.dtype)


# -------------------------------- wrappers -----------------------------------

def matmul_bias(x, w, b, *, tm=128, max_w_block_bytes=8 * 1024 * 1024):
    """y = x @ W + b.

    Grid is (row tiles, column tiles); the x row block stays resident across
    the column sweep (index depends only on i), the bf16 weight streams as
    (K, tn) column stripes, both axes are 'parallel' (v7x megacore).
    """
    M, K = x.shape
    Kw, N = w.shape
    assert Kw == K and b.shape == (N,)

    tm_eff = min(tm, M)
    Mp = _ceil_to(M, tm_eff)
    xp = jnp.pad(x, ((0, Mp - M), (0, 0))) if Mp != M else x

    tn_eff = _pick_tn(K, N, max_block_bytes=max_w_block_bytes,
                      itemsize=w.dtype.itemsize)
    assert N % tn_eff == 0

    grid = (Mp // tm_eff, N // tn_eff)
    cost = pl.CostEstimate(
        flops=2 * Mp * K * N,
        transcendentals=0,
        bytes_accessed=(Mp * K * x.dtype.itemsize
                        + K * N * w.dtype.itemsize
                        + Mp * N * 4),
    )

    out = pl.pallas_call(
        _matmul_bias_kernel,
        out_shape=jax.ShapeDtypeStruct((Mp, N), jnp.float32),
        grid=grid,
        in_specs=[
            pl.BlockSpec((tm_eff, K), lambda i, j: (i, 0)),   # x resident per row tile
            pl.BlockSpec((K, tn_eff), lambda i, j: (0, j)),   # weight column stripe streams
            pl.BlockSpec((1, tn_eff), lambda i, j: (0, j)),   # bias
        ],
        out_specs=pl.BlockSpec((tm_eff, tn_eff), lambda i, j: (i, j)),
        compiler_params=pltpu.CompilerParams(
            dimension_semantics=("parallel", "parallel"),
            vmem_limit_bytes=_vmem_limit(),
        ),
        cost_estimate=cost,
    )(xp, w, b.reshape(1, N))

    return out[:M] if Mp != M else out


def ln_gelu(h, gamma, beta, *, residual=None, tm=256):
    """y = GELU(LayerNorm(h)) [+ residual]; tiny elementwise pass over rows."""
    M, N = h.shape
    tm_eff = min(tm, M)
    Mp = _ceil_to(M, tm_eff)
    hp = jnp.pad(h, ((0, Mp - M), (0, 0))) if Mp != M else h

    args = [hp]
    in_specs = [pl.BlockSpec((tm_eff, N), lambda i: (i, 0))]
    if residual is not None:
        rp = jnp.pad(residual, ((0, Mp - M), (0, 0))) if Mp != M else residual
        args.append(rp)
        in_specs.append(pl.BlockSpec((tm_eff, N), lambda i: (i, 0)))
    args += [gamma.reshape(1, N), beta.reshape(1, N)]
    in_specs += [pl.BlockSpec((1, N), lambda i: (0, 0)),
                 pl.BlockSpec((1, N), lambda i: (0, 0))]

    kernel = functools.partial(_ln_gelu_kernel, add_residual=residual is not None)
    out = pl.pallas_call(
        kernel,
        out_shape=jax.ShapeDtypeStruct((Mp, N), jnp.float32),
        grid=(Mp // tm_eff,),
        in_specs=in_specs,
        out_specs=pl.BlockSpec((tm_eff, N), lambda i: (i, 0)),
        compiler_params=pltpu.CompilerParams(
            dimension_semantics=("parallel",),
            vmem_limit_bytes=_vmem_limit(),
        ),
    )(*args)

    return out[:M] if Mp != M else out


def projector(x, proj_params, *, tm=None):
    """Fused [LN->GELU->Linear] x3 over rows; all three weights resident in VMEM."""
    M, C = x.shape
    (g0, be0, w0, b0), (g1, be1, w1, b1), (g2, be2, w2, b2) = proj_params
    PH = w0.shape[1]
    assert w1.shape == (PH, PH) and w2.shape == (PH, C)

    if tm is None:
        tm = 128 if _is_v5e() else 256   # 256-row LHS fills v6e/v7x 256x256 MXU
    tm_eff = min(tm, M)
    Mp = _ceil_to(M, tm_eff)
    xp = jnp.pad(x, ((0, Mp - M), (0, 0))) if Mp != M else x

    def const(shape):
        # Grid-invariant parameters: single-buffer them (never re-fetched) so
        # the ~14 MB of projector weights isn't double-buffered on v7x.
        if _PROJ_SINGLE_BUFFER_CONSTS:
            return pl.BlockSpec(shape, lambda i: (0, 0),
                                pipeline_mode=pl.Buffered(1))
        return pl.BlockSpec(shape, lambda i: (0, 0))

    out = pl.pallas_call(
        _projector_kernel,
        out_shape=jax.ShapeDtypeStruct((Mp, C), jnp.float32),
        grid=(Mp // tm_eff,),
        in_specs=[
            pl.BlockSpec((tm_eff, C), lambda i: (i, 0)),
            const((1, C)), const((1, C)),
            const((C, PH)), const((1, PH)),
            const((1, PH)), const((1, PH)),
            const((PH, PH)), const((1, PH)),
            const((1, PH)), const((1, PH)),
            const((PH, C)), const((1, C)),
        ],
        out_specs=pl.BlockSpec((tm_eff, C), lambda i: (i, 0)),
        compiler_params=pltpu.CompilerParams(
            dimension_semantics=("parallel",),
            vmem_limit_bytes=_vmem_limit(),
        ),
    )(xp,
      g0.reshape(1, C), be0.reshape(1, C), w0, b0.reshape(1, PH),
      g1.reshape(1, PH), be1.reshape(1, PH), w1, b1.reshape(1, PH),
      g2.reshape(1, PH), be2.reshape(1, PH), w2, b2.reshape(1, C))

    return out[:M] if Mp != M else out


# ----------------------------- parameter setup --------------------------------

def init_params(key, in_dim, h, out_dim, clip_size, proj_hidden, n_blocks):
    keys = iter(jax.random.split(key, 64))

    def dense(fan_in, fan_out):
        kw, kb = next(keys), next(keys)
        w = (jax.random.normal(kw, (fan_in, fan_out), jnp.float32)
             / jnp.sqrt(float(fan_in))).astype(jnp.bfloat16)   # bf16 weight streaming
        b = 0.01 * jax.random.normal(kb, (fan_out,), jnp.float32)
        return w, b

    def ln(dim):
        kg, kb = next(keys), next(keys)
        g = 1.0 + 0.05 * jax.random.normal(kg, (dim,), jnp.float32)
        be = 0.05 * jax.random.normal(kb, (dim,), jnp.float32)
        return g, be

    params = {}
    w, b = dense(in_dim, h)
    g, be = ln(h)
    params["lin0"] = (w, b, g, be)

    params["mlp"] = []
    for _ in range(n_blocks):
        w, b = dense(h, h)
        g, be = ln(h)
        params["mlp"].append((w, b, g, be))

    params["lin1"] = dense(h, out_dim)

    params["proj"] = []
    for din, dout in [(clip_size, proj_hidden),
                      (proj_hidden, proj_hidden),
                      (proj_hidden, clip_size)]:
        g, be = ln(din)
        w, b = dense(din, dout)
        params["proj"].append((g, be, w, b))
    return params


# ------------------------------ full forward ----------------------------------

def brain_network_forward(x, params, clip_size):
    # lin0: Linear -> LN -> GELU -> (Dropout = identity in eval)
    w, b, g, be = params["lin0"]
    h = ln_gelu(matmul_bias(x, w, b), g, be)

    # residual MLP blocks: x = GELU(LN(x @ W + b)) + x
    for (w, b, g, be) in params["mlp"]:
        h = ln_gelu(matmul_bias(h, w, b), g, be, residual=h)

    # lin1 (backbone output)
    w1, b1 = params["lin1"]
    backbone = matmul_bias(h, w1, b1)

    # fused projector on [B * tokens, clip]
    B, out_dim = backbone.shape
    tokens = out_dim // clip_size
    t = backbone.reshape(B * tokens, clip_size)
    proj = projector(t, params["proj"]).reshape(B, tokens, clip_size)
    return backbone, proj


# ---------------------------- pure-JAX reference -------------------------------

def ref_forward(x, params, clip_size):
    w, b, g, be = params["lin0"]
    h = _gelu_exact(_layernorm(
        jnp.dot(x.astype(jnp.bfloat16), w, preferred_element_type=jnp.float32) + b, g, be))
    for (w, b, g, be) in params["mlp"]:
        h = _gelu_exact(_layernorm(
            jnp.dot(h.astype(jnp.bfloat16), w, preferred_element_type=jnp.float32) + b,
            g, be)) + h
    w1, b1 = params["lin1"]
    backbone = jnp.dot(h.astype(jnp.bfloat16), w1, preferred_element_type=jnp.float32) + b1
    B = x.shape[0]
    t = backbone.reshape(-1, clip_size)
    for (g, be, w, b) in params["proj"]:
        a = _gelu_exact(_layernorm(t, g, be))
        t = jnp.dot(a.astype(jnp.bfloat16), w, preferred_element_type=jnp.float32) + b
    return backbone, t.reshape(B, -1, clip_size)


# ----------------------------------- main --------------------------------------

if __name__ == "__main__":
    # small, forward-consistent shapes (original: in_dim=15724, h=4096,
    # clip_size=768, out_dim=257*768, proj hidden=2048, n_blocks=4)
    BATCH = 2
    IN_DIM = 512
    H = 256
    CLIP = 128
    TOKENS = 4
    OUT_DIM = TOKENS * CLIP
    PROJ_HIDDEN = 256
    N_BLOCKS = 2

    key = jax.random.PRNGKey(0)
    kx, kp = jax.random.split(key)
    x = jax.random.normal(kx, (BATCH, IN_DIM), jnp.float32)
    params = init_params(kp, IN_DIM, H, OUT_DIM, CLIP, PROJ_HIDDEN, N_BLOCKS)

    # Eager probe: single-buffered projector constants are a v7x VMEM
    # optimization; fall back to default buffering if this Pallas build
    # rejects pipeline_mode=pl.Buffered(1).
    try:
        _probe = projector(jnp.zeros((BATCH * TOKENS, CLIP), jnp.float32),
                           params["proj"])
        jax.block_until_ready(_probe)
    except Exception:
        _PROJ_SINGLE_BUFFER_CONSTS = False

    fwd = jax.jit(functools.partial(brain_network_forward, clip_size=CLIP))
    backbone, proj = fwd(x, params)
    jax.block_until_ready((backbone, proj))

    assert backbone.shape == (BATCH, OUT_DIM)
    assert proj.shape == (BATCH, TOKENS, CLIP)

    # correctness vs. pure-JAX reference (same bf16 weights / f32 accumulation)
    ref_bb, ref_pj = jax.jit(functools.partial(ref_forward, clip_size=CLIP))(x, params)
    np.testing.assert_allclose(np.asarray(backbone), np.asarray(ref_bb), rtol=5e-2, atol=5e-2)
    np.testing.assert_allclose(np.asarray(proj), np.asarray(ref_pj), rtol=5e-2, atol=5e-2)

    print("KERNEL_OK")
</pallas_src>

<mosaic_0001>
module attributes {stable_mosaic.version = 11 : i64} {
  func.func @_projector_kernel(%arg0: i32, %arg1: memref<8x128xf32, #tpu.memory_space<vmem>>, %arg2: memref<1x128xf32, #tpu.memory_space<vmem>>, %arg3: memref<1x128xf32, #tpu.memory_space<vmem>>, %arg4: memref<128x256xbf16, #tpu.memory_space<vmem>>, %arg5: memref<1x256xf32, #tpu.memory_space<vmem>>, %arg6: memref<1x256xf32, #tpu.memory_space<vmem>>, %arg7: memref<1x256xf32, #tpu.memory_space<vmem>>, %arg8: memref<256x256xbf16, #tpu.memory_space<vmem>>, %arg9: memref<1x256xf32, #tpu.memory_space<vmem>>, %arg10: memref<1x256xf32, #tpu.memory_space<vmem>>, %arg11: memref<1x256xf32, #tpu.memory_space<vmem>>, %arg12: memref<256x128xbf16, #tpu.memory_space<vmem>>, %arg13: memref<1x128xf32, #tpu.memory_space<vmem>>, %arg14: memref<8x128xf32, #tpu.memory_space<vmem>>) attributes {dimension_semantics = [#tpu.dimension_semantics<parallel>], iteration_bounds = array<i64: 1>, scalar_prefetch = 0 : i64, scratch_operands = 0 : i64, tpu.core_type = #tpu.core_type<tc>, window_params = [{transform_indices = @transform_0, window_bounds = array<i64: 8, 128>}, {pipeline_mode = #tpu.pipeline_mode<synchronous>, transform_indices = @transform_1, window_bounds = array<i64: 1, 128>}, {pipeline_mode = #tpu.pipeline_mode<synchronous>, transform_indices = @transform_2, window_bounds = array<i64: 1, 128>}, {pipeline_mode = #tpu.pipeline_mode<synchronous>, transform_indices = @transform_3, window_bounds = array<i64: 128, 256>}, {pipeline_mode = #tpu.pipeline_mode<synchronous>, transform_indices = @transform_4, window_bounds = array<i64: 1, 256>}, {pipeline_mode = #tpu.pipeline_mode<synchronous>, transform_indices = @transform_5, window_bounds = array<i64: 1, 256>}, {pipeline_mode = #tpu.pipeline_mode<synchronous>, transform_indices = @transform_6, window_bounds = array<i64: 1, 256>}, {pipeline_mode = #tpu.pipeline_mode<synchronous>, transform_indices = @transform_7, window_bounds = array<i64: 256, 256>}, {pipeline_mode = #tpu.pipeline_mode<synchronous>, transform_indices = @transform_8, window_bounds = array<i64: 1, 256>}, {pipeline_mode = #tpu.pipeline_mode<synchronous>, transform_indices = @transform_9, window_bounds = array<i64: 1, 256>}, {pipeline_mode = #tpu.pipeline_mode<synchronous>, transform_indices = @transform_10, window_bounds = array<i64: 1, 256>}, {pipeline_mode = #tpu.pipeline_mode<synchronous>, transform_indices = @transform_11, window_bounds = array<i64: 256, 128>}, {pipeline_mode = #tpu.pipeline_mode<synchronous>, transform_indices = @transform_12, window_bounds = array<i64: 1, 128>}, {transform_indices = @transform_13, window_bounds = array<i64: 8, 128>}]} {
    %c0 = arith.constant 0 : index
    %c0_0 = arith.constant 0 : index
    %0 = vector.load %arg1[%c0, %c0_0] : memref<8x128xf32, #tpu.memory_space<vmem>>, vector<8x128xf32>
    %c0_1 = arith.constant 0 : index
    %c0_2 = arith.constant 0 : index
    %1 = vector.load %arg2[%c0_1, %c0_2] : memref<1x128xf32, #tpu.memory_space<vmem>>, vector<1x128xf32>
    %c0_3 = arith.constant 0 : index
    %c0_4 = arith.constant 0 : index
    %2 = vector.load %arg3[%c0_3, %c0_4] : memref<1x128xf32, #tpu.memory_space<vmem>>, vector<1x128xf32>
    %cst = arith.constant dense<0.000000e+00> : vector<8xf32>
    %3 = vector.multi_reduction <add>, %0, %cst [1] : vector<8x128xf32> to vector<8xf32>
    %4 = vector.shape_cast %3 : vector<8xf32> to vector<8x1xf32>
    %cst_5 = arith.constant 1.280000e+02 : f32
    %5 = vector.broadcast %cst_5 : f32 to vector<8x1xf32>
    %6 = arith.divf %4, %5 : vector<8x1xf32>
    %7 = vector.broadcast %6 : vector<8x1xf32> to vector<8x128xf32>
    %8 = arith.subf %0, %7 : vector<8x128xf32>
    %9 = arith.mulf %8, %8 : vector<8x128xf32>
    %cst_6 = arith.constant dense<0.000000e+00> : vector<8xf32>
    %10 = vector.multi_reduction <add>, %9, %cst_6 [1] : vector<8x128xf32> to vector<8xf32>
    %11 = vector.shape_cast %10 : vector<8xf32> to vector<8x1xf32>
    %cst_7 = arith.constant 1.280000e+02 : f32
    %12 = vector.broadcast %cst_7 : f32 to vector<8x1xf32>
    %13 = arith.divf %11, %12 : vector<8x1xf32>
    %cst_8 = arith.constant 9.99999974E-6 : f32
    %14 = vector.broadcast %cst_8 : f32 to vector<8x1xf32>
    %15 = arith.addf %13, %14 : vector<8x1xf32>
    %16 = math.rsqrt %15 : vector<8x1xf32>
    %17 = vector.broadcast %16 : vector<8x1xf32> to vector<8x128xf32>
    %18 = arith.mulf %8, %17 : vector<8x128xf32>
    %19 = vector.broadcast %1 : vector<1x128xf32> to vector<8x128xf32>
    %20 = arith.mulf %18, %19 : vector<8x128xf32>
    %21 = vector.broadcast %2 : vector<1x128xf32> to vector<8x128xf32>
    %22 = arith.addf %20, %21 : vector<8x128xf32>
    %cst_9 = arith.constant 5.000000e-01 : f32
    %23 = vector.broadcast %cst_9 : f32 to vector<8x128xf32>
    %24 = arith.mulf %23, %22 : vector<8x128xf32>
    %cst_10 = arith.constant 2.000000e+00 : f32
    %25 = math.sqrt %cst_10 : f32
    %cst_11 = arith.constant 1.000000e+00 : f32
    %26 = arith.divf %cst_11, %25 : f32
    %27 = vector.broadcast %26 : f32 to vector<8x128xf32>
    %28 = arith.mulf %22, %27 : vector<8x128xf32>
    %29 = math.erf %28 : vector<8x128xf32>
    %cst_12 = arith.constant 1.000000e+00 : f32
    %30 = vector.broadcast %cst_12 : f32 to vector<8x128xf32>
    %31 = arith.addf %30, %29 : vector<8x128xf32>
    %32 = arith.mulf %24, %31 : vector<8x128xf32>
    %33 = arith.truncf %32 : vector<8x128xf32> to vector<8x128xbf16>
    %c0_13 = arith.constant 0 : index
    %c0_14 = arith.constant 0 : index
    %34 = vector.load %arg4[%c0_13, %c0_14] : memref<128x256xbf16, #tpu.memory_space<vmem>>, vector<128x256xbf16>
    %cst_15 = arith.constant dense<0.000000e+00> : vector<8x256xf32>
    %35 = tpu.matmul %33, %34, %cst_15 {dimension_numbers = #tpu.dot_dimension_numbers<[1], [0], [0], [1], [0, 0, 1, 1], [], []>} : vector<8x128xbf16>, vector<128x256xbf16>, vector<8x256xf32> -> vector<8x256xf32>
    %c0_16 = arith.constant 0 : index
    %c0_17 = arith.constant 0 : index
    %36 = vector.load %arg5[%c0_16, %c0_17] : memref<1x256xf32, #tpu.memory_space<vmem>>, vector<1x256xf32>
    %37 = vector.broadcast %36 : vector<1x256xf32> to vector<8x256xf32>
    %38 = arith.addf %35, %37 : vector<8x256xf32>
    %c0_18 = arith.constant 0 : index
    %c0_19 = arith.constant 0 : index
    %39 = vector.load %arg6[%c0_18, %c0_19] : memref<1x256xf32, #tpu.memory_space<vmem>>, vector<1x256xf32>
    %c0_20 = arith.constant 0 : index
    %c0_21 = arith.constant 0 : index
    %40 = vector.load %arg7[%c0_20, %c0_21] : memref<1x256xf32, #tpu.memory_space<vmem>>, vector<1x256xf32>
    %cst_22 = arith.constant dense<0.000000e+00> : vector<8xf32>
    %41 = vector.multi_reduction <add>, %38, %cst_22 [1] : vector<8x256xf32> to vector<8xf32>
    %42 = vector.shape_cast %41 : vector<8xf32> to vector<8x1xf32>
    %cst_23 = arith.constant 2.560000e+02 : f32
    %43 = vector.broadcast %cst_23 : f32 to vector<8x1xf32>
    %44 = arith.divf %42, %43 : vector<8x1xf32>
    %45 = vector.broadcast %44 : vector<8x1xf32> to vector<8x256xf32>
    %46 = arith.subf %38, %45 : vector<8x256xf32>
    %47 = arith.mulf %46, %46 : vector<8x256xf32>
    %cst_24 = arith.constant dense<0.000000e+00> : vector<8xf32>
    %48 = vector.multi_reduction <add>, %47, %cst_24 [1] : vector<8x256xf32> to vector<8xf32>
    %49 = vector.shape_cast %48 : vector<8xf32> to vector<8x1xf32>
    %cst_25 = arith.constant 2.560000e+02 : f32
    %50 = vector.broadcast %cst_25 : f32 to vector<8x1xf32>
    %51 = arith.divf %49, %50 : vector<8x1xf32>
    %cst_26 = arith.constant 9.99999974E-6 : f32
    %52 = vector.broadcast %cst_26 : f32 to vector<8x1xf32>
    %53 = arith.addf %51, %52 : vector<8x1xf32>
    %54 = math.rsqrt %53 : vector<8x1xf32>
    %55 = vector.broadcast %54 : vector<8x1xf32> to vector<8x256xf32>
    %56 = arith.mulf %46, %55 : vector<8x256xf32>
    %57 = vector.broadcast %39 : vector<1x256xf32> to vector<8x256xf32>
    %58 = arith.mulf %56, %57 : vector<8x256xf32>
    %59 = vector.broadcast %40 : vector<1x256xf32> to vector<8x256xf32>
    %60 = arith.addf %58, %59 : vector<8x256xf32>
    %cst_27 = arith.constant 5.000000e-01 : f32
    %61 = vector.broadcast %cst_27 : f32 to vector<8x256xf32>
    %62 = arith.mulf %61, %60 : vector<8x256xf32>
    %cst_28 = arith.constant 2.000000e+00 : f32
    %63 = math.sqrt %cst_28 : f32
    %cst_29 = arith.constant 1.000000e+00 : f32
    %64 = arith.divf %cst_29, %63 : f32
    %65 = vector.broadcast %64 : f32 to vector<8x256xf32>
    %66 = arith.mulf %60, %65 : vector<8x256xf32>
    %67 = math.erf %66 : vector<8x256xf32>
    %cst_30 = arith.constant 1.000000e+00 : f32
    %68 = vector.broadcast %cst_30 : f32 to vector<8x256xf32>
    %69 = arith.addf %68, %67 : vector<8x256xf32>
    %70 = arith.mulf %62, %69 : vector<8x256xf32>
    %71 = arith.truncf %70 : vector<8x256xf32> to vector<8x256xbf16>
    %c0_31 = arith.constant 0 : index
    %c0_32 = arith.constant 0 : index
    %72 = vector.load %arg8[%c0_31, %c0_32] : memref<256x256xbf16, #tpu.memory_space<vmem>>, vector<256x256xbf16>
    %cst_33 = arith.constant dense<0.000000e+00> : vector<8x256xf32>
    %73 = tpu.matmul %71, %72, %cst_33 {dimension_numbers = #tpu.dot_dimension_numbers<[1], [0], [0], [1], [0, 0, 1, 1], [], []>} : vector<8x256xbf16>, vector<256x256xbf16>, vector<8x256xf32> -> vector<8x256xf32>
    %c0_34 = arith.constant 0 : index
    %c0_35 = arith.constant 0 : index
    %74 = vector.load %arg9[%c0_34, %c0_35] : memref<1x256xf32, #tpu.memory_space<vmem>>, vector<1x256xf32>
    %75 = vector.broadcast %74 : vector<1x256xf32> to vector<8x256xf32>
    %76 = arith.addf %73, %75 : vector<8x256xf32>
    %c0_36 = arith.constant 0 : index
    %c0_37 = arith.constant 0 : index
    %77 = vector.load %arg10[%c0_36, %c0_37] : memref<1x256xf32, #tpu.memory_space<vmem>>, vector<1x256xf32>
    %c0_38 = arith.constant 0 : index
    %c0_39 = arith.constant 0 : index
    %78 = vector.load %arg11[%c0_38, %c0_39] : memref<1x256xf32, #tpu.memory_space<vmem>>, vector<1x256xf32>
    %cst_40 = arith.constant dense<0.000000e+00> : vector<8xf32>
    %79 = vector.multi_reduction <add>, %76, %cst_40 [1] : vector<8x256xf32> to vector<8xf32>
    %80 = vector.shape_cast %79 : vector<8xf32> to vector<8x1xf32>
    %cst_41 = arith.constant 2.560000e+02 : f32
    %81 = vector.broadcast %cst_41 : f32 to vector<8x1xf32>
    %82 = arith.divf %80, %81 : vector<8x1xf32>
    %83 = vector.broadcast %82 : vector<8x1xf32> to vector<8x256xf32>
    %84 = arith.subf %76, %83 : vector<8x256xf32>
    %85 = arith.mulf %84, %84 : vector<8x256xf32>
    %cst_42 = arith.constant dense<0.000000e+00> : vector<8xf32>
    %86 = vector.multi_reduction <add>, %85, %cst_42 [1] : vector<8x256xf32> to vector<8xf32>
    %87 = vector.shape_cast %86 : vector<8xf32> to vector<8x1xf32>
    %cst_43 = arith.constant 2.560000e+02 : f32
    %88 = vector.broadcast %cst_43 : f32 to vector<8x1xf32>
    %89 = arith.divf %87, %88 : vector<8x1xf32>
    %cst_44 = arith.constant 9.99999974E-6 : f32
    %90 = vector.broadcast %cst_44 : f32 to vector<8x1xf32>
    %91 = arith.addf %89, %90 : vector<8x1xf32>
    %92 = math.rsqrt %91 : vector<8x1xf32>
    %93 = vector.broadcast %92 : vector<8x1xf32> to vector<8x256xf32>
    %94 = arith.mulf %84, %93 : vector<8x256xf32>
    %95 = vector.broadcast %77 : vector<1x256xf32> to vector<8x256xf32>
    %96 = arith.mulf %94, %95 : vector<8x256xf32>
    %97 = vector.broadcast %78 : vector<1x256xf32> to vector<8x256xf32>
    %98 = arith.addf %96, %97 : vector<8x256xf32>
    %cst_45 = arith.constant 5.000000e-01 : f32
    %99 = vector.broadcast %cst_45 : f32 to vector<8x256xf32>
    %100 = arith.mulf %99, %98 : vector<8x256xf32>
    %cst_46 = arith.constant 2.000000e+00 : f32
    %101 = math.sqrt %cst_46 : f32
    %cst_47 = arith.constant 1.000000e+00 : f32
    %102 = arith.divf %cst_47, %101 : f32
    %103 = vector.broadcast %102 : f32 to vector<8x256xf32>
    %104 = arith.mulf %98, %103 : vector<8x256xf32>
    %105 = math.erf %104 : vector<8x256xf32>
    %cst_48 = arith.constant 1.000000e+00 : f32
    %106 = vector.broadcast %cst_48 : f32 to vector<8x256xf32>
    %107 = arith.addf %106, %105 : vector<8x256xf32>
    %108 = arith.mulf %100, %107 : vector<8x256xf32>
    %109 = arith.truncf %108 : vector<8x256xf32> to vector<8x256xbf16>
    %c0_49 = arith.constant 0 : index
    %c0_50 = arith.constant 0 : index
    %110 = vector.load %arg12[%c0_49, %c0_50] : memref<256x128xbf16, #tpu.memory_space<vmem>>, vector<256x128xbf16>
    %cst_51 = arith.constant dense<0.000000e+00> : vector<8x128xf32>
    %111 = tpu.matmul %109, %110, %cst_51 {dimension_numbers = #tpu.dot_dimension_numbers<[1], [0], [0], [1], [0, 0, 1, 1], [], []>} : vector<8x256xbf16>, vector<256x128xbf16>, vector<8x128xf32> -> vector<8x128xf32>
    %c0_52 = arith.constant 0 : index
    %c0_53 = arith.constant 0 : index
    %112 = vector.load %arg13[%c0_52, %c0_53] : memref<1x128xf32, #tpu.memory_space<vmem>>, vector<1x128xf32>
    %113 = vector.broadcast %112 : vector<1x128xf32> to vector<8x128xf32>
    %114 = arith.addf %111, %113 : vector<8x128xf32>
    %c0_54 = arith.constant 0 : index
    %c0_55 = arith.constant 0 : index
    %115 = vector.load %arg14[%c0_54, %c0_55] : memref<8x128xf32, #tpu.memory_space<vmem>>, vector<8x128xf32>
    tpu.vector_store %arg14[%c0_54, %c0_55], %114 {strides = array<i32>} : memref<8x128xf32, #tpu.memory_space<vmem>>, vector<8x128xf32>,
    return
  }
  func.func @transform_0(%arg0: i32) -> (i32, i32) {
    %c0_i32 = arith.constant 0 : i32
    %c0_i32_0 = arith.constant 0 : i32
    return %arg0, %c0_i32 : i32, i32
  }
  func.func @transform_1(%arg0: i32) -> (i32, i32) {
    %c0_i32 = arith.constant 0 : i32
    %c0_i32_0 = arith.constant 0 : i32
    %c0_i32_1 = arith.constant 0 : i32
    return %c0_i32, %c0_i32_0 : i32, i32
  }
  func.func @transform_2(%arg0: i32) -> (i32, i32) {
    %c0_i32 = arith.constant 0 : i32
    %c0_i32_0 = arith.constant 0 : i32
    %c0_i32_1 = arith.constant 0 : i32
    return %c0_i32, %c0_i32_0 : i32, i32
  }
  func.func @transform_3(%arg0: i32) -> (i32, i32) {
    %c0_i32 = arith.constant 0 : i32
    %c0_i32_0 = arith.constant 0 : i32
    %c0_i32_1 = arith.constant 0 : i32
    return %c0_i32, %c0_i32_0 : i32, i32
  }
  func.func @transform_4(%arg0: i32) -> (i32, i32) {
    %c0_i32 = arith.constant 0 : i32
    %c0_i32_0 = arith.constant 0 : i32
    %c0_i32_1 = arith.constant 0 : i32
    return %c0_i32, %c0_i32_0 : i32, i32
  }
  func.func @transform_5(%arg0: i32) -> (i32, i32) {
    %c0_i32 = arith.constant 0 : i32
    %c0_i32_0 = arith.constant 0 : i32
    %c0_i32_1 = arith.constant 0 : i32
    return %c0_i32, %c0_i32_0 : i32, i32
  }
  func.func @transform_6(%arg0: i32) -> (i32, i32) {
    %c0_i32 = arith.constant 0 : i32
    %c0_i32_0 = arith.constant 0 : i32
    %c0_i32_1 = arith.constant 0 : i32
    return %c0_i32, %c0_i32_0 : i32, i32
  }
  func.func @transform_7(%arg0: i32) -> (i32, i32) {
    %c0_i32 = arith.constant 0 : i32
    %c0_i32_0 = arith.constant 0 : i32
    %c0_i32_1 = arith.constant 0 : i32
    return %c0_i32, %c0_i32_0 : i32, i32
  }
  func.func @transform_8(%arg0: i32) -> (i32, i32) {
    %c0_i32 = arith.constant 0 : i32
    %c0_i32_0 = arith.constant 0 : i32
    %c0_i32_1 = arith.constant 0 : i32
    return %c0_i32, %c0_i32_0 : i32, i32
  }
  func.func @transform_9(%arg0: i32) -> (i32, i32) {
    %c0_i32 = arith.constant 0 : i32
    %c0_i32_0 = arith.constant 0 : i32
    %c0_i32_1 = arith.constant 0 : i32
    return %c0_i32, %c0_i32_0 : i32, i32
  }
  func.func @transform_10(%arg0: i32) -> (i32, i32) {
    %c0_i32 = arith.constant 0 : i32
    %c0_i32_0 = arith.constant 0 : i32
    %c0_i32_1 = arith.constant 0 : i32
    return %c0_i32, %c0_i32_0 : i32, i32
  }
  func.func @transform_11(%arg0: i32) -> (i32, i32) {
    %c0_i32 = arith.constant 0 : i32
    %c0_i32_0 = arith.constant 0 : i32
    %c0_i32_1 = arith.constant 0 : i32
    return %c0_i32, %c0_i32_0 : i32, i32
  }
  func.func @transform_12(%arg0: i32) -> (i32, i32) {
    %c0_i32 = arith.constant 0 : i32
    %c0_i32_0 = arith.constant 0 : i32
    %c0_i32_1 = arith.constant 0 : i32
    return %c0_i32, %c0_i32_0 : i32, i32
  }
  func.func @transform_13(%arg0: i32) -> (i32, i32) {
    %c0_i32 = arith.constant 0 : i32
    %c0_i32_0 = arith.constant 0 : i32
    return %arg0, %c0_i32 : i32, i32
  }
}

module attributes {stable_mosaic.version = 11 : i64} {
  func.func @_matmul_bias_kernel(%arg0: i32, %arg1: i32, %arg2: memref<2x256xf32, #tpu.memory_space<vmem>>, %arg3: memref<256x256xbf16, #tpu.memory_space<vmem>>, %arg4: memref<1x256xf32, #tpu.memory_space<vmem>>, %arg5: memref<2x256xf32, #tpu.memory_space<vmem>>) attributes {dimension_semantics = [#tpu.dimension_semantics<parallel>, #tpu.dimension_semantics<parallel>], iteration_bounds = array<i64: 1, 1>, scalar_prefetch = 0 : i64, scratch_operands = 0 : i64, tpu.core_type = #tpu.core_type<tc>, window_params = [{transform_indices = @transform_0, window_bounds = array<i64: 2, 256>}, {transform_indices = @transform_1, window_bounds = array<i64: 256, 256>}, {transform_indices = @transform_2, window_bounds = array<i64: 1, 256>}, {transform_indices = @transform_3, window_bounds = array<i64: 2, 256>}]} {
    %c0 = arith.constant 0 : index
    %c0_0 = arith.constant 0 : index
    %0 = vector.load %arg2[%c0, %c0_0] : memref<2x256xf32, #tpu.memory_space<vmem>>, vector<2x256xf32>
    %1 = arith.truncf %0 : vector<2x256xf32> to vector<2x256xbf16>
    %c0_1 = arith.constant 0 : index
    %c0_2 = arith.constant 0 : index
    %2 = vector.load %arg3[%c0_1, %c0_2] : memref<256x256xbf16, #tpu.memory_space<vmem>>, vector<256x256xbf16>
    %cst = arith.constant dense<0.000000e+00> : vector<2x256xf32>
    %3 = tpu.matmul %1, %2, %cst {dimension_numbers = #tpu.dot_dimension_numbers<[1], [0], [0], [1], [0, 0, 1, 1], [], []>} : vector<2x256xbf16>, vector<256x256xbf16>, vector<2x256xf32> -> vector<2x256xf32>
    %c0_3 = arith.constant 0 : index
    %c0_4 = arith.constant 0 : index
    %4 = vector.load %arg4[%c0_3, %c0_4] : memref<1x256xf32, #tpu.memory_space<vmem>>, vector<1x256xf32>
    %5 = vector.broadcast %4 : vector<1x256xf32> to vector<2x256xf32>
    %6 = arith.addf %3, %5 : vector<2x256xf32>
    %c0_5 = arith.constant 0 : index
    %c0_6 = arith.constant 0 : index
    %7 = vector.load %arg5[%c0_5, %c0_6] : memref<2x256xf32, #tpu.memory_space<vmem>>, vector<2x256xf32>
    tpu.vector_store %arg5[%c0_5, %c0_6], %6 {strides = array<i32>} : memref<2x256xf32, #tpu.memory_space<vmem>>, vector<2x256xf32>,
    return
  }
  func.func @transform_0(%arg0: i32, %arg1: i32) -> (i32, i32) {
    %c0_i32 = arith.constant 0 : i32
    %c0_i32_0 = arith.constant 0 : i32
    return %arg0, %c0_i32 : i32, i32
  }
  func.func @transform_1(%arg0: i32, %arg1: i32) -> (i32, i32) {
    %c0_i32 = arith.constant 0 : i32
    %c0_i32_0 = arith.constant 0 : i32
    return %c0_i32, %arg1 : i32, i32
  }
  func.func @transform_2(%arg0: i32, %arg1: i32) -> (i32, i32) {
    %c0_i32 = arith.constant 0 : i32
    %c0_i32_0 = arith.constant 0 : i32
    return %c0_i32, %arg1 : i32, i32
  }
  func.func @transform_3(%arg0: i32, %arg1: i32) -> (i32, i32) {
    %c0_i32 = arith.constant 0 : i32
    return %arg0, %arg1 : i32, i32
  }
}

module attributes {stable_mosaic.version = 11 : i64} {
  func.func @_ln_gelu_kernel(%arg0: i32, %arg1: memref<2x256xf32, #tpu.memory_space<vmem>>, %arg2: memref<2x256xf32, #tpu.memory_space<vmem>>, %arg3: memref<1x256xf32, #tpu.memory_space<vmem>>, %arg4: memref<1x256xf32, #tpu.memory_space<vmem>>, %arg5: memref<2x256xf32, #tpu.memory_space<vmem>>) attributes {dimension_semantics = [#tpu.dimension_semantics<parallel>], iteration_bounds = array<i64: 1>, scalar_prefetch = 0 : i64, scratch_operands = 0 : i64, tpu.core_type = #tpu.core_type<tc>, window_params = [{transform_indices = @transform_0, window_bounds = array<i64: 2, 256>}, {transform_indices = @transform_1, window_bounds = array<i64: 2, 256>}, {pipeline_mode = #tpu.pipeline_mode<synchronous>, transform_indices = @transform_2, window_bounds = array<i64: 1, 256>}, {pipeline_mode = #tpu.pipeline_mode<synchronous>, transform_indices = @transform_3, window_bounds = array<i64: 1, 256>}, {transform_indices = @transform_4, window_bounds = array<i64: 2, 256>}]} {
    %c0 = arith.constant 0 : index
    %c0_0 = arith.constant 0 : index
    %0 = vector.load %arg1[%c0, %c0_0] : memref<2x256xf32, #tpu.memory_space<vmem>>, vector<2x256xf32>
    %c0_1 = arith.constant 0 : index
    %c0_2 = arith.constant 0 : index
    %1 = vector.load %arg3[%c0_1, %c0_2] : memref<1x256xf32, #tpu.memory_space<vmem>>, vector<1x256xf32>
    %c0_3 = arith.constant 0 : index
    %c0_4 = arith.constant 0 : index
    %2 = vector.load %arg4[%c0_3, %c0_4] : memref<1x256xf32, #tpu.memory_space<vmem>>, vector<1x256xf32>
    %cst = arith.constant dense<0.000000e+00> : vector<2xf32>
    %3 = vector.multi_reduction <add>, %0, %cst [1] : vector<2x256xf32> to vector<2xf32>
    %4 = vector.shape_cast %3 : vector<2xf32> to vector<2x1xf32>
    %cst_5 = arith.constant 2.560000e+02 : f32
    %5 = vector.broadcast %cst_5 : f32 to vector<2x1xf32>
    %6 = arith.divf %4, %5 : vector<2x1xf32>
    %7 = vector.broadcast %6 : vector<2x1xf32> to vector<2x256xf32>
    %8 = arith.subf %0, %7 : vector<2x256xf32>
    %9 = arith.mulf %8, %8 : vector<2x256xf32>
    %cst_6 = arith.constant dense<0.000000e+00> : vector<2xf32>
    %10 = vector.multi_reduction <add>, %9, %cst_6 [1] : vector<2x256xf32> to vector<2xf32>
    %11 = vector.shape_cast %10 : vector<2xf32> to vector<2x1xf32>
    %cst_7 = arith.constant 2.560000e+02 : f32
    %12 = vector.broadcast %cst_7 : f32 to vector<2x1xf32>
    %13 = arith.divf %11, %12 : vector<2x1xf32>
    %cst_8 = arith.constant 9.99999974E-6 : f32
    %14 = vector.broadcast %cst_8 : f32 to vector<2x1xf32>
    %15 = arith.addf %13, %14 : vector<2x1xf32>
    %16 = math.rsqrt %15 : vector<2x1xf32>
    %17 = vector.broadcast %16 : vector<2x1xf32> to vector<2x256xf32>
    %18 = arith.mulf %8, %17 : vector<2x256xf32>
    %19 = vector.broadcast %1 : vector<1x256xf32> to vector<2x256xf32>
    %20 = arith.mulf %18, %19 : vector<2x256xf32>
    %21 = vector.broadcast %2 : vector<1x256xf32> to vector<2x256xf32>
    %22 = arith.addf %20, %21 : vector<2x256xf32>
    %cst_9 = arith.constant 5.000000e-01 : f32
    %23 = vector.broadcast %cst_9 : f32 to vector<2x256xf32>
    %24 = arith.mulf %23, %22 : vector<2x256xf32>
    %cst_10 = arith.constant 2.000000e+00 : f32
    %25 = math.sqrt %cst_10 : f32
    %cst_11 = arith.constant 1.000000e+00 : f32
    %26 = arith.divf %cst_11, %25 : f32
    %27 = vector.broadcast %26 : f32 to vector<2x256xf32>
    %28 = arith.mulf %22, %27 : vector<2x256xf32>
    %29 = math.erf %28 : vector<2x256xf32>
    %cst_12 = arith.constant 1.000000e+00 : f32
    %30 = vector.broadcast %cst_12 : f32 to vector<2x256xf32>
    %31 = arith.addf %30, %29 : vector<2x256xf32>
    %32 = arith.mulf %24, %31 : vector<2x256xf32>
    %c0_13 = arith.constant 0 : index
    %c0_14 = arith.constant 0 : index
    %33 = vector.load %arg2[%c0_13, %c0_14] : memref<2x256xf32, #tpu.memory_space<vmem>>, vector<2x256xf32>
    %34 = arith.addf %32, %33 : vector<2x256xf32>
    %c0_15 = arith.constant 0 : index
    %c0_16 = arith.constant 0 : index
    %35 = vector.load %arg5[%c0_15, %c0_16] : memref<2x256xf32, #tpu.memory_space<vmem>>, vector<2x256xf32>
    tpu.vector_store %arg5[%c0_15, %c0_16], %34 {strides = array<i32>} : memref<2x256xf32, #tpu.memory_space<vmem>>, vector<2x256xf32>,
    return
  }
  func.func @transform_0(%arg0: i32) -> (i32, i32) {
    %c0_i32 = arith.constant 0 : i32
    %c0_i32_0 = arith.constant 0 : i32
    return %arg0, %c0_i32 : i32, i32
  }
  func.func @transform_1(%arg0: i32) -> (i32, i32) {
    %c0_i32 = arith.constant 0 : i32
    %c0_i32_0 = arith.constant 0 : i32
    return %arg0, %c0_i32 : i32, i32
  }
  func.func @transform_2(%arg0: i32) -> (i32, i32) {
    %c0_i32 = arith.constant 0 : i32
    %c0_i32_0 = arith.constant 0 : i32
    %c0_i32_1 = arith.constant 0 : i32
    return %c0_i32, %c0_i32_0 : i32, i32
  }
  func.func @transform_3(%arg0: i32) -> (i32, i32) {
    %c0_i32 = arith.constant 0 : i32
    %c0_i32_0 = arith.constant 0 : i32
    %c0_i32_1 = arith.constant 0 : i32
    return %c0_i32, %c0_i32_0 : i32, i32
  }
  func.func @transform_4(%arg0: i32) -> (i32, i32) {
    %c0_i32 = arith.constant 0 : i32
    %c0_i32_0 = arith.constant 0 : i32
    return %arg0, %c0_i32 : i32, i32
  }
}

module attributes {stable_mosaic.version = 11 : i64} {
  func.func @_ln_gelu_kernel(%arg0: i32, %arg1: memref<2x256xf32, #tpu.memory_space<vmem>>, %arg2: memref<1x256xf32, #tpu.memory_space<vmem>>, %arg3: memref<1x256xf32, #tpu.memory_space<vmem>>, %arg4: memref<2x256xf32, #tpu.memory_space<vmem>>) attributes {dimension_semantics = [#tpu.dimension_semantics<parallel>], iteration_bounds = array<i64: 1>, scalar_prefetch = 0 : i64, scratch_operands = 0 : i64, tpu.core_type = #tpu.core_type<tc>, window_params = [{transform_indices = @transform_0, window_bounds = array<i64: 2, 256>}, {pipeline_mode = #tpu.pipeline_mode<synchronous>, transform_indices = @transform_1, window_bounds = array<i64: 1, 256>}, {pipeline_mode = #tpu.pipeline_mode<synchronous>, transform_indices = @transform_2, window_bounds = array<i64: 1, 256>}, {transform_indices = @transform_3, window_bounds = array<i64: 2, 256>}]} {
    %c0 = arith.constant 0 : index
    %c0_0 = arith.constant 0 : index
    %0 = vector.load %arg1[%c0, %c0_0] : memref<2x256xf32, #tpu.memory_space<vmem>>, vector<2x256xf32>
    %c0_1 = arith.constant 0 : index
    %c0_2 = arith.constant 0 : index
    %1 = vector.load %arg2[%c0_1, %c0_2] : memref<1x256xf32, #tpu.memory_space<vmem>>, vector<1x256xf32>
    %c0_3 = arith.constant 0 : index
    %c0_4 = arith.constant 0 : index
    %2 = vector.load %arg3[%c0_3, %c0_4] : memref<1x256xf32, #tpu.memory_space<vmem>>, vector<1x256xf32>
    %cst = arith.constant dense<0.000000e+00> : vector<2xf32>
    %3 = vector.multi_reduction <add>, %0, %cst [1] : vector<2x256xf32> to vector<2xf32>
    %4 = vector.shape_cast %3 : vector<2xf32> to vector<2x1xf32>
    %cst_5 = arith.constant 2.560000e+02 : f32
    %5 = vector.broadcast %cst_5 : f32 to vector<2x1xf32>
    %6 = arith.divf %4, %5 : vector<2x1xf32>
    %7 = vector.broadcast %6 : vector<2x1xf32> to vector<2x256xf32>
    %8 = arith.subf %0, %7 : vector<2x256xf32>
    %9 = arith.mulf %8, %8 : vector<2x256xf32>
    %cst_6 = arith.constant dense<0.000000e+00> : vector<2xf32>
    %10 = vector.multi_reduction <add>, %9, %cst_6 [1] : vector<2x256xf32> to vector<2xf32>
    %11 = vector.shape_cast %10 : vector<2xf32> to vector<2x1xf32>
    %cst_7 = arith.constant 2.560000e+02 : f32
    %12 = vector.broadcast %cst_7 : f32 to vector<2x1xf32>
    %13 = arith.divf %11, %12 : vector<2x1xf32>
    %cst_8 = arith.constant 9.99999974E-6 : f32
    %14 = vector.broadcast %cst_8 : f32 to vector<2x1xf32>
    %15 = arith.addf %13, %14 : vector<2x1xf32>
    %16 = math.rsqrt %15 : vector<2x1xf32>
    %17 = vector.broadcast %16 : vector<2x1xf32> to vector<2x256xf32>
    %18 = arith.mulf %8, %17 : vector<2x256xf32>
    %19 = vector.broadcast %1 : vector<1x256xf32> to vector<2x256xf32>
    %20 = arith.mulf %18, %19 : vector<2x256xf32>
    %21 = vector.broadcast %2 : vector<1x256xf32> to vector<2x256xf32>
    %22 = arith.addf %20, %21 : vector<2x256xf32>
    %cst_9 = arith.constant 5.000000e-01 : f32
    %23 = vector.broadcast %cst_9 : f32 to vector<2x256xf32>
    %24 = arith.mulf %23, %22 : vector<2x256xf32>
    %cst_10 = arith.constant 2.000000e+00 : f32
    %25 = math.sqrt %cst_10 : f32
    %cst_11 = arith.constant 1.000000e+00 : f32
    %26 = arith.divf %cst_11, %25 : f32
    %27 = vector.broadcast %26 : f32 to vector<2x256xf32>
    %28 = arith.mulf %22, %27 : vector<2x256xf32>
    %29 = math.erf %28 : vector<2x256xf32>
    %cst_12 = arith.constant 1.000000e+00 : f32
    %30 = vector.broadcast %cst_12 : f32 to vector<2x256xf32>
    %31 = arith.addf %30, %29 : vector<2x256xf32>
    %32 = arith.mulf %24, %31 : vector<2x256xf32>
    %c0_13 = arith.constant 0 : index
    %c0_14 = arith.constant 0 : index
    %33 = vector.load %arg4[%c0_13, %c0_14] : memref<2x256xf32, #tpu.memory_space<vmem>>, vector<2x256xf32>
    tpu.vector_store %arg4[%c0_13, %c0_14], %32 {strides = array<i32>} : memref<2x256xf32, #tpu.memory_space<vmem>>, vector<2x256xf32>,
    return
  }
  func.func @transform_0(%arg0: i32) -> (i32, i32) {
    %c0_i32 = arith.constant 0 : i32
    %c0_i32_0 = arith.constant 0 : i32
    return %arg0, %c0_i32 : i32, i32
  }
  func.func @transform_1(%arg0: i32) -> (i32, i32) {
    %c0_i32 = arith.constant 0 : i32
    %c0_i32_0 = arith.constant 0 : i32
    %c0_i32_1 = arith.constant 0 : i32
    return %c0_i32, %c0_i32_0 : i32, i32
  }
  func.func @transform_2(%arg0: i32) -> (i32, i32) {
    %c0_i32 = arith.constant 0 : i32
    %c0_i32_0 = arith.constant 0 : i32
    %c0_i32_1 = arith.constant 0 : i32
    return %c0_i32, %c0_i32_0 : i32, i32
  }
  func.func @transform_3(%arg0: i32) -> (i32, i32) {
    %c0_i32 = arith.constant 0 : i32
    %c0_i32_0 = arith.constant 0 : i32
    return %arg0, %c0_i32 : i32, i32
  }
}

module attributes {stable_mosaic.version = 11 : i64} {
  func.func @_matmul_bias_kernel(%arg0: i32, %arg1: i32, %arg2: memref<2x512xf32, #tpu.memory_space<vmem>>, %arg3: memref<512x256xbf16, #tpu.memory_space<vmem>>, %arg4: memref<1x256xf32, #tpu.memory_space<vmem>>, %arg5: memref<2x256xf32, #tpu.memory_space<vmem>>) attributes {dimension_semantics = [#tpu.dimension_semantics<parallel>, #tpu.dimension_semantics<parallel>], iteration_bounds = array<i64: 1, 1>, scalar_prefetch = 0 : i64, scratch_operands = 0 : i64, tpu.core_type = #tpu.core_type<tc>, window_params = [{transform_indices = @transform_0, window_bounds = array<i64: 2, 512>}, {transform_indices = @transform_1, window_bounds = array<i64: 512, 256>}, {transform_indices = @transform_2, window_bounds = array<i64: 1, 256>}, {transform_indices = @transform_3, window_bounds = array<i64: 2, 256>}]} {
    %c0 = arith.constant 0 : index
    %c0_0 = arith.constant 0 : index
    %0 = vector.load %arg2[%c0, %c0_0] : memref<2x512xf32, #tpu.memory_space<vmem>>, vector<2x512xf32>
    %1 = arith.truncf %0 : vector<2x512xf32> to vector<2x512xbf16>
    %c0_1 = arith.constant 0 : index
    %c0_2 = arith.constant 0 : index
    %2 = vector.load %arg3[%c0_1, %c0_2] : memref<512x256xbf16, #tpu.memory_space<vmem>>, vector<512x256xbf16>
    %cst = arith.constant dense<0.000000e+00> : vector<2x256xf32>
    %3 = tpu.matmul %1, %2, %cst {dimension_numbers = #tpu.dot_dimension_numbers<[1], [0], [0], [1], [0, 0, 1, 1], [], []>} : vector<2x512xbf16>, vector<512x256xbf16>, vector<2x256xf32> -> vector<2x256xf32>
    %c0_3 = arith.constant 0 : index
    %c0_4 = arith.constant 0 : index
    %4 = vector.load %arg4[%c0_3, %c0_4] : memref<1x256xf32, #tpu.memory_space<vmem>>, vector<1x256xf32>
    %5 = vector.broadcast %4 : vector<1x256xf32> to vector<2x256xf32>
    %6 = arith.addf %3, %5 : vector<2x256xf32>
    %c0_5 = arith.constant 0 : index
    %c0_6 = arith.constant 0 : index
    %7 = vector.load %arg5[%c0_5, %c0_6] : memref<2x256xf32, #tpu.memory_space<vmem>>, vector<2x256xf32>
    tpu.vector_store %arg5[%c0_5, %c0_6], %6 {strides = array<i32>} : memref<2x256xf32, #tpu.memory_space<vmem>>, vector<2x256xf32>,
    return
  }
  func.func @transform_0(%arg0: i32, %arg1: i32) -> (i32, i32) {
    %c0_i32 = arith.constant 0 : i32
    %c0_i32_0 = arith.constant 0 : i32
    return %arg0, %c0_i32 : i32, i32
  }
  func.func @transform_1(%arg0: i32, %arg1: i32) -> (i32, i32) {
    %c0_i32 = arith.constant 0 : i32
    %c0_i32_0 = arith.constant 0 : i32
    return %c0_i32, %arg1 : i32, i32
  }
  func.func @transform_2(%arg0: i32, %arg1: i32) -> (i32, i32) {
    %c0_i32 = arith.constant 0 : i32
    %c0_i32_0 = arith.constant 0 : i32
    return %c0_i32, %arg1 : i32, i32
  }
  func.func @transform_3(%arg0: i32, %arg1: i32) -> (i32, i32) {
    %c0_i32 = arith.constant 0 : i32
    return %arg0, %arg1 : i32, i32
  }
}

module attributes {stable_mosaic.version = 11 : i64} {
  func.func @_matmul_bias_kernel(%arg0: i32, %arg1: i32, %arg2: memref<2x256xf32, #tpu.memory_space<vmem>>, %arg3: memref<256x512xbf16, #tpu.memory_space<vmem>>, %arg4: memref<1x512xf32, #tpu.memory_space<vmem>>, %arg5: memref<2x512xf32, #tpu.memory_space<vmem>>) attributes {dimension_semantics = [#tpu.dimension_semantics<parallel>, #tpu.dimension_semantics<parallel>], iteration_bounds = array<i64: 1, 1>, scalar_prefetch = 0 : i64, scratch_operands = 0 : i64, tpu.core_type = #tpu.core_type<tc>, window_params = [{transform_indices = @transform_0, window_bounds = array<i64: 2, 256>}, {transform_indices = @transform_1, window_bounds = array<i64: 256, 512>}, {transform_indices = @transform_2, window_bounds = array<i64: 1, 512>}, {transform_indices = @transform_3, window_bounds = array<i64: 2, 512>}]} {
    %c0 = arith.constant 0 : index
    %c0_0 = arith.constant 0 : index
    %0 = vector.load %arg2[%c0, %c0_0] : memref<2x256xf32, #tpu.memory_space<vmem>>, vector<2x256xf32>
    %1 = arith.truncf %0 : vector<2x256xf32> to vector<2x256xbf16>
    %c0_1 = arith.constant 0 : index
    %c0_2 = arith.constant 0 : index
    %2 = vector.load %arg3[%c0_1, %c0_2] : memref<256x512xbf16, #tpu.memory_space<vmem>>, vector<256x512xbf16>
    %cst = arith.constant dense<0.000000e+00> : vector<2x512xf32>
    %3 = tpu.matmul %1, %2, %cst {dimension_numbers = #tpu.dot_dimension_numbers<[1], [0], [0], [1], [0, 0, 1, 1], [], []>} : vector<2x256xbf16>, vector<256x512xbf16>, vector<2x512xf32> -> vector<2x512xf32>
    %c0_3 = arith.constant 0 : index
    %c0_4 = arith.constant 0 : index
    %4 = vector.load %arg4[%c0_3, %c0_4] : memref<1x512xf32, #tpu.memory_space<vmem>>, vector<1x512xf32>
    %5 = vector.broadcast %4 : vector<1x512xf32> to vector<2x512xf32>
    %6 = arith.addf %3, %5 : vector<2x512xf32>
    %c0_5 = arith.constant 0 : index
    %c0_6 = arith.constant 0 : index
    %7 = vector.load %arg5[%c0_5, %c0_6] : memref<2x512xf32, #tpu.memory_space<vmem>>, vector<2x512xf32>
    tpu.vector_store %arg5[%c0_5, %c0_6], %6 {strides = array<i32>} : memref<2x512xf32, #tpu.memory_space<vmem>>, vector<2x512xf32>,
    return
  }
  func.func @transform_0(%arg0: i32, %arg1: i32) -> (i32, i32) {
    %c0_i32 = arith.constant 0 : i32
    %c0_i32_0 = arith.constant 0 : i32
    return %arg0, %c0_i32 : i32, i32
  }
  func.func @transform_1(%arg0: i32, %arg1: i32) -> (i32, i32) {
    %c0_i32 = arith.constant 0 : i32
    %c0_i32_0 = arith.constant 0 : i32
    return %c0_i32, %arg1 : i32, i32
  }
  func.func @transform_2(%arg0: i32, %arg1: i32) -> (i32, i32) {
    %c0_i32 = arith.constant 0 : i32
    %c0_i32_0 = arith.constant 0 : i32
    return %c0_i32, %arg1 : i32, i32
  }
  func.func @transform_3(%arg0: i32, %arg1: i32) -> (i32, i32) {
    %c0_i32 = arith.constant 0 : i32
    return %arg0, %arg1 : i32, i32
  }
}

module attributes {stable_mosaic.version = 11 : i64} {
  func.func @_projector_kernel(%arg0: i32, %arg1: memref<8x128xf32, #tpu.memory_space<vmem>>, %arg2: memref<1x128xf32, #tpu.memory_space<vmem>>, %arg3: memref<1x128xf32, #tpu.memory_space<vmem>>, %arg4: memref<128x256xbf16, #tpu.memory_space<vmem>>, %arg5: memref<1x256xf32, #tpu.memory_space<vmem>>, %arg6: memref<1x256xf32, #tpu.memory_space<vmem>>, %arg7: memref<1x256xf32, #tpu.memory_space<vmem>>, %arg8: memref<256x256xbf16, #tpu.memory_space<vmem>>, %arg9: memref<1x256xf32, #tpu.memory_space<vmem>>, %arg10: memref<1x256xf32, #tpu.memory_space<vmem>>, %arg11: memref<1x256xf32, #tpu.memory_space<vmem>>, %arg12: memref<256x128xbf16, #tpu.memory_space<vmem>>, %arg13: memref<1x128xf32, #tpu.memory_space<vmem>>, %arg14: memref<8x128xf32, #tpu.memory_space<vmem>>) attributes {dimension_semantics = [#tpu.dimension_semantics<parallel>], iteration_bounds = array<i64: 1>, scalar_prefetch = 0 : i64, scratch_operands = 0 : i64, tpu.core_type = #tpu.core_type<tc>, window_params = [{transform_indices = @transform_0, window_bounds = array<i64: 8, 128>}, {pipeline_mode = #tpu.pipeline_mode<synchronous>, transform_indices = @transform_1, window_bounds = array<i64: 1, 128>}, {pipeline_mode = #tpu.pipeline_mode<synchronous>, transform_indices = @transform_2, window_bounds = array<i64: 1, 128>}, {pipeline_mode = #tpu.pipeline_mode<synchronous>, transform_indices = @transform_3, window_bounds = array<i64: 128, 256>}, {pipeline_mode = #tpu.pipeline_mode<synchronous>, transform_indices = @transform_4, window_bounds = array<i64: 1, 256>}, {pipeline_mode = #tpu.pipeline_mode<synchronous>, transform_indices = @transform_5, window_bounds = array<i64: 1, 256>}, {pipeline_mode = #tpu.pipeline_mode<synchronous>, transform_indices = @transform_6, window_bounds = array<i64: 1, 256>}, {pipeline_mode = #tpu.pipeline_mode<synchronous>, transform_indices = @transform_7, window_bounds = array<i64: 256, 256>}, {pipeline_mode = #tpu.pipeline_mode<synchronous>, transform_indices = @transform_8, window_bounds = array<i64: 1, 256>}, {pipeline_mode = #tpu.pipeline_mode<synchronous>, transform_indices = @transform_9, window_bounds = array<i64: 1, 256>}, {pipeline_mode = #tpu.pipeline_mode<synchronous>, transform_indices = @transform_10, window_bounds = array<i64: 1, 256>}, {pipeline_mode = #tpu.pipeline_mode<synchronous>, transform_indices = @transform_11, window_bounds = array<i64: 256, 128>}, {pipeline_mode = #tpu.pipeline_mode<synchronous>, transform_indices = @transform_12, window_bounds = array<i64: 1, 128>}, {transform_indices = @transform_13, window_bounds = array<i64: 8, 128>}]} {
    %c0 = arith.constant 0 : index
    %c0_0 = arith.constant 0 : index
    %0 = vector.load %arg1[%c0, %c0_0] : memref<8x128xf32, #tpu.memory_space<vmem>>, vector<8x128xf32>
    %c0_1 = arith.constant 0 : index
    %c0_2 = arith.constant 0 : index
    %1 = vector.load %arg2[%c0_1, %c0_2] : memref<1x128xf32, #tpu.memory_space<vmem>>, vector<1x128xf32>
    %c0_3 = arith.constant 0 : index
    %c0_4 = arith.constant 0 : index
    %2 = vector.load %arg3[%c0_3, %c0_4] : memref<1x128xf32, #tpu.memory_space<vmem>>, vector<1x128xf32>
    %cst = arith.constant dense<0.000000e+00> : vector<8xf32>
    %3 = vector.multi_reduction <add>, %0, %cst [1] : vector<8x128xf32> to vector<8xf32>
    %4 = vector.shape_cast %3 : vector<8xf32> to vector<8x1xf32>
    %cst_5 = arith.constant 1.280000e+02 : f32
    %5 = vector.broadcast %cst_5 : f32 to vector<8x1xf32>
    %6 = arith.divf %4, %5 : vector<8x1xf32>
    %7 = vector.broadcast %6 : vector<8x1xf32> to vector<8x128xf32>
    %8 = arith.subf %0, %7 : vector<8x128xf32>
    %9 = arith.mulf %8, %8 : vector<8x128xf32>
    %cst_6 = arith.constant dense<0.000000e+00> : vector<8xf32>
    %10 = vector.multi_reduction <add>, %9, %cst_6 [1] : vector<8x128xf32> to vector<8xf32>
    %11 = vector.shape_cast %10 : vector<8xf32> to vector<8x1xf32>
    %cst_7 = arith.constant 1.280000e+02 : f32
    %12 = vector.broadcast %cst_7 : f32 to vector<8x1xf32>
    %13 = arith.divf %11, %12 : vector<8x1xf32>
    %cst_8 = arith.constant 9.99999974E-6 : f32
    %14 = vector.broadcast %cst_8 : f32 to vector<8x1xf32>
    %15 = arith.addf %13, %14 : vector<8x1xf32>
    %16 = math.rsqrt %15 : vector<8x1xf32>
    %17 = vector.broadcast %16 : vector<8x1xf32> to vector<8x128xf32>
    %18 = arith.mulf %8, %17 : vector<8x128xf32>
    %19 = vector.broadcast %1 : vector<1x128xf32> to vector<8x128xf32>
    %20 = arith.mulf %18, %19 : vector<8x128xf32>
    %21 = vector.broadcast %2 : vector<1x128xf32> to vector<8x128xf32>
    %22 = arith.addf %20, %21 : vector<8x128xf32>
    %cst_9 = arith.constant 5.000000e-01 : f32
    %23 = vector.broadcast %cst_9 : f32 to vector<8x128xf32>
    %24 = arith.mulf %23, %22 : vector<8x128xf32>
    %cst_10 = arith.constant 2.000000e+00 : f32
    %25 = math.sqrt %cst_10 : f32
    %cst_11 = arith.constant 1.000000e+00 : f32
    %26 = arith.divf %cst_11, %25 : f32
    %27 = vector.broadcast %26 : f32 to vector<8x128xf32>
    %28 = arith.mulf %22, %27 : vector<8x128xf32>
    %29 = math.erf %28 : vector<8x128xf32>
    %cst_12 = arith.constant 1.000000e+00 : f32
    %30 = vector.broadcast %cst_12 : f32 to vector<8x128xf32>
    %31 = arith.addf %30, %29 : vector<8x128xf32>
    %32 = arith.mulf %24, %31 : vector<8x128xf32>
    %33 = arith.truncf %32 : vector<8x128xf32> to vector<8x128xbf16>
    %c0_13 = arith.constant 0 : index
    %c0_14 = arith.constant 0 : index
    %34 = vector.load %arg4[%c0_13, %c0_14] : memref<128x256xbf16, #tpu.memory_space<vmem>>, vector<128x256xbf16>
    %cst_15 = arith.constant dense<0.000000e+00> : vector<8x256xf32>
    %35 = tpu.matmul %33, %34, %cst_15 {dimension_numbers = #tpu.dot_dimension_numbers<[1], [0], [0], [1], [0, 0, 1, 1], [], []>} : vector<8x128xbf16>, vector<128x256xbf16>, vector<8x256xf32> -> vector<8x256xf32>
    %c0_16 = arith.constant 0 : index
    %c0_17 = arith.constant 0 : index
    %36 = vector.load %arg5[%c0_16, %c0_17] : memref<1x256xf32, #tpu.memory_space<vmem>>, vector<1x256xf32>
    %37 = vector.broadcast %36 : vector<1x256xf32> to vector<8x256xf32>
    %38 = arith.addf %35, %37 : vector<8x256xf32>
    %c0_18 = arith.constant 0 : index
    %c0_19 = arith.constant 0 : index
    %39 = vector.load %arg6[%c0_18, %c0_19] : memref<1x256xf32, #tpu.memory_space<vmem>>, vector<1x256xf32>
    %c0_20 = arith.constant 0 : index
    %c0_21 = arith.constant 0 : index
    %40 = vector.load %arg7[%c0_20, %c0_21] : memref<1x256xf32, #tpu.memory_space<vmem>>, vector<1x256xf32>
    %cst_22 = arith.constant dense<0.000000e+00> : vector<8xf32>
    %41 = vector.multi_reduction <add>, %38, %cst_22 [1] : vector<8x256xf32> to vector<8xf32>
    %42 = vector.shape_cast %41 : vector<8xf32> to vector<8x1xf32>
    %cst_23 = arith.constant 2.560000e+02 : f32
    %43 = vector.broadcast %cst_23 : f32 to vector<8x1xf32>
    %44 = arith.divf %42, %43 : vector<8x1xf32>
    %45 = vector.broadcast %44 : vector<8x1xf32> to vector<8x256xf32>
    %46 = arith.subf %38, %45 : vector<8x256xf32>
    %47 = arith.mulf %46, %46 : vector<8x256xf32>
    %cst_24 = arith.constant dense<0.000000e+00> : vector<8xf32>
    %48 = vector.multi_reduction <add>, %47, %cst_24 [1] : vector<8x256xf32> to vector<8xf32>
    %49 = vector.shape_cast %48 : vector<8xf32> to vector<8x1xf32>
    %cst_25 = arith.constant 2.560000e+02 : f32
    %50 = vector.broadcast %cst_25 : f32 to vector<8x1xf32>
    %51 = arith.divf %49, %50 : vector<8x1xf32>
    %cst_26 = arith.constant 9.99999974E-6 : f32
    %52 = vector.broadcast %cst_26 : f32 to vector<8x1xf32>
    %53 = arith.addf %51, %52 : vector<8x1xf32>
    %54 = math.rsqrt %53 : vector<8x1xf32>
    %55 = vector.broadcast %54 : vector<8x1xf32> to vector<8x256xf32>
    %56 = arith.mulf %46, %55 : vector<8x256xf32>
    %57 = vector.broadcast %39 : vector<1x256xf32> to vector<8x256xf32>
    %58 = arith.mulf %56, %57 : vector<8x256xf32>
    %59 = vector.broadcast %40 : vector<1x256xf32> to vector<8x256xf32>
    %60 = arith.addf %58, %59 : vector<8x256xf32>
    %cst_27 = arith.constant 5.000000e-01 : f32
    %61 = vector.broadcast %cst_27 : f32 to vector<8x256xf32>
    %62 = arith.mulf %61, %60 : vector<8x256xf32>
    %cst_28 = arith.constant 2.000000e+00 : f32
    %63 = math.sqrt %cst_28 : f32
    %cst_29 = arith.constant 1.000000e+00 : f32
    %64 = arith.divf %cst_29, %63 : f32
    %65 = vector.broadcast %64 : f32 to vector<8x256xf32>
    %66 = arith.mulf %60, %65 : vector<8x256xf32>
    %67 = math.erf %66 : vector<8x256xf32>
    %cst_30 = arith.constant 1.000000e+00 : f32
    %68 = vector.broadcast %cst_30 : f32 to vector<8x256xf32>
    %69 = arith.addf %68, %67 : vector<8x256xf32>
    %70 = arith.mulf %62, %69 : vector<8x256xf32>
    %71 = arith.truncf %70 : vector<8x256xf32> to vector<8x256xbf16>
    %c0_31 = arith.constant 0 : index
    %c0_32 = arith.constant 0 : index
    %72 = vector.load %arg8[%c0_31, %c0_32] : memref<256x256xbf16, #tpu.memory_space<vmem>>, vector<256x256xbf16>
    %cst_33 = arith.constant dense<0.000000e+00> : vector<8x256xf32>
    %73 = tpu.matmul %71, %72, %cst_33 {dimension_numbers = #tpu.dot_dimension_numbers<[1], [0], [0], [1], [0, 0, 1, 1], [], []>} : vector<8x256xbf16>, vector<256x256xbf16>, vector<8x256xf32> -> vector<8x256xf32>
    %c0_34 = arith.constant 0 : index
    %c0_35 = arith.constant 0 : index
    %74 = vector.load %arg9[%c0_34, %c0_35] : memref<1x256xf32, #tpu.memory_space<vmem>>, vector<1x256xf32>
    %75 = vector.broadcast %74 : vector<1x256xf32> to vector<8x256xf32>
    %76 = arith.addf %73, %75 : vector<8x256xf32>
    %c0_36 = arith.constant 0 : index
    %c0_37 = arith.constant 0 : index
    %77 = vector.load %arg10[%c0_36, %c0_37] : memref<1x256xf32, #tpu.memory_space<vmem>>, vector<1x256xf32>
    %c0_38 = arith.constant 0 : index
    %c0_39 = arith.constant 0 : index
    %78 = vector.load %arg11[%c0_38, %c0_39] : memref<1x256xf32, #tpu.memory_space<vmem>>, vector<1x256xf32>
    %cst_40 = arith.constant dense<0.000000e+00> : vector<8xf32>
    %79 = vector.multi_reduction <add>, %76, %cst_40 [1] : vector<8x256xf32> to vector<8xf32>
    %80 = vector.shape_cast %79 : vector<8xf32> to vector<8x1xf32>
    %cst_41 = arith.constant 2.560000e+02 : f32
    %81 = vector.broadcast %cst_41 : f32 to vector<8x1xf32>
    %82 = arith.divf %80, %81 : vector<8x1xf32>
    %83 = vector.broadcast %82 : vector<8x1xf32> to vector<8x256xf32>
    %84 = arith.subf %76, %83 : vector<8x256xf32>
    %85 = arith.mulf %84, %84 : vector<8x256xf32>
    %cst_42 = arith.constant dense<0.000000e+00> : vector<8xf32>
    %86 = vector.multi_reduction <add>, %85, %cst_42 [1] : vector<8x256xf32> to vector<8xf32>
    %87 = vector.shape_cast %86 : vector<8xf32> to vector<8x1xf32>
    %cst_43 = arith.constant 2.560000e+02 : f32
    %88 = vector.broadcast %cst_43 : f32 to vector<8x1xf32>
    %89 = arith.divf %87, %88 : vector<8x1xf32>
    %cst_44 = arith.constant 9.99999974E-6 : f32
    %90 = vector.broadcast %cst_44 : f32 to vector<8x1xf32>
    %91 = arith.addf %89, %90 : vector<8x1xf32>
    %92 = math.rsqrt %91 : vector<8x1xf32>
    %93 = vector.broadcast %92 : vector<8x1xf32> to vector<8x256xf32>
    %94 = arith.mulf %84, %93 : vector<8x256xf32>
    %95 = vector.broadcast %77 : vector<1x256xf32> to vector<8x256xf32>
    %96 = arith.mulf %94, %95 : vector<8x256xf32>
    %97 = vector.broadcast %78 : vector<1x256xf32> to vector<8x256xf32>
    %98 = arith.addf %96, %97 : vector<8x256xf32>
    %cst_45 = arith.constant 5.000000e-01 : f32
    %99 = vector.broadcast %cst_45 : f32 to vector<8x256xf32>
    %100 = arith.mulf %99, %98 : vector<8x256xf32>
    %cst_46 = arith.constant 2.000000e+00 : f32
    %101 = math.sqrt %cst_46 : f32
    %cst_47 = arith.constant 1.000000e+00 : f32
    %102 = arith.divf %cst_47, %101 : f32
    %103 = vector.broadcast %102 : f32 to vector<8x256xf32>
    %104 = arith.mulf %98, %103 : vector<8x256xf32>
    %105 = math.erf %104 : vector<8x256xf32>
    %cst_48 = arith.constant 1.000000e+00 : f32
    %106 = vector.broadcast %cst_48 : f32 to vector<8x256xf32>
    %107 = arith.addf %106, %105 : vector<8x256xf32>
    %108 = arith.mulf %100, %107 : vector<8x256xf32>
    %109 = arith.truncf %108 : vector<8x256xf32> to vector<8x256xbf16>
    %c0_49 = arith.constant 0 : index
    %c0_50 = arith.constant 0 : index
    %110 = vector.load %arg12[%c0_49, %c0_50] : memref<256x128xbf16, #tpu.memory_space<vmem>>, vector<256x128xbf16>
    %cst_51 = arith.constant dense<0.000000e+00> : vector<8x128xf32>
    %111 = tpu.matmul %109, %110, %cst_51 {dimension_numbers = #tpu.dot_dimension_numbers<[1], [0], [0], [1], [0, 0, 1, 1], [], []>} : vector<8x256xbf16>, vector<256x128xbf16>, vector<8x128xf32> -> vector<8x128xf32>
    %c0_52 = arith.constant 0 : index
    %c0_53 = arith.constant 0 : index
    %112 = vector.load %arg13[%c0_52, %c0_53] : memref<1x128xf32, #tpu.memory_space<vmem>>, vector<1x128xf32>
    %113 = vector.broadcast %112 : vector<1x128xf32> to vector<8x128xf32>
    %114 = arith.addf %111, %113 : vector<8x128xf32>
    %c0_54 = arith.constant 0 : index
    %c0_55 = arith.constant 0 : index
    %115 = vector.load %arg14[%c0_54, %c0_55] : memref<8x128xf32, #tpu.memory_space<vmem>>, vector<8x128xf32>
    tpu.vector_store %arg14[%c0_54, %c0_55], %114 {strides = array<i32>} : memref<8x128xf32, #tpu.memory_space<vmem>>, vector<8x128xf32>,
    return
  }
  func.func @transform_0(%arg0: i32) -> (i32, i32) {
    %c0_i32 = arith.constant 0 : i32
    %c0_i32_0 = arith.constant 0 : i32
    return %arg0, %c0_i32 : i32, i32
  }
  func.func @transform_1(%arg0: i32) -> (i32, i32) {
    %c0_i32 = arith.constant 0 : i32
    %c0_i32_0 = arith.constant 0 : i32
    %c0_i32_1 = arith.constant 0 : i32
    return %c0_i32, %c0_i32_0 : i32, i32
  }
  func.func @transform_2(%arg0: i32) -> (i32, i32) {
    %c0_i32 = arith.constant 0 : i32
    %c0_i32_0 = arith.constant 0 : i32
    %c0_i32_1 = arith.constant 0 : i32
    return %c0_i32, %c0_i32_0 : i32, i32
  }
  func.func @transform_3(%arg0: i32) -> (i32, i32) {
    %c0_i32 = arith.constant 0 : i32
    %c0_i32_0 = arith.constant 0 : i32
    %c0_i32_1 = arith.constant 0 : i32
    return %c0_i32, %c0_i32_0 : i32, i32
  }
  func.func @transform_4(%arg0: i32) -> (i32, i32) {
    %c0_i32 = arith.constant 0 : i32
    %c0_i32_0 = arith.constant 0 : i32
    %c0_i32_1 = arith.constant 0 : i32
    return %c0_i32, %c0_i32_0 : i32, i32
  }
  func.func @transform_5(%arg0: i32) -> (i32, i32) {
    %c0_i32 = arith.constant 0 : i32
    %c0_i32_0 = arith.constant 0 : i32
    %c0_i32_1 = arith.constant 0 : i32
    return %c0_i32, %c0_i32_0 : i32, i32
  }
  func.func @transform_6(%arg0: i32) -> (i32, i32) {
    %c0_i32 = arith.constant 0 : i32
    %c0_i32_0 = arith.constant 0 : i32
    %c0_i32_1 = arith.constant 0 : i32
    return %c0_i32, %c0_i32_0 : i32, i32
  }
  func.func @transform_7(%arg0: i32) -> (i32, i32) {
    %c0_i32 = arith.constant 0 : i32
    %c0_i32_0 = arith.constant 0 : i32
    %c0_i32_1 = arith.constant 0 : i32
    return %c0_i32, %c0_i32_0 : i32, i32
  }
  func.func @transform_8(%arg0: i32) -> (i32, i32) {
    %c0_i32 = arith.constant 0 : i32
    %c0_i32_0 = arith.constant 0 : i32
    %c0_i32_1 = arith.constant 0 : i32
    return %c0_i32, %c0_i32_0 : i32, i32
  }
  func.func @transform_9(%arg0: i32) -> (i32, i32) {
    %c0_i32 = arith.constant 0 : i32
    %c0_i32_0 = arith.constant 0 : i32
    %c0_i32_1 = arith.constant 0 : i32
    return %c0_i32, %c0_i32_0 : i32, i32
  }
  func.func @transform_10(%arg0: i32) -> (i32, i32) {
    %c0_i32 = arith.constant 0 : i32
    %c0_i32_0 = arith.constant 0 : i32
    %c0_i32_1 = arith.constant 0 : i32
    return %c0_i32, %c0_i32_0 : i32, i32
  }
  func.func @transform_11(%arg0: i32) -> (i32, i32) {
    %c0_i32 = arith.constant 0 : i32
    %c0_i32_0 = arith.constant 0 : i32
    %c0_i32_1 = arith.constant 0 : i32
    return %c0_i32, %c0_i32_0 : i32, i32
  }
  func.func @transform_12(%arg0: i32) -> (i32, i32) {
    %c0_i32 = arith.constant 0 : i32
    %c0_i32_0 = arith.constant 0 : i32
    %c0_i32_1 = arith.constant 0 : i32
    return %c0_i32, %c0_i32_0 : i32, i32
  }
  func.func @transform_13(%arg0: i32) -> (i32, i32) {
    %c0_i32 = arith.constant 0 : i32
    %c0_i32_0 = arith.constant 0 : i32
    return %arg0, %c0_i32 : i32, i32
  }
}

</mosaic_0001>

<bundles_post_ra>
// kernel: tpu_custom_call.1
= control target key start
LH: loop header
LB: loop body
LE: loop exit
PB: predicated region body
PF: predicated region fallthrough
CT: control target
= control target key end

     0   :  { %18 = vsyncpa [#allocation3], 0  ;;  %s1777_s0 = inlined_call_operand.hbm [shape: f32[8,128], index: 0, kind: input, shape index: {}]   ;;  %s1778_s1 = inlined_call_operand.hbm [shape: f32[1,128], index: 1, kind: input, shape index: {}]   ;;  %s1779_s2 = inlined_call_operand.hbm [shape: f32[1,128], index: 2, kind: input, shape index: {}]   ;;  %s1780_s3 = inlined_call_operand.hbm [shape: bf16[128,256], index: 3, kind: input, shape index: {}]   ;;  %s1781_s4 = inlined_call_operand.hbm [shape: f32[1,256], index: 4, kind: input, shape index: {}]   ;;  %s1782_s5 = inlined_call_operand.hbm [shape: f32[1,256], index: 5, kind: input, shape index: {}]   ;;  %s1783_s6 = inlined_call_operand.hbm [shape: f32[1,256], index: 6, kind: input, shape index: {}]   ;;  %s1784_s7 = inlined_call_operand.hbm [shape: bf16[256,256], index: 7, kind: input, shape index: {}]   ;;  %s1785_s8 = inlined_call_operand.hbm [shape: f32[1,256], index: 8, kind: input, shape index: {}]   ;;  %s1786_s9 = inlined_call_operand.hbm [shape: f32[1,256], index: 9, kind: input, shape index: {}]   ;;  %s1787_s10 = inlined_call_operand.hbm [shape: f32[1,256], index: 10, kind: input, shape index: {}]   ;;  %s1788_s11 = inlined_call_operand.hbm [shape: bf16[256,128], index: 11, kind: input, shape index: {}]   ;;  %s1789_s12 = inlined_call_operand.hbm [shape: f32[1,128], index: 12, kind: input, shape index: {}]   ;;  %s1790_s13 = inlined_call_operand.hbm [shape: f32[8,128], index: 13, kind: output, shape index: {}]  }
   0x1   :  { %19 = vsyncpa [#allocation6], 0 }
   0x2   :  { %20 = vsyncpa [#allocation9], 0 }
   0x3   :  { %21 = vsyncpa [#allocation12], 0 }
   0x4   :  { %22 = vsyncpa [#allocation15], 0 }
   0x5   :  { %23 = vsyncpa [#allocation18], 0 }
   0x6   :  { %24 = vsyncpa [#allocation21], 0 }
   0x7   :  { %25 = vsyncpa [#allocation4], 0  ;;  %s1477_s25 = smov [#allocation5]   ;;  %s1478_s27 = smov [#allocation8]  }
   0x8   :  { %s42_s26 = sshll.u32 %s1477_s25, 4  ;;  %s61_s28 = sshll.u32 %s1478_s27, 4  ;;  %s43_s26 = int_to_ptr.vmem [resolvable:$true] %s42_s26  ;;  %s1566_s28 = int_to_ptr.vmem [resolvable:$true] %s61_s28 }
   0x9   :  { %s1153_s14 = scalar_lea.hbm %s1778_s1, 16 }
   0xa   :  { %p1154_p0 = scmp.ne.s32.totalorder %s1778_s1, %s1153_s14  ;;  %p1157_p1 = scmp.lt.u32.totalorder %s1153_s14, %s1778_s1 }
   0xc   :  { %p1159_p2 = pnand %p1157_p1, %p1154_p0 }
   0xe   :  { %1162 = shalt.err (!%p1159_p2)
}
   0xf   :  { %s1163_s19 = scalar_lea.vmem %s43_s26, 16  ;;  %s1167_s20 = scalar_lea.vmem %s43_s26, 32 }
  0x10   :  { %p1164_p3 = scmp.ne.s32.totalorder %s43_s26, %s1163_s19  ;;  %p1168_p4 = scmp.lt.s32.totalorder %s43_s26, %s43_s26 }
  0x11   :  { %p1169_p5 = scmp.lt.s32.totalorder %s1167_s20, %s1163_s19 }
  0x13   :  { %p1170_p6 = por %p1169_p5, %p1168_p4 }
  0x15   :  { %p1171_p7 = pnand %p1170_p6, %p1164_p3 }
  0x17   :  { %1174 = shalt.err (!%p1171_p7)
}
  0x18   :  { %45 = dma.hbm_to_vmem [thread:$0]  %s1778_s1, 16, %s43_s26, [#allocation6]  }
  0x19   :  { %s1175_s25 = scalar_lea.hbm %s1780_s3, 2048 }
  0x1a   :  { %p1176_p8 = scmp.ne.s32.totalorder %s1780_s3, %s1175_s25  ;;  %p1179_p9 = scmp.lt.u32.totalorder %s1175_s25, %s1780_s3 }
  0x1c   :  { %p1181_p10 = pnand %p1179_p9, %p1176_p8 }
  0x1e   :  { %1184 = shalt.err (!%p1181_p10)
}
  0x1f   :  { %s1185_s15 = scalar_lea.vmem %s1566_s28, 2048  ;;  %p1190_p12 = scmp.lt.s32.totalorder %s1566_s28, %s1566_s28 }
  0x20   :  { %p1186_p11 = scmp.ne.s32.totalorder %s1566_s28, %s1185_s15  ;;  %p1191_p13 = scmp.lt.s32.totalorder %s1185_s15, %s1185_s15 }
  0x22   :  { %p1192_p0 = por %p1191_p13, %p1190_p12 }
  0x24   :  { %p1193_p1 = pnand %p1192_p0, %p1186_p11 }
  0x26   :  { %1196 = shalt.err (!%p1193_p1)
}
  0x27   :  { %s1479_s1 = smov 128   ;;  %s1480_s26 = smov 8  }
  0x28   :  { %67 = dma.hbm_to_vmem [thread:$0]  %s1780_s3, 2048, %s1566_s28, [#allocation9], %s1479_s1, %s1479_s1, %s1480_s26  }
  0x29   :  { %s1481_s18 = smov [#allocation11]   ;;  %s1482_s20 = smov [#allocation14]  }
  0x2a   :  { %s84_s19 = sshll.u32 %s1481_s18, 4  ;;  %s103_s21 = sshll.u32 %s1482_s20, 4  ;;  %s85_s19 = int_to_ptr.vmem [resolvable:$true] %s84_s19  ;;  %s1600_s21 = int_to_ptr.vmem [resolvable:$true] %s103_s21 }
  0x2b   :  { %s1197_s24 = scalar_lea.hbm %s1782_s5, 32 }
  0x2c   :  { %p1198_p2 = scmp.ne.s32.totalorder %s1782_s5, %s1197_s24  ;;  %p1201_p3 = scmp.lt.u32.totalorder %s1197_s24, %s1782_s5 }
  0x2e   :  { %p1203_p4 = pnand %p1201_p3, %p1198_p2 }
  0x30   :  { %1206 = shalt.err (!%p1203_p4)
}
  0x31   :  { %s1207_s3 = scalar_lea.vmem %s85_s19, 32  ;;  %p1212_p6 = scmp.lt.s32.totalorder %s85_s19, %s85_s19 }
  0x32   :  { %p1208_p5 = scmp.ne.s32.totalorder %s85_s19, %s1207_s3  ;;  %p1213_p7 = scmp.lt.s32.totalorder %s1207_s3, %s1207_s3 }
  0x34   :  { %p1214_p8 = por %p1213_p7, %p1212_p6 }
  0x36   :  { %p1215_p9 = pnand %p1214_p8, %p1208_p5 }
  0x38   :  { %1218 = shalt.err (!%p1215_p9)
}
  0x39   :  { %87 = dma.hbm_to_vmem [thread:$0]  %s1782_s5, 32, %s85_s19, [#allocation12]  }
  0x3a   :  { %s1219_s17 = scalar_lea.hbm %s1784_s7, 4096 }
  0x3b   :  { %p1220_p10 = scmp.ne.s32.totalorder %s1784_s7, %s1219_s17  ;;  %p1223_p11 = scmp.lt.u32.totalorder %s1219_s17, %s1784_s7 }
  0x3d   :  { %p1225_p12 = pnand %p1223_p11, %p1220_p10 }
  0x3f   :  { %1228 = shalt.err (!%p1225_p12)
}
  0x40   :  { %s1229_s24 = scalar_lea.vmem %s1600_s21, 4096  ;;  %p1234_p0 = scmp.lt.s32.totalorder %s1600_s21, %s1600_s21 }
  0x41   :  { %p1230_p13 = scmp.ne.s32.totalorder %s1600_s21, %s1229_s24  ;;  %p1235_p1 = scmp.lt.s32.totalorder %s1229_s24, %s1229_s24 }
  0x43   :  { %p1236_p2 = por %p1235_p1, %p1234_p0 }
  0x45   :  { %p1237_p3 = pnand %p1236_p2, %p1230_p13 }
  0x47   :  { %1240 = shalt.err (!%p1237_p3)
}
  0x48   :  { %109 = dma.hbm_to_vmem [thread:$0]  %s1784_s7, 4096, %s1600_s21, [#allocation15], %s1479_s1, %s1479_s1, %s1480_s26  }
  0x49   :  { %s1483_s25 = smov [#allocation17]   ;;  %s1484_s29 = smov [#allocation20]  }
  0x4a   :  { %s126_s27 = sshll.u32 %s1483_s25, 4  ;;  %s145_s30 = sshll.u32 %s1484_s29, 4  ;;  %s127_s27 = int_to_ptr.vmem [resolvable:$true] %s126_s27  ;;  %s1634_s30 = int_to_ptr.vmem [resolvable:$true] %s145_s30 }
  0x4b   :  { %s1241_s14 = scalar_lea.hbm %s1786_s9, 32 }
  0x4c   :  { %p1242_p4 = scmp.ne.s32.totalorder %s1786_s9, %s1241_s14  ;;  %p1245_p5 = scmp.lt.u32.totalorder %s1241_s14, %s1786_s9 }
  0x4e   :  { %p1247_p6 = pnand %p1245_p5, %p1242_p4 }
  0x50   :  { %1250 = shalt.err (!%p1247_p6)
}
  0x51   :  { %s1251_s7 = scalar_lea.vmem %s127_s27, 32  ;;  %p1256_p8 = scmp.lt.s32.totalorder %s127_s27, %s127_s27 }
  0x52   :  { %p1252_p7 = scmp.ne.s32.totalorder %s127_s27, %s1251_s7  ;;  %p1257_p9 = scmp.lt.s32.totalorder %s1251_s7, %s1251_s7 }
  0x54   :  { %p1258_p10 = por %p1257_p9, %p1256_p8 }
  0x56   :  { %p1259_p11 = pnand %p1258_p10, %p1252_p7 }
  0x58   :  { %1262 = shalt.err (!%p1259_p11)
}
  0x59   :  { %129 = dma.hbm_to_vmem [thread:$0]  %s1786_s9, 32, %s127_s27, [#allocation18]  }
  0x5a   :  { %s1263_s22 = scalar_lea.hbm %s1788_s11, 2048 }
  0x5b   :  { %p1264_p12 = scmp.ne.s32.totalorder %s1788_s11, %s1263_s22  ;;  %p1267_p13 = scmp.lt.u32.totalorder %s1263_s22, %s1788_s11 }
  0x5d   :  { %p1269_p0 = pnand %p1267_p13, %p1264_p12 }
  0x5f   :  { %1272 = shalt.err (!%p1269_p0)
}
  0x60   :  { %s1273_s25 = scalar_lea.vmem %s1634_s30, 2048  ;;  %p1278_p2 = scmp.lt.s32.totalorder %s1634_s30, %s1634_s30 }
  0x61   :  { %p1274_p1 = scmp.ne.s32.totalorder %s1634_s30, %s1273_s25  ;;  %p1279_p3 = scmp.lt.s32.totalorder %s1273_s25, %s1273_s25 }
  0x63   :  { %p1280_p4 = por %p1279_p3, %p1278_p2 }
  0x65   :  { %p1281_p5 = pnand %p1280_p4, %p1274_p1 }
  0x67   :  { %1284 = shalt.err (!%p1281_p5)
}
  0x68   :  { %s1485_s9 = smov 64   ;;  %s1486_s27 = smov 4  }
  0x69   :  { %151 = dma.hbm_to_vmem [thread:$0]  %s1788_s11, 2048, %s1634_s30, [#allocation21], %s1485_s9, %s1485_s9, %s1486_s27  }
  0x6a   :  { %s1487_s28 = smov [#allocation2]   ;;  %s1488_s15 = smov [#allocation7]  }
  0x6b   :  { %s32_s14 = sshll.u32 %s1487_s28, 4  ;;  %s52_s16 = sshll.u32 %s1488_s15, 4  ;;  %s33_s14 = int_to_ptr.vmem [resolvable:$true] %s32_s14  ;;  %s53_s16 = int_to_ptr.vmem [resolvable:$true] %s52_s16 }
  0x6c   :  { %s1285_s7 = scalar_lea.hbm %s1777_s0, 128 }
  0x6d   :  { %p1286_p6 = scmp.ne.s32.totalorder %s1777_s0, %s1285_s7  ;;  %p1289_p7 = scmp.lt.u32.totalorder %s1285_s7, %s1777_s0 }
  0x6f   :  { %p1291_p8 = pnand %p1289_p7, %p1286_p6 }
  0x71   :  { %1294 = shalt.err (!%p1291_p8)
}
  0x72   :  { %s1295_s11 = scalar_lea.vmem %s33_s14, 128  ;;  %p1300_p10 = scmp.lt.s32.totalorder %s33_s14, %s33_s14 }
  0x73   :  { %p1296_p9 = scmp.ne.s32.totalorder %s33_s14, %s1295_s11  ;;  %p1301_p11 = scmp.lt.s32.totalorder %s1295_s11, %s1295_s11 }
  0x75   :  { %p1302_p12 = por %p1301_p11, %p1300_p10 }
  0x77   :  { %p1303_p13 = pnand %p1302_p12, %p1296_p9 }
  0x79   :  { %1306 = shalt.err (!%p1303_p13)
}
  0x7a   :  { %35 = dma.hbm_to_vmem [thread:$0]  %s1777_s0, 128, %s33_s14, [#allocation3]  }
  0x7b   :  { %s1307_s5 = scalar_lea.hbm %s1779_s2, 16 }
  0x7c   :  { %p1308_p0 = scmp.ne.s32.totalorder %s1779_s2, %s1307_s5  ;;  %p1311_p1 = scmp.lt.u32.totalorder %s1307_s5, %s1779_s2 }
  0x7e   :  { %p1313_p2 = pnand %p1311_p1, %p1308_p0 }
  0x80   :  { %1316 = shalt.err (!%p1313_p2)
}
  0x81   :  { %s1317_s29 = scalar_lea.vmem %s53_s16, 16  ;;  %s1321_s3 = scalar_lea.vmem %s53_s16, 32 }
  0x82   :  { %p1318_p3 = scmp.ne.s32.totalorder %s53_s16, %s1317_s29  ;;  %p1322_p4 = scmp.lt.s32.totalorder %s53_s16, %s53_s16 }
  0x83   :  { %p1323_p5 = scmp.lt.s32.totalorder %s1321_s3, %s1317_s29 }
  0x85   :  { %p1324_p6 = por %p1323_p5, %p1322_p4 }
  0x87   :  { %p1325_p7 = pnand %p1324_p6, %p1318_p3 }
  0x89   :  { %1328 = shalt.err (!%p1325_p7)
}
  0x8a   :  { %55 = dma.hbm_to_vmem [thread:$0]  %s1779_s2, 16, %s53_s16, [#allocation6]  }
  0x8b   :  { %s1489_s14 = smov [#allocation10]   ;;  %s1490_s17 = smov [#allocation13]  }
  0x8c   :  { %s74_s15 = sshll.u32 %s1489_s14, 4  ;;  %s94_s18 = sshll.u32 %s1490_s17, 4  ;;  %s75_s15 = int_to_ptr.vmem [resolvable:$true] %s74_s15  ;;  %s95_s18 = int_to_ptr.vmem [resolvable:$true] %s94_s18 }
  0x8d   :  { %s1329_s26 = scalar_lea.hbm %s1781_s4, 32 }
  0x8e   :  { %p1330_p8 = scmp.ne.s32.totalorder %s1781_s4, %s1329_s26  ;;  %p1333_p9 = scmp.lt.u32.totalorder %s1329_s26, %s1781_s4 }
  0x90   :  { %p1335_p10 = pnand %p1333_p9, %p1330_p8 }
  0x92   :  { %1338 = shalt.err (!%p1335_p10)
}
  0x93   :  { %s1339_s2 = scalar_lea.vmem %s75_s15, 32  ;;  %p1344_p12 = scmp.lt.s32.totalorder %s75_s15, %s75_s15 }
  0x94   :  { %p1340_p11 = scmp.ne.s32.totalorder %s75_s15, %s1339_s2  ;;  %p1345_p13 = scmp.lt.s32.totalorder %s1339_s2, %s1339_s2 }
  0x96   :  { %p1346_p0 = por %p1345_p13, %p1344_p12 }
  0x98   :  { %p1347_p1 = pnand %p1346_p0, %p1340_p11 }
  0x9a   :  { %1350 = shalt.err (!%p1347_p1)
}
  0x9b   :  { %77 = dma.hbm_to_vmem [thread:$0]  %s1781_s4, 32, %s75_s15, [#allocation9]  }
  0x9c   :  { %s1351_s5 = scalar_lea.hbm %s1783_s6, 32 }
  0x9d   :  { %p1352_p2 = scmp.ne.s32.totalorder %s1783_s6, %s1351_s5  ;;  %p1355_p3 = scmp.lt.u32.totalorder %s1351_s5, %s1783_s6 }
  0x9f   :  { %p1357_p4 = pnand %p1355_p3, %p1352_p2 }
  0xa1   :  { %1360 = shalt.err (!%p1357_p4)
}
  0xa2   :  { %s1361_s29 = scalar_lea.vmem %s95_s18, 32  ;;  %p1366_p6 = scmp.lt.s32.totalorder %s95_s18, %s95_s18 }
  0xa3   :  { %p1362_p5 = scmp.ne.s32.totalorder %s95_s18, %s1361_s29  ;;  %p1367_p7 = scmp.lt.s32.totalorder %s1361_s29, %s1361_s29 }
  0xa5   :  { %p1368_p8 = por %p1367_p7, %p1366_p6 }
  0xa7   :  { %p1369_p9 = pnand %p1368_p8, %p1362_p5 }
  0xa9   :  { %1372 = shalt.err (!%p1369_p9)
}
  0xaa   :  { %97 = dma.hbm_to_vmem [thread:$0]  %s1783_s6, 32, %s95_s18, [#allocation12]  }
  0xab   :  { %s1491_s0 = smov [#allocation16]   ;;  %s1492_s14 = smov [#allocation19]  }
  0xac   :  { %s116_s28 = sshll.u32 %s1491_s0, 4  ;;  %s136_s15 = sshll.u32 %s1492_s14, 4  ;;  %s117_s28 = int_to_ptr.vmem [resolvable:$true] %s116_s28  ;;  %s137_s15 = int_to_ptr.vmem [resolvable:$true] %s136_s15 }
  0xad   :  { %s1373_s1 = scalar_lea.hbm %s1785_s8, 32 }
  0xae   :  { %p1374_p10 = scmp.ne.s32.totalorder %s1785_s8, %s1373_s1  ;;  %p1377_p11 = scmp.lt.u32.totalorder %s1373_s1, %s1785_s8 }
  0xb0   :  { %p1379_p12 = pnand %p1377_p11, %p1374_p10 }
  0xb2   :  { %1382 = shalt.err (!%p1379_p12)
}
  0xb3   :  { %s1383_s6 = scalar_lea.vmem %s117_s28, 32  ;;  %p1388_p0 = scmp.lt.s32.totalorder %s117_s28, %s117_s28 }
  0xb4   :  { %p1384_p13 = scmp.ne.s32.totalorder %s117_s28, %s1383_s6  ;;  %p1389_p1 = scmp.lt.s32.totalorder %s1383_s6, %s1383_s6 }
  0xb6   :  { %p1390_p2 = por %p1389_p1, %p1388_p0 }
  0xb8   :  { %p1391_p3 = pnand %p1390_p2, %p1384_p13 }
  0xba   :  { %1394 = shalt.err (!%p1391_p3)
}
  0xbb   :  { %119 = dma.hbm_to_vmem [thread:$0]  %s1785_s8, 32, %s117_s28, [#allocation15]  }
  0xbc   :  { %s1395_s22 = scalar_lea.hbm %s1787_s10, 32 }
  0xbd   :  { %p1396_p4 = scmp.ne.s32.totalorder %s1787_s10, %s1395_s22  ;;  %p1399_p5 = scmp.lt.u32.totalorder %s1395_s22, %s1787_s10 }
  0xbf   :  { %p1401_p6 = pnand %p1399_p5, %p1396_p4 }
  0xc1   :  { %1404 = shalt.err (!%p1401_p6)
}
  0xc2   :  { %s1405_s25 = scalar_lea.vmem %s137_s15, 32  ;;  %p1410_p8 = scmp.lt.s32.totalorder %s137_s15, %s137_s15 }
  0xc3   :  { %p1406_p7 = scmp.ne.s32.totalorder %s137_s15, %s1405_s25  ;;  %p1411_p9 = scmp.lt.s32.totalorder %s1405_s25, %s1405_s25 }
  0xc5   :  { %p1412_p10 = por %p1411_p9, %p1410_p8 }
  0xc7   :  { %p1413_p11 = pnand %p1412_p10, %p1406_p7 }
  0xc9   :  { %1416 = shalt.err (!%p1413_p11)
}
  0xca   :  { %139 = dma.hbm_to_vmem [thread:$0]  %s1787_s10, 32, %s137_s15, [#allocation18]  }
  0xcb   :  { %s1493_s27 = smov [#allocation22]   ;;  %s1417_s0 = scalar_lea.hbm %s1789_s12, 16 }
  0xcc   :  { %s158_s29 = sshll.u32 %s1493_s27, 4  ;;  %p1418_p12 = scmp.ne.s32.totalorder %s1789_s12, %s1417_s0  ;;  %s159_s29 = int_to_ptr.vmem [resolvable:$true] %s158_s29 }
  0xcd   :  { %p1421_p13 = scmp.lt.u32.totalorder %s1417_s0, %s1789_s12 }
  0xcf   :  { %p1423_p0 = pnand %p1421_p13, %p1418_p12 }
  0xd1   :  { %1426 = shalt.err (!%p1423_p0)
}
  0xd2   :  { %s1427_s1 = scalar_lea.vmem %s159_s29, 16  ;;  %s1431_s10 = scalar_lea.vmem %s159_s29, 32 }
  0xd3   :  { %p1428_p1 = scmp.ne.s32.totalorder %s159_s29, %s1427_s1  ;;  %p1432_p2 = scmp.lt.s32.totalorder %s159_s29, %s159_s29 }
  0xd4   :  { %p1433_p3 = scmp.lt.s32.totalorder %s1431_s10, %s1427_s1 }
  0xd6   :  { %p1434_p4 = por %p1433_p3, %p1432_p2 }
  0xd8   :  { %p1435_p5 = pnand %p1434_p4, %p1428_p1 }
  0xda   :  { %1438 = shalt.err (!%p1435_p5)
}
  0xdb   :  { %161 = dma.hbm_to_vmem [thread:$0]  %s1789_s12, 16, %s159_s29, [#allocation21]  }
  0xdc   :  { %1461 = dma.done.wait [#allocation3], 128  }
  0xdd   :  { %1462 = vsyncadd [#allocation3], 4294967168 }
  0xde   :  { %1463 = dma.done.wait [#allocation6], 32  }
  0xdf   :  { %1464 = vsyncadd [#allocation6], 4294967264 }
  0xe0   :  { %1465 = dma.done.wait [#allocation9], 2080  }
  0xe1   :  { %1466 = vsyncadd [#allocation9], 4294965216 }
  0xe2   :  { %1467 = dma.done.wait [#allocation12], 64  }
  0xe3   :  { %1468 = vsyncadd [#allocation12], 4294967232 }
  0xe4   :  { %1469 = dma.done.wait [#allocation15], 4128  }
  0xe5   :  { %1470 = vsyncadd [#allocation15], 4294963168 }
  0xe6   :  { %1471 = dma.done.wait [#allocation18], 64  }
  0xe7   :  { %1472 = vsyncadd [#allocation18], 4294967232 }
  0xe8   :  { %1473 = dma.done.wait [#allocation21], 2064  }
  0xe9   :  { %1474 = vsyncadd [#allocation21], 4294965232  ;;  %v202_v0 = vld [vmem:[#allocation2] sm:$0xff]  ;;  %v1049_v5 = vld [vmem:[#allocation8 + $0x4] ss:$8 sps:$4 sm:$0xff]   ;;  %v1494_v10 = vmov 0   ;;  %v255_v37 = vlaneseq }
  0xea   :  { %205 = vadd.xlane.f32.xlu0 %v202_v0  ;;  %v1051_v6 = vld [vmem:[#allocation8] ss:$8 sps:$4 sm:$0xff]   ;;  %v1052_v7 = vld [vmem:[#allocation8 + $0x14] ss:$8 sps:$4 sm:$0xff]   ;;  %345 = vmatprep.subr.bf16.mxu0 %v1049_v5  ;;  %v1054_v8 = vld [vmem:[#allocation8 + $0x10] ss:$8 sps:$4 sm:$0xff]  }
  0xeb   :  { %346 = vmatpush1.bf16.msra.mxu0 %v1051_v6  ;;  %v1055_v9 = vld [vmem:[#allocation8 + $0x24] ss:$8 sps:$4 sm:$0xff]   ;;  %377 = vmatprep.mubr.bf16.mxu0 %v1494_v10  ;;  %v1057_v11 = vld [vmem:[#allocation8 + $0x20] ss:$8 sps:$4 sm:$0xff]   ;;  %v1058_v12 = vld [vmem:[#allocation8 + $0x34] ss:$8 sps:$4 sm:$0xff]  }
  0xec   :  { %347 = vmatprep.subr.bf16.mxu0 %v1052_v7  ;;  %v1060_v13 = vld [vmem:[#allocation8 + $0x30] ss:$8 sps:$4 sm:$0xff]   ;;  %v1061_v14 = vld [vmem:[#allocation8 + $0x44] ss:$8 sps:$4 sm:$0xff]   ;;  %v1063_v15 = vld [vmem:[#allocation8 + $0x40] ss:$8 sps:$4 sm:$0xff]  }
  0xed   :  { %v1064_v16 = vld [vmem:[#allocation8 + $0x54] ss:$8 sps:$4 sm:$0xff]   ;;  %v1066_v17 = vld [vmem:[#allocation8 + $0x50] ss:$8 sps:$4 sm:$0xff]   ;;  %v1067_v18 = vld [vmem:[#allocation8 + $0x64] ss:$8 sps:$4 sm:$0xff]  }
  0xee   :  { %v1069_v19 = vld [vmem:[#allocation8 + $0x60] ss:$8 sps:$4 sm:$0xff]   ;;  %v1070_v20 = vld [vmem:[#allocation8 + $0x74] ss:$8 sps:$4 sm:$0xff]   ;;  %v1072_v21 = vld [vmem:[#allocation8 + $0x70] ss:$8 sps:$4 sm:$0xff]  }
  0xef   :  { %348 = vmatpush1.bf16.msra.mxu0 %v1054_v8  ;;  %v941_v26 = vld [vmem:[#allocation5] ss:$0 sm:$0xff]  ;;  %v942_v28 = vld [vmem:[#allocation7] ss:$0 sm:$0xff]  ;;  %v256_v38 = vshrl.u32 %v255_v37, 7  ;;  %s1495_s12 = smov [#allocation23]  }
  0xf0   :  { %349 = vmatprep.subr.bf16.mxu0 %v1055_v9  ;;  %v253_v40 = vld [vmem:[#allocation10] sm:$0x3]  ;;  %v1073_v51 = vld [vmem:[#allocation14 + $0x4] ss:$8 sps:$4 sm:$0xff]   ;;  %v1075_v52 = vld [vmem:[#allocation14] ss:$8 sps:$4 sm:$0xff]  }
  0xf1   :  { %v1749_v39 = vsub.s32 0, %v256_v38  ;;  %v1751_v41 = vsub.s32 1, %v256_v38  ;;  %v1076_v53 = vld [vmem:[#allocation14 + $0x14] ss:$8 sps:$4 sm:$0xff]   ;;  %647 = vmatprep.subr.bf16.mxu1 %v1073_v51  ;;  %v1078_v54 = vld [vmem:[#allocation14 + $0x10] ss:$8 sps:$4 sm:$0xff]  }
  0xf2   :  { %648 = vmatpush1.bf16.msra.mxu1 %v1075_v52  ;;  %v1079_v55 = vld [vmem:[#allocation14 + $0x24] ss:$8 sps:$4 sm:$0xff]   ;;  %v1081_v56 = vld [vmem:[#allocation14 + $0x20] ss:$8 sps:$4 sm:$0xff]   ;;  %v1082_v57 = vld [vmem:[#allocation14 + $0x34] ss:$8 sps:$4 sm:$0xff]  }
  0xf3   :  { %350 = vmatpush1.bf16.msra.mxu0 %v1057_v11  ;;  %v258_v42 = vrot.slane %v253_v40, %v1749_v39  ;;  %v262_v43 = vrot.slane %v253_v40, %v1751_v41  ;;  %649 = vmatprep.subr.bf16.mxu1 %v1076_v53  ;;  %v1084_v58 = vld [vmem:[#allocation14 + $0x30] ss:$8 sps:$4 sm:$0xff]   ;;  %v1085_v59 = vld [vmem:[#allocation14 + $0x44] ss:$8 sps:$4 sm:$0xff]   ;;  %v1087_v60 = vld [vmem:[#allocation14 + $0x40] ss:$8 sps:$4 sm:$0xff]  }
  0xf4   :  { %351 = vmatprep.subr.bf16.mxu0 %v1058_v12  ;;  %v1088_v61 = vld [vmem:[#allocation14 + $0x54] ss:$8 sps:$4 sm:$0xff]   ;;  %v1090_v62 = vld [vmem:[#allocation14 + $0x50] ss:$8 sps:$4 sm:$0xff]   ;;  %v1091_v6 = vld [vmem:[#allocation14 + $0x64] ss:$8 sps:$4 sm:$0xff]  }
  0xf5   :  { %v1093_v7 = vld [vmem:[#allocation14 + $0x60] ss:$8 sps:$4 sm:$0xff]   ;;  %v1094_v8 = vld [vmem:[#allocation14 + $0x74] ss:$8 sps:$4 sm:$0xff]   ;;  %v1096_v9 = vld [vmem:[#allocation14 + $0x70] ss:$8 sps:$4 sm:$0xff]  }
  0xf6   :  { %650 = vmatpush1.bf16.msra.mxu1 %v1078_v54  ;;  %v1097_v10 = vld [vmem:[#allocation14 + $0x84] ss:$8 sps:$4 sm:$0xff]   ;;  %v1099_v11 = vld [vmem:[#allocation14 + $0x80] ss:$8 sps:$4 sm:$0xff]   ;;  %v1100_v12 = vld [vmem:[#allocation14 + $0x94] ss:$8 sps:$4 sm:$0xff]  }
  0xf7   :  { %352 = vmatpush1.bf16.msra.mxu0 %v1060_v13  ;;  %651 = vmatprep.subr.bf16.mxu1 %v1079_v55  ;;  %v1102_v13 = vld [vmem:[#allocation14 + $0x90] ss:$8 sps:$4 sm:$0xff]   ;;  %s926_s21 = sshll.u32 %s1495_s12, 4  ;;  %s927_s21 = int_to_ptr.vmem [resolvable:$true] %s926_s21 }
  0xf8   :  { %353 = vmatprep.subr.bf16.mxu0 %v1061_v14  ;;  %v1103_v14 = vld [vmem:[#allocation14 + $0xa4] ss:$8 sps:$4 sm:$0xff]   ;;  %s1439_s20 = scalar_lea.vmem %s927_s21, 128  ;;  %p1444_p7 = scmp.lt.s32.totalorder %s927_s21, %s927_s21 }
  0xf9   :  { %p1440_p6 = scmp.ne.s32.totalorder %s927_s21, %s1439_s20  ;;  %p1445_p8 = scmp.lt.s32.totalorder %s1439_s20, %s1439_s20 }
  0xfa   :  { %652 = vmatpush1.bf16.msra.mxu1 %v1081_v56  ;;  %v475_v56 = vld [vmem:[#allocation16] sm:$0x3] }
  0xfb   :  { %354 = vmatpush1.bf16.msra.mxu0 %v1063_v15  ;;  %653 = vmatprep.subr.bf16.mxu1 %v1082_v57  ;;  %v1105_v15 = vld [vmem:[#allocation14 + $0xa0] ss:$8 sps:$4 sm:$0xff]   ;;  %v480_v57 = vrot.slane %v475_v56, %v1749_v39  ;;  %p1446_p9 = por %p1445_p8, %p1444_p7 }
  0xfc   :  { %355 = vmatprep.subr.bf16.mxu0 %v1064_v16  ;;  %v1106_v16 = vld [vmem:[#allocation14 + $0xb4] ss:$8 sps:$4 sm:$0xff]  }
  0xfd   :  { %p1447_p10 = pnand %p1446_p9, %p1440_p6 }
  0xfe   :  { %654 = vmatpush1.bf16.msra.mxu1 %v1084_v58  ;;  %v484_v58 = vrot.slane %v475_v56, %v1751_v41 }
  0xff   :  { %356 = vmatpush1.bf16.msra.mxu0 %v1066_v17  ;;  %655 = vmatprep.subr.bf16.mxu1 %v1085_v59  ;;  %v1108_v17 = vld [vmem:[#allocation14 + $0xb0] ss:$8 sps:$4 sm:$0xff]  }
 0x100   :  { %357 = vmatprep.subr.bf16.mxu0 %v1067_v18  ;;  %v1109_v18 = vld [vmem:[#allocation14 + $0xc4] ss:$8 sps:$4 sm:$0xff]  }
 0x102   :  { %656 = vmatpush1.bf16.msra.mxu1 %v1087_v60 }
 0x103   :  { %358 = vmatpush1.bf16.msra.mxu0 %v1069_v19  ;;  %657 = vmatprep.subr.bf16.mxu1 %v1088_v61  ;;  %v1111_v19 = vld [vmem:[#allocation14 + $0xc0] ss:$8 sps:$4 sm:$0xff]  }
 0x104   :  { %359 = vmatprep.subr.bf16.mxu0 %v1070_v20  ;;  %v1112_v20 = vld [vmem:[#allocation14 + $0xd4] ss:$8 sps:$4 sm:$0xff]  }
 0x106   :  { %658 = vmatpush1.bf16.msra.mxu1 %v1090_v62 }
 0x107   :  { %360 = vmatpush1.bf16.msra.mxu0 %v1072_v21  ;;  %659 = vmatprep.subr.bf16.mxu1 %v1091_v6  ;;  %v1114_v21 = vld [vmem:[#allocation14 + $0xd0] ss:$8 sps:$4 sm:$0xff]  }
 0x10a   :  { %660 = vmatpush1.bf16.msra.mxu1 %v1093_v7 }
 0x10b   :  { %661 = vmatprep.subr.bf16.mxu1 %v1094_v8 }
 0x10e   :  { %662 = vmatpush1.bf16.msra.mxu1 %v1096_v9  ;;  %v1121_v9 = vld [vmem:[#allocation20 + $0x40] sm:$0xff]  }
 0x10f   :  { %663 = vmatprep.subr.bf16.mxu1 %v1097_v10  ;;  %v1122_v10 = vld [vmem:[#allocation20] sm:$0xff]   ;;  %1008 = vmatprep.subr.bf16.mxu0 %v1121_v9 }
 0x112   :  { %664 = vmatpush1.bf16.msra.mxu1 %v1099_v11  ;;  %v1123_v11 = vld [vmem:[#allocation20 + $0x48] sm:$0xff]  }
 0x113   :  { %665 = vmatprep.subr.bf16.mxu1 %v1100_v12  ;;  %v1124_v12 = vld [vmem:[#allocation20 + $0x8] sm:$0xff]  }
 0x116   :  { %666 = vmatpush1.bf16.msra.mxu1 %v1102_v13  ;;  %v1125_v13 = vld [vmem:[#allocation20 + $0x50] sm:$0xff]  }
 0x117   :  { %667 = vmatprep.subr.bf16.mxu1 %v1103_v14  ;;  %v1126_v14 = vld [vmem:[#allocation20 + $0x10] sm:$0xff]  }
 0x11a   :  { %668 = vmatpush1.bf16.msra.mxu1 %v1105_v15  ;;  %v1127_v15 = vld [vmem:[#allocation20 + $0x58] sm:$0xff]  }
 0x11b   :  { %669 = vmatprep.subr.bf16.mxu1 %v1106_v16  ;;  %v1128_v16 = vld [vmem:[#allocation20 + $0x18] sm:$0xff]  }
 0x11e   :  { %670 = vmatpush1.bf16.msra.mxu1 %v1108_v17  ;;  %v1129_v17 = vld [vmem:[#allocation20 + $0x60] sm:$0xff]  }
 0x11f   :  { %671 = vmatprep.subr.bf16.mxu1 %v1109_v18  ;;  %v1130_v18 = vld [vmem:[#allocation20 + $0x20] sm:$0xff]  }
 0x122   :  { %672 = vmatpush1.bf16.msra.mxu1 %v1111_v19  ;;  %v1131_v19 = vld [vmem:[#allocation20 + $0x68] sm:$0xff]  }
 0x123   :  { %673 = vmatprep.subr.bf16.mxu1 %v1112_v20  ;;  %v1132_v20 = vld [vmem:[#allocation20 + $0x28] sm:$0xff]  }
 0x126   :  { %674 = vmatpush1.bf16.msra.mxu1 %v1114_v21  ;;  %v1133_v21 = vld [vmem:[#allocation20 + $0x70] sm:$0xff]  }
 0x177   :  { %v206_v1 = vpop.xlane.xlu0 %205 }
 0x178   :  { %v208_v2 = vmul.f32 0.0078125, %v206_v1 }
 0x17a   :  { %v209_v3 = vsub.f32 %v202_v0, %v208_v2 }
 0x17c   :  { %v210_v4 = vmul.f32 %v209_v3, %v209_v3 }
 0x17e   :  { %211 = vadd.xlane.f32.xlu0 %v210_v4 }
 0x20b   :  { %v212_v22 = vpop.xlane.xlu0 %211 }
 0x20c   :  { %v213_v23 = vmul.f32 0.0078125, %v212_v22  ;;  %v1115_v22 = vld [vmem:[#allocation14 + $0xe4] ss:$8 sps:$4 sm:$0xff]  }
 0x20d   :  { %675 = vmatprep.subr.bf16.mxu1 %v1115_v22  ;;  %v1134_v22 = vld [vmem:[#allocation20 + $0x30] sm:$0xff]  }
 0x20e   :  { %v214_v24 = vadd.f32 1e-05, %v213_v23  ;;  %v1117_v23 = vld [vmem:[#allocation14 + $0xe0] ss:$8 sps:$4 sm:$0xff]  }
 0x20f   :  { %676 = vmatpush1.bf16.msra.mxu1 %v1117_v23  ;;  %v1135_v23 = vld [vmem:[#allocation20 + $0x78] sm:$0xff]  }
 0x210   :  { %1137 = vrsqrt.f32 %v214_v24  ;;  %v1118_v24 = vld [vmem:[#allocation14 + $0xf4] ss:$8 sps:$4 sm:$0xff]  }
 0x211   :  { %677 = vmatprep.subr.bf16.mxu1 %v1118_v24  ;;  %v1136_v24 = vld [vmem:[#allocation20 + $0x38] sm:$0xff]  }
 0x21a   :  { %v1138_v25 = vpop.eup %1137 }
 0x21b   :  { %v216_v27 = vmul.f32 %v1138_v25, %v209_v3  ;;  %v1120_v25 = vld [vmem:[#allocation14 + $0xf0] ss:$8 sps:$4 sm:$0xff]  }
 0x21c   :  { %678 = vmatpush1.bf16.msra.mxu1 %v1120_v25 }
 0x21d   :  { %v223_v29 = vmul.f32 %v941_v26, %v216_v27 }
 0x21f   :  { %v230_v30 = vadd.f32 %v942_v28, %v223_v29  ;;  %v386_v29 = vld [vmem:[#allocation11] sm:$0x3] }
 0x221   :  { %v232_v31 = vmul.f32 0.70710677, %v230_v30  ;;  %v231_v33 = vmul.f32 0.5, %v230_v30  ;;  %v387_v30 = vld [vmem:[#allocation13] sm:$0x3] }
 0x223   :  { %1139 = verf.f32 %v232_v31  ;;  %v409_v31 = vrot.slane %v386_v29, %v1749_v39 }
 0x22d   :  { %v1140_v32 = vpop.eup %1139 }
 0x22e   :  { %v234_v34 = vadd.f32 1.0, %v1140_v32  ;;  %v413_v32 = vrot.slane %v386_v29, %v1751_v41  ;;  %v689_v29 = vld [vmem:[#allocation19] sm:$0x3] }
 0x230   :  { %v235_v35 = vmul.f32 %v234_v34, %v231_v33 }
 0x232   :  { %v236_v36 = vpack.c.bf16 %v235_v35, %v235_v35  ;;  %v422_v35 = vrot.slane %v387_v30, %v1749_v39 }
 0x234   :  { %378 = vmatmul.mubr.bf16.vlgmr.msra.gmra.mrb[0].mxu0 %v236_v36  ;;  %v426_v36 = vrot.slane %v387_v30, %v1751_v41 }
 0x235   :  { %1009 = vmatpush3.bf16.msra.mxu0 %v1122_v10 }
 0x236   :  { %1010 = vmatprep.subr.bf16.mxu0 %v1123_v11 }
 0x239   :  { %1011 = vmatpush3.bf16.msra.mxu0 %v1124_v12 }
 0x23a   :  { %1012 = vmatprep.subr.bf16.mxu0 %v1125_v13 }
 0x23d   :  { %1013 = vmatpush3.bf16.msra.mxu0 %v1126_v14 }
 0x23e   :  { %1014 = vmatprep.subr.bf16.mxu0 %v1127_v15 }
 0x241   :  { %1015 = vmatpush3.bf16.msra.mxu0 %v1128_v16 }
 0x242   :  { %1016 = vmatprep.subr.bf16.mxu0 %v1129_v17 }
 0x245   :  { %1017 = vmatpush3.bf16.msra.mxu0 %v1130_v18 }
 0x246   :  { %1018 = vmatprep.subr.bf16.mxu0 %v1131_v19 }
 0x249   :  { %1019 = vmatpush3.bf16.msra.mxu0 %v1132_v20 }
 0x24a   :  { %1020 = vmatprep.subr.bf16.mxu0 %v1133_v21 }
 0x24d   :  { %1021 = vmatpush3.bf16.msra.mxu0 %v1134_v22 }
 0x24e   :  { %1022 = vmatprep.subr.bf16.mxu0 %v1135_v23 }
 0x251   :  { %1023 = vmatpush3.bf16.msra.mxu0 %v1136_v24 }
 0x307   :  { %v379_v44 = vpop.f32.mrb[0].mxu0 }
 0x308   :  { %v380_v45 = vadd.f32 %v379_v44, %v258_v42  ;;  %v381_v46 = vpop.f32.mrb[1].mxu0 }
 0x309   :  { %v382_v47 = vadd.f32 %v381_v46, %v262_v43  ;;  %v383_v48 = vpop.f32.mrb[2].mxu0 }
 0x30a   :  { %v384_v49 = vpop.f32.mrb[3].mxu0 }
 0x30b   :  { %v388_v50 = vadd.f32 %v382_v47, %v380_v45 }
 0x30d   :  { %389 = vadd.xlane.f32.xlu1 %v388_v50 }
 0x39a   :  { %v390_v63 = vpop.xlane.xlu1 %389 }
 0x39b   :  { %v392_v0 = vmul.f32 0.00390625, %v390_v63 }
 0x39d   :  { %v393_v1 = vsub.f32 %v380_v45, %v392_v0  ;;  %v394_v2 = vsub.f32 %v382_v47, %v392_v0 }
 0x39f   :  { %v395_v3 = vmul.f32 %v393_v1, %v393_v1  ;;  %v396_v4 = vmul.f32 %v394_v2, %v394_v2 }
 0x3a1   :  { %v397_v5 = vadd.f32 %v396_v4, %v395_v3 }
 0x3a3   :  { %398 = vadd.xlane.f32.xlu1 %v397_v5 }
 0x430   :  { %v399_v26 = vpop.xlane.xlu1 %398 }
 0x431   :  { %v400_v27 = vmul.f32 0.00390625, %v399_v26 }
 0x433   :  { %v401_v28 = vadd.f32 1e-05, %v400_v27 }
 0x435   :  { %1141 = vrsqrt.f32 %v401_v28  ;;  %v688_v28 = vld [vmem:[#allocation17] sm:$0x3] }
 0x436   :  { %v710_v30 = vrot.slane %v688_v28, %v1749_v39 }
 0x43f   :  { %v1142_v33 = vpop.eup %1141 }
 0x440   :  { %v404_v34 = vmul.f32 %v1142_v33, %v394_v2  ;;  %v403_v37 = vmul.f32 %v1142_v33, %v393_v1 }
 0x442   :  { %v417_v38 = vmul.f32 %v413_v32, %v404_v34  ;;  %v416_v40 = vmul.f32 %v409_v31, %v403_v37  ;;  %v714_v31 = vrot.slane %v688_v28, %v1751_v41 }
 0x444   :  { %v430_v42 = vadd.f32 %v426_v36, %v417_v38  ;;  %v429_v43 = vadd.f32 %v422_v35, %v416_v40  ;;  %v723_v35 = vrot.slane %v689_v29, %v1749_v39  ;;  %v727_v36 = vrot.slane %v689_v29, %v1751_v41 }
 0x446   :  { %v434_v44 = vmul.f32 0.70710677, %v430_v42  ;;  %v433_v45 = vmul.f32 0.70710677, %v429_v43  ;;  %v432_v48 = vmul.f32 0.5, %v430_v42  ;;  %v431_v50 = vmul.f32 0.5, %v429_v43 }
 0x448   :  { %1143 = verf.f32 %v434_v44 }
 0x449   :  { %1145 = verf.f32 %v433_v45 }
 0x452   :  { %v1144_v46 = vpop.eup %1143 }
 0x453   :  { %v1146_v47 = vpop.eup %1145  ;;  %v438_v49 = vadd.f32 1.0, %v1144_v46 }
 0x454   :  { %v437_v51 = vadd.f32 1.0, %v1146_v47 }
 0x455   :  { %v440_v52 = vmul.f32 %v438_v49, %v432_v48 }
 0x456   :  { %v439_v53 = vmul.f32 %v437_v51, %v431_v50 }
 0x457   :  { %v442_v54 = vpack.c.bf16 %v440_v52, %v440_v52 }
 0x458   :  { %v441_v55 = vpack.c.bf16 %v439_v53, %v439_v53 }
 0x459   :  { %679 = vmatprep.mubr.bf16.mxu1 %v442_v54  ;;  %v991_v54 = vld [vmem:[#allocation22] ss:$0 sm:$0xff] }
 0x45a   :  { %680 = vmatmul.mubr.bf16.vlgmr.msra.gmra.mrb[0].mxu1 %v441_v55 }
 0x52d   :  { %v681_v59 = vpop.f32.mrb[0].mxu1 }
 0x52e   :  { %v682_v60 = vadd.f32 %v681_v59, %v480_v57  ;;  %v683_v61 = vpop.f32.mrb[1].mxu1 }
 0x52f   :  { %v684_v62 = vadd.f32 %v683_v61, %v484_v58  ;;  %v685_v63 = vpop.f32.mrb[2].mxu1 }
 0x530   :  { %v686_v0 = vpop.f32.mrb[3].mxu1 }
 0x531   :  { %v690_v1 = vadd.f32 %v684_v62, %v682_v60 }
 0x533   :  { %691 = vadd.xlane.f32.xlu0 %v690_v1 }
 0x5c0   :  { %v692_v2 = vpop.xlane.xlu0 %691 }
 0x5c1   :  { %v693_v3 = vmul.f32 0.00390625, %v692_v2 }
 0x5c3   :  { %v694_v4 = vsub.f32 %v682_v60, %v693_v3  ;;  %v695_v5 = vsub.f32 %v684_v62, %v693_v3 }
 0x5c5   :  { %v696_v6 = vmul.f32 %v694_v4, %v694_v4  ;;  %v697_v7 = vmul.f32 %v695_v5, %v695_v5 }
 0x5c7   :  { %v698_v8 = vadd.f32 %v697_v7, %v696_v6 }
 0x5c9   :  { %699 = vadd.xlane.f32.xlu1 %v698_v8 }
 0x656   :  { %v700_v25 = vpop.xlane.xlu1 %699 }
 0x657   :  { %v701_v26 = vmul.f32 0.00390625, %v700_v25 }
 0x659   :  { %v702_v27 = vadd.f32 1e-05, %v701_v26 }
 0x65b   :  { %1147 = vrsqrt.f32 %v702_v27 }
 0x665   :  { %v1148_v32 = vpop.eup %1147 }
 0x666   :  { %v704_v33 = vmul.f32 %v1148_v32, %v694_v4  ;;  %v705_v34 = vmul.f32 %v1148_v32, %v695_v5 }
 0x668   :  { %v718_v37 = vmul.f32 %v714_v31, %v705_v34  ;;  %v717_v38 = vmul.f32 %v710_v30, %v704_v33 }
 0x66a   :  { %v731_v40 = vadd.f32 %v727_v36, %v718_v37  ;;  %v730_v42 = vadd.f32 %v723_v35, %v717_v38 }
 0x66c   :  { %v735_v43 = vmul.f32 0.70710677, %v731_v40  ;;  %v734_v44 = vmul.f32 0.70710677, %v730_v42  ;;  %v733_v47 = vmul.f32 0.5, %v731_v40  ;;  %v732_v49 = vmul.f32 0.5, %v730_v42 }
 0x66e   :  { %1149 = verf.f32 %v735_v43 }
 0x66f   :  { %1151 = verf.f32 %v734_v44 }
 0x678   :  { %v1150_v45 = vpop.eup %1149 }
 0x679   :  { %v1152_v46 = vpop.eup %1151  ;;  %v739_v48 = vadd.f32 1.0, %v1150_v45 }
 0x67a   :  { %v738_v50 = vadd.f32 1.0, %v1152_v46 }
 0x67b   :  { %v741_v51 = vmul.f32 %v739_v48, %v733_v47 }
 0x67c   :  { %v740_v52 = vmul.f32 %v738_v50, %v732_v49 }
 0x67d   :  { %v743_v53 = vpack.c.bf16 %v741_v51, %v741_v51 }
 0x67e   :  { %v742_v39 = vpack.c.bf16 %v740_v52, %v740_v52 }
 0x67f   :  { %911 = vmatprep.mubr.bf16.mxu0 %v743_v53 }
 0x680   :  { %912 = vmatmul.mubr.bf16.vlgmr.msra.gmra.mrb[4].mxu0 %v742_v39 }
 0x753   :  { %v1024_v41 = vpop.f32.mrb[4].mxu0 }
 0x754   :  { %v1025_v55 = vpop.f32.mrb[5].mxu0 }
 0x755   :  { %v1026_v56 = vadd.f32 %v1025_v55, %v1024_v41  ;;  %v1027_v57 = vpop.f32.mrb[6].mxu0 }
 0x756   :  { %v1028_v58 = vpop.f32.mrb[7].mxu0 }
 0x757   :  { %v914_v59 = vadd.f32 %v1026_v56, %v991_v54 }
 0x759   :  { %919 = vst [vmem:[#allocation23] sm:$0xff] %v914_v59 }
 0x75a   :  { %1450 = shalt.err (!%p1447_p10)
}
 0x75b   :  { %s1451_s18 = scalar_lea.hbm %s1790_s13, 128 }
 0x75c   :  { %p1452_p11 = scmp.ne.s32.totalorder %s1790_s13, %s1451_s18  ;;  %p1455_p12 = scmp.lt.u32.totalorder %s1451_s18, %s1790_s13 }
 0x75e   :  { %p1457_p13 = pnand %p1455_p12, %p1452_p11 }
 0x760   :  { %1460 = shalt.err (!%p1457_p13)
}
 0x761   :  { %929 = dma.vmem_to_hbm [thread:$0]  %s927_s21, 128, %s1790_s13, [#allocation4]  }
 0x762   :  { %1475 = dma.done.wait [#allocation4], 128  }
 0x763   :  { %1476 = vsyncadd [#allocation4], 4294967168 }
 0x764   :  { %933 = vsyncpa [#allocation3], 1 }
 0x765   :  { %934 = vsyncpa [#allocation6], 1 }
 0x766   :  { %935 = vsyncpa [#allocation9], 1 }
 0x767   :  { %936 = vsyncpa [#allocation12], 1 }
 0x768   :  { %937 = vsyncpa [#allocation15], 1 }
 0x769   :  { %938 = vsyncpa [#allocation18], 1 }
 0x76a   :  { %939 = vsyncpa [#allocation21], 1 }
 0x76b   :  { %940 = vsyncpa [#allocation4], 1 }

// kernel: brain_network_forward.10
= control target key start
LH: loop header
LB: loop body
LE: loop exit
PB: predicated region body
PF: predicated region fallthrough
CT: control target
= control target key end

     0   :  { %8 = vsyncpa [#allocation3], 0  ;;  %s595_s0 = inlined_call_operand.hbm [shape: f32[2,256], index: 0, kind: input, shape index: {}]   ;;  %s596_s1 = inlined_call_operand.hbm [shape: bf16[256,256], index: 1, kind: input, shape index: {}]   ;;  %s597_s2 = inlined_call_operand.hbm [shape: f32[1,256], index: 2, kind: input, shape index: {}]   ;;  %s598_s3 = inlined_call_operand.hbm [shape: f32[2,256], index: 3, kind: output, shape index: {}]  }
   0x1   :  { %9 = vsyncpa [#allocation6], 0 }
   0x2   :  { %10 = vsyncpa [#allocation4], 0  ;;  %s521_s12 = smov [#allocation5]   ;;  %s427_s16 = scalar_lea.hbm %s596_s1, 4096 }
   0x3   :  { %s26_s13 = sshll.u32 %s521_s12, 4  ;;  %p428_p0 = scmp.ne.s32.totalorder %s596_s1, %s427_s16  ;;  %s27_s13 = int_to_ptr.vmem [resolvable:$true] %s26_s13 }
   0x4   :  { %p431_p1 = scmp.lt.u32.totalorder %s427_s16, %s596_s1 }
   0x6   :  { %p433_p2 = pnand %p431_p1, %p428_p0 }
   0x8   :  { %436 = shalt.err (!%p433_p2)
}
   0x9   :  { %s437_s21 = scalar_lea.vmem %s27_s13, 4096  ;;  %p442_p4 = scmp.lt.s32.totalorder %s27_s13, %s27_s13 }
   0xa   :  { %p438_p3 = scmp.ne.s32.totalorder %s27_s13, %s437_s21  ;;  %p443_p5 = scmp.lt.s32.totalorder %s437_s21, %s437_s21 }
   0xc   :  { %p444_p6 = por %p443_p5, %p442_p4 }
   0xe   :  { %p445_p7 = pnand %p444_p6, %p438_p3 }
  0x10   :  { %448 = shalt.err (!%p445_p7)
}
  0x11   :  { %s522_s22 = smov 128   ;;  %s523_s23 = smov 8  }
  0x12   :  { %32 = dma.hbm_to_vmem [thread:$0]  %s596_s1, 4096, %s27_s13, [#allocation6], %s522_s22, %s522_s22, %s523_s23  }
  0x13   :  { %s524_s26 = smov [#allocation2]   ;;  %s525_s28 = smov [#allocation7]  }
  0x14   :  { %s17_s27 = sshll.u32 %s524_s26, 4  ;;  %s39_s29 = sshll.u32 %s525_s28, 4  ;;  %s18_s27 = int_to_ptr.vmem [resolvable:$true] %s17_s27  ;;  %s40_s29 = int_to_ptr.vmem [resolvable:$true] %s39_s29 }
  0x15   :  { %s449_s5 = scalar_lea.hbm %s595_s0, 64 }
  0x16   :  { %p450_p8 = scmp.ne.s32.totalorder %s595_s0, %s449_s5  ;;  %p453_p9 = scmp.lt.u32.totalorder %s449_s5, %s595_s0 }
  0x18   :  { %p455_p10 = pnand %p453_p9, %p450_p8 }
  0x1a   :  { %458 = shalt.err (!%p455_p10)
}
  0x1b   :  { %s459_s1 = scalar_lea.vmem %s18_s27, 64  ;;  %p464_p12 = scmp.lt.s32.totalorder %s18_s27, %s18_s27 }
  0x1c   :  { %p460_p11 = scmp.ne.s32.totalorder %s18_s27, %s459_s1  ;;  %p465_p13 = scmp.lt.s32.totalorder %s459_s1, %s459_s1 }
  0x1e   :  { %p466_p0 = por %p465_p13, %p464_p12 }
  0x20   :  { %p467_p1 = pnand %p466_p0, %p460_p11 }
  0x22   :  { %470 = shalt.err (!%p467_p1)
}
  0x23   :  { %20 = dma.hbm_to_vmem [thread:$0]  %s595_s0, 64, %s18_s27, [#allocation3]  }
  0x24   :  { %s471_s14 = scalar_lea.hbm %s597_s2, 32 }
  0x25   :  { %p472_p2 = scmp.ne.s32.totalorder %s597_s2, %s471_s14  ;;  %p475_p3 = scmp.lt.u32.totalorder %s471_s14, %s597_s2 }
  0x27   :  { %p477_p4 = pnand %p475_p3, %p472_p2 }
  0x29   :  { %480 = shalt.err (!%p477_p4)
}
  0x2a   :  { %s481_s19 = scalar_lea.vmem %s40_s29, 32  ;;  %p486_p6 = scmp.lt.s32.totalorder %s40_s29, %s40_s29 }
  0x2b   :  { %p482_p5 = scmp.ne.s32.totalorder %s40_s29, %s481_s19  ;;  %p487_p7 = scmp.lt.s32.totalorder %s481_s19, %s481_s19 }
  0x2d   :  { %p488_p8 = por %p487_p7, %p486_p6 }
  0x2f   :  { %p489_p9 = pnand %p488_p8, %p482_p5 }
  0x31   :  { %492 = shalt.err (!%p489_p9)
}
  0x32   :  { %42 = dma.hbm_to_vmem [thread:$0]  %s597_s2, 32, %s40_s29, [#allocation6]  }
  0x33   :  { %515 = dma.done.wait [#allocation3], 64  }
  0x34   :  { %516 = vsyncadd [#allocation3], 4294967232 }
  0x35   :  { %517 = dma.done.wait [#allocation6], 4128  }
  0x36   :  { %518 = vsyncadd [#allocation6], 4294963168  ;;  %v379_v0 = vld [vmem:[#allocation5 + $0x4] ss:$8 sps:$4 sm:$0xff]   ;;  %v381_v1 = vld [vmem:[#allocation5] ss:$8 sps:$4 sm:$0xff]   ;;  %v100_v36 = vlaneseq }
  0x37   :  { %270 = vmatprep.subr.bf16.mxu0 %v379_v0  ;;  %v382_v2 = vld [vmem:[#allocation5 + $0x14] ss:$8 sps:$4 sm:$0xff]   ;;  %v384_v3 = vld [vmem:[#allocation5 + $0x10] ss:$8 sps:$4 sm:$0xff]   ;;  %v385_v4 = vld [vmem:[#allocation5 + $0x24] ss:$8 sps:$4 sm:$0xff]  }
  0x38   :  { %271 = vmatpush1.bf16.msra.mxu0 %v381_v1  ;;  %v387_v5 = vld [vmem:[#allocation5 + $0x20] ss:$8 sps:$4 sm:$0xff]   ;;  %v388_v6 = vld [vmem:[#allocation5 + $0x34] ss:$8 sps:$4 sm:$0xff]   ;;  %v390_v7 = vld [vmem:[#allocation5 + $0x30] ss:$8 sps:$4 sm:$0xff]  }
  0x39   :  { %272 = vmatprep.subr.bf16.mxu0 %v382_v2  ;;  %v391_v8 = vld [vmem:[#allocation5 + $0x44] ss:$8 sps:$4 sm:$0xff]   ;;  %v393_v9 = vld [vmem:[#allocation5 + $0x40] ss:$8 sps:$4 sm:$0xff]   ;;  %v394_v10 = vld [vmem:[#allocation5 + $0x54] ss:$8 sps:$4 sm:$0xff]  }
  0x3a   :  { %v396_v11 = vld [vmem:[#allocation5 + $0x50] ss:$8 sps:$4 sm:$0xff]   ;;  %v397_v12 = vld [vmem:[#allocation5 + $0x64] ss:$8 sps:$4 sm:$0xff]   ;;  %v399_v15 = vld [vmem:[#allocation5 + $0x60] ss:$8 sps:$4 sm:$0xff]  }
  0x3b   :  { %v339_v13 = vld.sshfl [vmem:[#allocation2] sm:$0x33 pattern:$0x76325410]  ;;  %v402_v18 = vld [vmem:[#allocation5 + $0x70] ss:$8 sps:$4 sm:$0xff]  }
  0x3c   :  { %273 = vmatpush1.bf16.msra.mxu0 %v384_v3  ;;  %v61_v14 = vcombine.high %v339_v13, %v339_v13  ;;  %v400_v16 = vld [vmem:[#allocation5 + $0x74] ss:$8 sps:$4 sm:$0xff]   ;;  %v403_v19 = vld [vmem:[#allocation5 + $0x84] ss:$8 sps:$4 sm:$0xff]   ;;  %v405_v20 = vld [vmem:[#allocation5 + $0x80] ss:$8 sps:$4 sm:$0xff]   ;;  %v64_v35 = vpack.c.bf16 %v339_v13, %v339_v13 }
  0x3d   :  { %274 = vmatprep.subr.bf16.mxu0 %v385_v4  ;;  %v406_v21 = vld [vmem:[#allocation5 + $0x94] ss:$8 sps:$4 sm:$0xff]   ;;  %v408_v22 = vld [vmem:[#allocation5 + $0x90] ss:$8 sps:$4 sm:$0xff]   ;;  %v409_v23 = vld [vmem:[#allocation5 + $0xa4] ss:$8 sps:$4 sm:$0xff]  }
  0x3e   :  { %v65_v17 = vpack.c.bf16 %v61_v14, %v61_v14  ;;  %v411_v24 = vld [vmem:[#allocation5 + $0xa0] ss:$8 sps:$4 sm:$0xff]   ;;  %v412_v25 = vld [vmem:[#allocation5 + $0xb4] ss:$8 sps:$4 sm:$0xff]   ;;  %v414_v26 = vld [vmem:[#allocation5 + $0xb0] ss:$8 sps:$4 sm:$0xff]  }
  0x3f   :  { %v415_v27 = vld [vmem:[#allocation5 + $0xc4] ss:$8 sps:$4 sm:$0xff]   ;;  %v417_v28 = vld [vmem:[#allocation5 + $0xc0] ss:$8 sps:$4 sm:$0xff]   ;;  %v418_v29 = vld [vmem:[#allocation5 + $0xd4] ss:$8 sps:$4 sm:$0xff]  }
  0x40   :  { %275 = vmatpush1.bf16.msra.mxu0 %v387_v5  ;;  %302 = vmatprep.mubr.bf16.mxu0 %v65_v17  ;;  %v420_v30 = vld [vmem:[#allocation5 + $0xd0] ss:$8 sps:$4 sm:$0xff]   ;;  %v421_v31 = vld [vmem:[#allocation5 + $0xe4] ss:$8 sps:$4 sm:$0xff]   ;;  %v423_v32 = vld [vmem:[#allocation5 + $0xe0] ss:$8 sps:$4 sm:$0xff]  }
  0x41   :  { %276 = vmatprep.subr.bf16.mxu0 %v388_v6  ;;  %v424_v33 = vld [vmem:[#allocation5 + $0xf4] ss:$8 sps:$4 sm:$0xff]   ;;  %v426_v34 = vld [vmem:[#allocation5 + $0xf0] ss:$8 sps:$4 sm:$0xff]   ;;  %v101_v37 = vshrl.u32 %v100_v36, 7  ;;  %s526_s2 = smov [#allocation8]  }
  0x42   :  { %v98_v39 = vld [vmem:[#allocation7] sm:$0x3]  ;;  %s329_s21 = sshll.u32 %s526_s2, 4  ;;  %s330_s21 = int_to_ptr.vmem [resolvable:$true] %s329_s21 }
  0x43   :  { %v102_v38 = vsub.s32 0, %v101_v37  ;;  %v106_v40 = vsub.s32 1, %v101_v37  ;;  %s493_s22 = scalar_lea.vmem %s330_s21, 64  ;;  %p498_p11 = scmp.lt.s32.totalorder %s330_s21, %s330_s21 }
  0x44   :  { %277 = vmatpush1.bf16.msra.mxu0 %v390_v7  ;;  %p494_p10 = scmp.ne.s32.totalorder %s330_s21, %s493_s22  ;;  %p499_p12 = scmp.lt.s32.totalorder %s493_s22, %s493_s22 }
  0x45   :  { %278 = vmatprep.subr.bf16.mxu0 %v391_v8  ;;  %v103_v41 = vrot.slane %v98_v39, %v102_v38  ;;  %v107_v42 = vrot.slane %v98_v39, %v106_v40 }
  0x46   :  { %p500_p13 = por %p499_p12, %p498_p11 }
  0x48   :  { %279 = vmatpush1.bf16.msra.mxu0 %v393_v9  ;;  %p501_p0 = pnand %p500_p13, %p494_p10 }
  0x49   :  { %280 = vmatprep.subr.bf16.mxu0 %v394_v10 }
  0x4c   :  { %281 = vmatpush1.bf16.msra.mxu0 %v396_v11 }
  0x4d   :  { %282 = vmatprep.subr.bf16.mxu0 %v397_v12 }
  0x50   :  { %283 = vmatpush1.bf16.msra.mxu0 %v399_v15 }
  0x51   :  { %284 = vmatprep.subr.bf16.mxu0 %v400_v16 }
  0x54   :  { %285 = vmatpush1.bf16.msra.mxu0 %v402_v18 }
  0x55   :  { %286 = vmatprep.subr.bf16.mxu0 %v403_v19 }
  0x58   :  { %287 = vmatpush1.bf16.msra.mxu0 %v405_v20 }
  0x59   :  { %288 = vmatprep.subr.bf16.mxu0 %v406_v21 }
  0x5c   :  { %289 = vmatpush1.bf16.msra.mxu0 %v408_v22 }
  0x5d   :  { %290 = vmatprep.subr.bf16.mxu0 %v409_v23 }
  0x60   :  { %291 = vmatpush1.bf16.msra.mxu0 %v411_v24 }
  0x61   :  { %292 = vmatprep.subr.bf16.mxu0 %v412_v25 }
  0x64   :  { %293 = vmatpush1.bf16.msra.mxu0 %v414_v26 }
  0x65   :  { %294 = vmatprep.subr.bf16.mxu0 %v415_v27 }
  0x68   :  { %295 = vmatpush1.bf16.msra.mxu0 %v417_v28 }
  0x69   :  { %296 = vmatprep.subr.bf16.mxu0 %v418_v29 }
  0x6c   :  { %297 = vmatpush1.bf16.msra.mxu0 %v420_v30 }
  0x6d   :  { %298 = vmatprep.subr.bf16.mxu0 %v421_v31 }
  0x70   :  { %299 = vmatpush1.bf16.msra.mxu0 %v423_v32 }
  0x71   :  { %300 = vmatprep.subr.bf16.mxu0 %v424_v33 }
  0x74   :  { %301 = vmatpush1.bf16.msra.mxu0 %v426_v34 }
  0x77   :  { %303 = vmatmul.mubr.bf16.vlgmr.msra.gmra.mrb[0].mxu0 %v64_v35 }
 0x14a   :  { %v304_v43 = vpop.f32.mrb[0].mxu0 }
 0x14b   :  { %v305_v44 = vadd.f32 %v304_v43, %v103_v41  ;;  %v306_v45 = vpop.f32.mrb[1].mxu0 }
 0x14c   :  { %v307_v46 = vadd.f32 %v306_v45, %v107_v42  ;;  %v308_v47 = vpop.f32.mrb[2].mxu0 }
 0x14d   :  { %v309_v48 = vpop.f32.mrb[3].mxu0 }
 0x14e   :  { %v313_v49 = vcombine.low %v305_v44, %v307_v46 }
 0x150   :  { %372 = vst.sshfl [vmem:[#allocation8] sm:$0x33 pattern:$0x76325410] %v313_v49 }
 0x151   :  { %504 = shalt.err (!%p501_p0)
}
 0x152   :  { %s505_s25 = scalar_lea.hbm %s598_s3, 64 }
 0x153   :  { %p506_p1 = scmp.ne.s32.totalorder %s598_s3, %s505_s25  ;;  %p509_p2 = scmp.lt.u32.totalorder %s505_s25, %s598_s3 }
 0x155   :  { %p511_p3 = pnand %p509_p2, %p506_p1 }
 0x157   :  { %514 = shalt.err (!%p511_p3)
}
 0x158   :  { %332 = dma.vmem_to_hbm [thread:$0]  %s330_s21, 64, %s598_s3, [#allocation4]  }
 0x159   :  { %519 = dma.done.wait [#allocation4], 64  }
 0x15a   :  { %520 = vsyncadd [#allocation4], 4294967232 }
 0x15b   :  { %336 = vsyncpa [#allocation3], 1 }
 0x15c   :  { %337 = vsyncpa [#allocation6], 1 }
 0x15d   :  { %338 = vsyncpa [#allocation4], 1 }

// kernel: brain_network_forward.9
= control target key start
LH: loop header
LB: loop body
LE: loop exit
PB: predicated region body
PF: predicated region fallthrough
CT: control target
= control target key end

     0   :  { %8 = vsyncpa [#allocation3], 0  ;;  %s354_s0 = inlined_call_operand.hbm [shape: f32[2,256], index: 0, kind: input, shape index: {}]   ;;  %s355_s1 = inlined_call_operand.hbm [shape: f32[1,256], index: 1, kind: input, shape index: {}]   ;;  %s356_s2 = inlined_call_operand.hbm [shape: f32[1,256], index: 2, kind: input, shape index: {}]   ;;  %s357_s3 = inlined_call_operand.hbm [shape: f32[2,256], index: 3, kind: output, shape index: {}]  }
   0x1   :  { %9 = vsyncpa [#allocation6], 0 }
   0x2   :  { %10 = vsyncpa [#allocation4], 0  ;;  %s276_s12 = smov [#allocation5]   ;;  %s277_s14 = smov [#allocation2]  }
   0x3   :  { %s27_s13 = sshll.u32 %s276_s12, 4  ;;  %s17_s15 = sshll.u32 %s277_s14, 4  ;;  %s28_s13 = int_to_ptr.vmem [resolvable:$true] %s27_s13  ;;  %s18_s15 = int_to_ptr.vmem [resolvable:$true] %s17_s15 }
   0x4   :  { %s182_s18 = scalar_lea.hbm %s355_s1, 32 }
   0x5   :  { %p183_p0 = scmp.ne.s32.totalorder %s355_s1, %s182_s18  ;;  %p186_p1 = scmp.lt.u32.totalorder %s182_s18, %s355_s1 }
   0x7   :  { %p188_p2 = pnand %p186_p1, %p183_p0 }
   0x9   :  { %191 = shalt.err (!%p188_p2)
}
   0xa   :  { %s192_s23 = scalar_lea.vmem %s28_s13, 32  ;;  %p197_p4 = scmp.lt.s32.totalorder %s28_s13, %s28_s13 }
   0xb   :  { %p193_p3 = scmp.ne.s32.totalorder %s28_s13, %s192_s23  ;;  %p198_p5 = scmp.lt.s32.totalorder %s192_s23, %s192_s23 }
   0xd   :  { %p199_p6 = por %p198_p5, %p197_p4 }
   0xf   :  { %p200_p7 = pnand %p199_p6, %p193_p3 }
  0x11   :  { %203 = shalt.err (!%p200_p7)
}
  0x12   :  { %30 = dma.hbm_to_vmem [thread:$0]  %s355_s1, 32, %s28_s13, [#allocation6]  }
  0x13   :  { %s204_s28 = scalar_lea.hbm %s354_s0, 64 }
  0x14   :  { %p205_p8 = scmp.ne.s32.totalorder %s354_s0, %s204_s28  ;;  %p208_p9 = scmp.lt.u32.totalorder %s204_s28, %s354_s0 }
  0x16   :  { %p210_p10 = pnand %p208_p9, %p205_p8 }
  0x18   :  { %213 = shalt.err (!%p210_p10)
}
  0x19   :  { %s214_s6 = scalar_lea.vmem %s18_s15, 64  ;;  %p219_p12 = scmp.lt.s32.totalorder %s18_s15, %s18_s15 }
  0x1a   :  { %p215_p11 = scmp.ne.s32.totalorder %s18_s15, %s214_s6  ;;  %p220_p13 = scmp.lt.s32.totalorder %s214_s6, %s214_s6 }
  0x1c   :  { %p221_p0 = por %p220_p13, %p219_p12 }
  0x1e   :  { %p222_p1 = pnand %p221_p0, %p215_p11 }
  0x20   :  { %225 = shalt.err (!%p222_p1)
}
  0x21   :  { %20 = dma.hbm_to_vmem [thread:$0]  %s354_s0, 64, %s18_s15, [#allocation3]  }
  0x22   :  { %s278_s8 = smov [#allocation7]   ;;  %s226_s12 = scalar_lea.hbm %s356_s2, 32 }
  0x23   :  { %s37_s9 = sshll.u32 %s278_s8, 4  ;;  %p227_p2 = scmp.ne.s32.totalorder %s356_s2, %s226_s12  ;;  %s38_s9 = int_to_ptr.vmem [resolvable:$true] %s37_s9 }
  0x24   :  { %p230_p3 = scmp.lt.u32.totalorder %s226_s12, %s356_s2 }
  0x26   :  { %p232_p4 = pnand %p230_p3, %p227_p2 }
  0x28   :  { %235 = shalt.err (!%p232_p4)
}
  0x29   :  { %s236_s18 = scalar_lea.vmem %s38_s9, 32  ;;  %p241_p6 = scmp.lt.s32.totalorder %s38_s9, %s38_s9 }
  0x2a   :  { %p237_p5 = scmp.ne.s32.totalorder %s38_s9, %s236_s18  ;;  %p242_p7 = scmp.lt.s32.totalorder %s236_s18, %s236_s18 }
  0x2c   :  { %p243_p8 = por %p242_p7, %p241_p6 }
  0x2e   :  { %p244_p9 = pnand %p243_p8, %p237_p5 }
  0x30   :  { %247 = shalt.err (!%p244_p9)
}
  0x31   :  { %40 = dma.hbm_to_vmem [thread:$0]  %s356_s2, 32, %s38_s9, [#allocation6]  }
  0x32   :  { %270 = dma.done.wait [#allocation3], 64  }
  0x33   :  { %271 = vsyncadd [#allocation3], 4294967232 }
  0x34   :  { %272 = dma.done.wait [#allocation6], 64  }
  0x35   :  { %273 = vsyncadd [#allocation6], 4294967232  ;;  %v57_v0 = vlaneseq  ;;  %v279_v1 = vmov 1983009808   ;;  %v50_v6 = vld [vmem:[#allocation2] sm:$0xf] }
  0x36   :  { %v55_v2 = vunpack.c.l.s4 %v279_v1  ;;  %vm64_vm0 = vcmask 1041408   ;;  %v280_v12 = vmov 269488144   ;;  %v51_v31 = vld [vmem:[#allocation5] sm:$0x3]  ;;  %s281_s2 = smov [#allocation8]  }
  0x37   :  { %v58_v3 = vshrl.u32 %v57_v0, 7  ;;  %v74_v13 = vunpack.c.l.s4 %v280_v12  ;;  %v52_v32 = vld [vmem:[#allocation7] sm:$0x3]  ;;  %s162_s19 = sshll.u32 %s281_s2, 4  ;;  %s163_s19 = int_to_ptr.vmem [resolvable:$true] %s162_s19 }
  0x38   :  { %v56_v4 = vunpack.c.0.s8 %v55_v2  ;;  %s248_s20 = scalar_lea.vmem %s163_s19, 64  ;;  %p253_p11 = scmp.lt.s32.totalorder %s163_s19, %s163_s19 }
  0x39   :  { %v75_v14 = vunpack.c.0.s8 %v74_v13  ;;  %v115_v29 = vsub.s32 0, %v58_v3  ;;  %v119_v30 = vsub.s32 1, %v58_v3  ;;  %p249_p10 = scmp.ne.s32.totalorder %s163_s19, %s248_s20  ;;  %p254_p12 = scmp.lt.s32.totalorder %s248_s20, %s248_s20 }
  0x3a   :  { %v59_v5 = vsub.s32 %v56_v4, %v58_v3 }
  0x3b   :  { %v78_v15 = vsub.s32 %v75_v14, %v58_v3  ;;  %v116_v33 = vrot.slane %v51_v31, %v115_v29  ;;  %v120_v34 = vrot.slane %v51_v31, %v119_v30  ;;  %v135_v35 = vrot.slane %v52_v32, %v115_v29  ;;  %p255_p13 = por %p254_p12, %p253_p11 }
  0x3c   :  { %v60_v7 = vrot.slane %v50_v6, %v59_v5  ;;  %v139_v36 = vrot.slane %v52_v32, %v119_v30 }
  0x3d   :  { %v121_v37 = vcombine.low %v116_v33, %v120_v34  ;;  %p256_p0 = pnand %p255_p13, %p249_p10 }
  0x3e   :  { %v61_v8 = vcombine.high %v60_v7, %v60_v7  ;;  %v65_v9 = vsel %vm64_vm0, %v60_v7, 0.0  ;;  %v140_v38 = vcombine.low %v135_v35, %v139_v36 }
  0x3f   :  { %v128_v41 = vrot.slane %v121_v37, %v59_v5 }
  0x40   :  { %v66_v10 = vsel %vm64_vm0, %v61_v8, 0.0  ;;  %v147_v43 = vrot.slane %v140_v38, %v59_v5 }
  0x41   :  { %v67_v11 = vadd.f32 %v66_v10, %v65_v9 }
  0x43   :  { %68 = vadd.xlane.f32.xlu0 %v67_v11 }
  0xd0   :  { %v69_v16 = vpop.xlane.xlu0 %68 }
  0xd1   :  { %v71_v17 = vmul.f32 0.00390625, %v69_v16 }
  0xd3   :  { %v79_v18 = vrot.slane %v71_v17, %v78_v15 }
  0xd5   :  { %v81_v19 = vsub.f32 %v50_v6, %v79_v18 }
  0xd7   :  { %v82_v20 = vmul.f32 %v81_v19, %v81_v19 }
  0xd9   :  { %v90_v21 = vrot.slane %v82_v20, %v59_v5 }
  0xdb   :  { %v91_v22 = vcombine.high %v90_v21, %v90_v21  ;;  %v94_v23 = vsel %vm64_vm0, %v90_v21, 0.0 }
  0xdd   :  { %v95_v24 = vsel %vm64_vm0, %v91_v22, 0.0 }
  0xde   :  { %v96_v25 = vadd.f32 %v95_v24, %v94_v23 }
  0xe0   :  { %97 = vadd.xlane.f32.xlu0 %v96_v25 }
 0x16d   :  { %v98_v26 = vpop.xlane.xlu0 %97 }
 0x16e   :  { %v99_v27 = vmul.f32 0.00390625, %v98_v26 }
 0x170   :  { %v100_v28 = vadd.f32 1e-05, %v99_v27 }
 0x172   :  { %178 = vrsqrt.f32 %v100_v28 }
 0x17c   :  { %v179_v39 = vpop.eup %178 }
 0x17d   :  { %v109_v40 = vrot.slane %v179_v39, %v78_v15 }
 0x17f   :  { %v111_v42 = vmul.f32 %v109_v40, %v81_v19 }
 0x181   :  { %v130_v44 = vmul.f32 %v128_v41, %v111_v42 }
 0x183   :  { %v149_v45 = vadd.f32 %v147_v43, %v130_v44 }
 0x185   :  { %v151_v46 = vmul.f32 0.70710677, %v149_v45  ;;  %v150_v48 = vmul.f32 0.5, %v149_v45 }
 0x187   :  { %180 = verf.f32 %v151_v46 }
 0x191   :  { %v181_v47 = vpop.eup %180 }
 0x192   :  { %v153_v49 = vadd.f32 1.0, %v181_v47 }
 0x194   :  { %v154_v50 = vmul.f32 %v153_v49, %v150_v48 }
 0x196   :  { %155 = vst [vmem:[#allocation8] sm:$0xf] %v154_v50 }
 0x197   :  { %259 = shalt.err (!%p256_p0)
}
 0x198   :  { %s260_s23 = scalar_lea.hbm %s357_s3, 64 }
 0x199   :  { %p261_p1 = scmp.ne.s32.totalorder %s357_s3, %s260_s23  ;;  %p264_p2 = scmp.lt.u32.totalorder %s260_s23, %s357_s3 }
 0x19b   :  { %p266_p3 = pnand %p264_p2, %p261_p1 }
 0x19d   :  { %269 = shalt.err (!%p266_p3)
}
 0x19e   :  { %165 = dma.vmem_to_hbm [thread:$0]  %s163_s19, 64, %s357_s3, [#allocation4]  }
 0x19f   :  { %274 = dma.done.wait [#allocation4], 64  }
 0x1a0   :  { %275 = vsyncadd [#allocation4], 4294967232 }
 0x1a1   :  { %169 = vsyncpa [#allocation3], 1 }
 0x1a2   :  { %170 = vsyncpa [#allocation6], 1 }
 0x1a3   :  { %171 = vsyncpa [#allocation4], 1 }

// kernel: brain_network_forward.11
= control target key start
LH: loop header
LB: loop body
LE: loop exit
PB: predicated region body
PF: predicated region fallthrough
CT: control target
= control target key end

     0   :  { %9 = vsyncpa [#allocation3], 0  ;;  %s415_s0 = inlined_call_operand.hbm [shape: f32[2,256], index: 0, kind: input, shape index: {}]   ;;  %s416_s1 = inlined_call_operand.hbm [shape: f32[2,256], index: 1, kind: input, shape index: {}]   ;;  %s417_s2 = inlined_call_operand.hbm [shape: f32[1,256], index: 2, kind: input, shape index: {}]   ;;  %s418_s3 = inlined_call_operand.hbm [shape: f32[1,256], index: 3, kind: input, shape index: {}]   ;;  %s419_s4 = inlined_call_operand.hbm [shape: f32[2,256], index: 4, kind: output, shape index: {}]  }
   0x1   :  { %10 = vsyncpa [#allocation6], 0 }
   0x2   :  { %11 = vsyncpa [#allocation9], 0 }
   0x3   :  { %12 = vsyncpa [#allocation4], 0  ;;  %s319_s15 = smov [#allocation5]   ;;  %s320_s17 = smov [#allocation2]  }
   0x4   :  { %s29_s16 = sshll.u32 %s319_s15, 4  ;;  %s19_s18 = sshll.u32 %s320_s17, 4  ;;  %s30_s16 = int_to_ptr.vmem [resolvable:$true] %s29_s16  ;;  %s20_s18 = int_to_ptr.vmem [resolvable:$true] %s19_s18 }
   0x5   :  { %s201_s21 = scalar_lea.hbm %s416_s1, 64 }
   0x6   :  { %p202_p0 = scmp.ne.s32.totalorder %s416_s1, %s201_s21  ;;  %p205_p1 = scmp.lt.u32.totalorder %s201_s21, %s416_s1 }
   0x8   :  { %p207_p2 = pnand %p205_p1, %p202_p0 }
   0xa   :  { %210 = shalt.err (!%p207_p2)
}
   0xb   :  { %s211_s26 = scalar_lea.vmem %s30_s16, 64  ;;  %p216_p4 = scmp.lt.s32.totalorder %s30_s16, %s30_s16 }
   0xc   :  { %p212_p3 = scmp.ne.s32.totalorder %s30_s16, %s211_s26  ;;  %p217_p5 = scmp.lt.s32.totalorder %s211_s26, %s211_s26 }
   0xe   :  { %p218_p6 = por %p217_p5, %p216_p4 }
  0x10   :  { %p219_p7 = pnand %p218_p6, %p212_p3 }
  0x12   :  { %222 = shalt.err (!%p219_p7)
}
  0x13   :  { %32 = dma.hbm_to_vmem [thread:$0]  %s416_s1, 64, %s30_s16, [#allocation6]  }
  0x14   :  { %s223_s5 = scalar_lea.hbm %s415_s0, 64 }
  0x15   :  { %p224_p8 = scmp.ne.s32.totalorder %s415_s0, %s223_s5  ;;  %p227_p9 = scmp.lt.u32.totalorder %s223_s5, %s415_s0 }
  0x17   :  { %p229_p10 = pnand %p227_p9, %p224_p8 }
  0x19   :  { %232 = shalt.err (!%p229_p10)
}
  0x1a   :  { %s233_s10 = scalar_lea.vmem %s20_s18, 64  ;;  %p238_p12 = scmp.lt.s32.totalorder %s20_s18, %s20_s18 }
  0x1b   :  { %p234_p11 = scmp.ne.s32.totalorder %s20_s18, %s233_s10  ;;  %p239_p13 = scmp.lt.s32.totalorder %s233_s10, %s233_s10 }
  0x1d   :  { %p240_p0 = por %p239_p13, %p238_p12 }
  0x1f   :  { %p241_p1 = pnand %p240_p0, %p234_p11 }
  0x21   :  { %244 = shalt.err (!%p241_p1)
}
  0x22   :  { %22 = dma.hbm_to_vmem [thread:$0]  %s415_s0, 64, %s20_s18, [#allocation3]  }
  0x23   :  { %s321_s12 = smov [#allocation7]   ;;  %s322_s14 = smov [#allocation8]  }
  0x24   :  { %s39_s13 = sshll.u32 %s321_s12, 4  ;;  %s49_s15 = sshll.u32 %s322_s14, 4  ;;  %s40_s13 = int_to_ptr.vmem [resolvable:$true] %s39_s13  ;;  %s50_s15 = int_to_ptr.vmem [resolvable:$true] %s49_s15 }
  0x25   :  { %s245_s19 = scalar_lea.hbm %s417_s2, 32 }
  0x26   :  { %p246_p2 = scmp.ne.s32.totalorder %s417_s2, %s245_s19  ;;  %p249_p3 = scmp.lt.u32.totalorder %s245_s19, %s417_s2 }
  0x28   :  { %p251_p4 = pnand %p249_p3, %p246_p2 }
  0x2a   :  { %254 = shalt.err (!%p251_p4)
}
  0x2b   :  { %s255_s0 = scalar_lea.vmem %s40_s13, 32  ;;  %p260_p6 = scmp.lt.s32.totalorder %s40_s13, %s40_s13 }
  0x2c   :  { %p256_p5 = scmp.ne.s32.totalorder %s40_s13, %s255_s0  ;;  %p261_p7 = scmp.lt.s32.totalorder %s255_s0, %s255_s0 }
  0x2e   :  { %p262_p8 = por %p261_p7, %p260_p6 }
  0x30   :  { %p263_p9 = pnand %p262_p8, %p256_p5 }
  0x32   :  { %266 = shalt.err (!%p263_p9)
}
  0x33   :  { %42 = dma.hbm_to_vmem [thread:$0]  %s417_s2, 32, %s40_s13, [#allocation6]  }
  0x34   :  { %s267_s27 = scalar_lea.hbm %s418_s3, 32 }
  0x35   :  { %p268_p10 = scmp.ne.s32.totalorder %s418_s3, %s267_s27  ;;  %p271_p11 = scmp.lt.u32.totalorder %s267_s27, %s418_s3 }
  0x37   :  { %p273_p12 = pnand %p271_p11, %p268_p10 }
  0x39   :  { %276 = shalt.err (!%p273_p12)
}
  0x3a   :  { %s277_s6 = scalar_lea.vmem %s50_s15, 32  ;;  %p282_p0 = scmp.lt.s32.totalorder %s50_s15, %s50_s15 }
  0x3b   :  { %p278_p13 = scmp.ne.s32.totalorder %s50_s15, %s277_s6  ;;  %p283_p1 = scmp.lt.s32.totalorder %s277_s6, %s277_s6 }
  0x3d   :  { %p284_p2 = por %p283_p1, %p282_p0 }
  0x3f   :  { %p285_p3 = pnand %p284_p2, %p278_p13 }
  0x41   :  { %288 = shalt.err (!%p285_p3)
}
  0x42   :  { %52 = dma.hbm_to_vmem [thread:$0]  %s418_s3, 32, %s50_s15, [#allocation9]  }
  0x43   :  { %311 = dma.done.wait [#allocation3], 64  }
  0x44   :  { %312 = vsyncadd [#allocation3], 4294967232 }
  0x45   :  { %313 = dma.done.wait [#allocation6], 96  }
  0x46   :  { %314 = vsyncadd [#allocation6], 4294967200 }
  0x47   :  { %315 = dma.done.wait [#allocation9], 32  }
  0x48   :  { %316 = vsyncadd [#allocation9], 4294967264  ;;  %v72_v0 = vlaneseq  ;;  %v323_v1 = vmov 1983009808   ;;  %v65_v6 = vld [vmem:[#allocation2] sm:$0xf] }
  0x49   :  { %v70_v2 = vunpack.c.l.s4 %v323_v1  ;;  %vm79_vm0 = vcmask 1041408   ;;  %v324_v12 = vmov 269488144   ;;  %v66_v31 = vld [vmem:[#allocation7] sm:$0x3]  ;;  %s325_s3 = smov [#allocation10]  }
  0x4a   :  { %v73_v3 = vshrl.u32 %v72_v0, 7  ;;  %v89_v13 = vunpack.c.l.s4 %v324_v12  ;;  %v67_v32 = vld [vmem:[#allocation8] sm:$0x3]  ;;  %v170_v50 = vld [vmem:[#allocation5] sm:$0xf]  ;;  %s179_s8 = sshll.u32 %s325_s3, 4  ;;  %s180_s8 = int_to_ptr.vmem [resolvable:$true] %s179_s8 }
  0x4b   :  { %v71_v4 = vunpack.c.0.s8 %v70_v2  ;;  %s289_s9 = scalar_lea.vmem %s180_s8, 64  ;;  %p294_p5 = scmp.lt.s32.totalorder %s180_s8, %s180_s8 }
  0x4c   :  { %v90_v14 = vunpack.c.0.s8 %v89_v13  ;;  %v130_v29 = vsub.s32 0, %v73_v3  ;;  %v134_v30 = vsub.s32 1, %v73_v3  ;;  %p290_p4 = scmp.ne.s32.totalorder %s180_s8, %s289_s9  ;;  %p295_p6 = scmp.lt.s32.totalorder %s289_s9, %s289_s9 }
  0x4d   :  { %v74_v5 = vsub.s32 %v71_v4, %v73_v3 }
  0x4e   :  { %v93_v15 = vsub.s32 %v90_v14, %v73_v3  ;;  %v131_v33 = vrot.slane %v66_v31, %v130_v29  ;;  %v135_v34 = vrot.slane %v66_v31, %v134_v30  ;;  %v150_v35 = vrot.slane %v67_v32, %v130_v29  ;;  %p296_p7 = por %p295_p6, %p294_p5 }
  0x4f   :  { %v75_v7 = vrot.slane %v65_v6, %v74_v5  ;;  %v154_v36 = vrot.slane %v67_v32, %v134_v30 }
  0x50   :  { %v136_v37 = vcombine.low %v131_v33, %v135_v34  ;;  %p297_p8 = pnand %p296_p7, %p290_p4 }
  0x51   :  { %v76_v8 = vcombine.high %v75_v7, %v75_v7  ;;  %v80_v9 = vsel %vm79_vm0, %v75_v7, 0.0  ;;  %v155_v38 = vcombine.low %v150_v35, %v154_v36 }
  0x52   :  { %v143_v41 = vrot.slane %v136_v37, %v74_v5 }
  0x53   :  { %v81_v10 = vsel %vm79_vm0, %v76_v8, 0.0  ;;  %v162_v43 = vrot.slane %v155_v38, %v74_v5 }
  0x54   :  { %v82_v11 = vadd.f32 %v81_v10, %v80_v9 }
  0x56   :  { %83 = vadd.xlane.f32.xlu0 %v82_v11 }
  0xe3   :  { %v84_v16 = vpop.xlane.xlu0 %83 }
  0xe4   :  { %v86_v17 = vmul.f32 0.00390625, %v84_v16 }
  0xe6   :  { %v94_v18 = vrot.slane %v86_v17, %v93_v15 }
  0xe8   :  { %v96_v19 = vsub.f32 %v65_v6, %v94_v18 }
  0xea   :  { %v97_v20 = vmul.f32 %v96_v19, %v96_v19 }
  0xec   :  { %v105_v21 = vrot.slane %v97_v20, %v74_v5 }
  0xee   :  { %v106_v22 = vcombine.high %v105_v21, %v105_v21  ;;  %v109_v23 = vsel %vm79_vm0, %v105_v21, 0.0 }
  0xf0   :  { %v110_v24 = vsel %vm79_vm0, %v106_v22, 0.0 }
  0xf1   :  { %v111_v25 = vadd.f32 %v110_v24, %v109_v23 }
  0xf3   :  { %112 = vadd.xlane.f32.xlu0 %v111_v25 }
 0x180   :  { %v113_v26 = vpop.xlane.xlu0 %112 }
 0x181   :  { %v114_v27 = vmul.f32 0.00390625, %v113_v26 }
 0x183   :  { %v115_v28 = vadd.f32 1e-05, %v114_v27 }
 0x185   :  { %197 = vrsqrt.f32 %v115_v28 }
 0x18f   :  { %v198_v39 = vpop.eup %197 }
 0x190   :  { %v124_v40 = vrot.slane %v198_v39, %v93_v15 }
 0x192   :  { %v126_v42 = vmul.f32 %v124_v40, %v96_v19 }
 0x194   :  { %v145_v44 = vmul.f32 %v143_v41, %v126_v42 }
 0x196   :  { %v164_v45 = vadd.f32 %v162_v43, %v145_v44 }
 0x198   :  { %v166_v46 = vmul.f32 0.70710677, %v164_v45  ;;  %v165_v48 = vmul.f32 0.5, %v164_v45 }
 0x19a   :  { %199 = verf.f32 %v166_v46 }
 0x1a4   :  { %v200_v47 = vpop.eup %199 }
 0x1a5   :  { %v168_v49 = vadd.f32 1.0, %v200_v47 }
 0x1a7   :  { %v169_v51 = vmul.f32 %v168_v49, %v165_v48 }
 0x1a9   :  { %v171_v52 = vadd.f32 %v170_v50, %v169_v51 }
 0x1ab   :  { %172 = vst [vmem:[#allocation10] sm:$0xf] %v171_v52 }
 0x1ac   :  { %300 = shalt.err (!%p297_p8)
}
 0x1ad   :  { %s301_s11 = scalar_lea.hbm %s419_s4, 64 }
 0x1ae   :  { %p302_p9 = scmp.ne.s32.totalorder %s419_s4, %s301_s11  ;;  %p305_p10 = scmp.lt.u32.totalorder %s301_s11, %s419_s4 }
 0x1b0   :  { %p307_p11 = pnand %p305_p10, %p302_p9 }
 0x1b2   :  { %310 = shalt.err (!%p307_p11)
}
 0x1b3   :  { %182 = dma.vmem_to_hbm [thread:$0]  %s180_s8, 64, %s419_s4, [#allocation4]  }
 0x1b4   :  { %317 = dma.done.wait [#allocation4], 64  }
 0x1b5   :  { %318 = vsyncadd [#allocation4], 4294967232 }
 0x1b6   :  { %186 = vsyncpa [#allocation3], 1 }
 0x1b7   :  { %187 = vsyncpa [#allocation6], 1 }
 0x1b8   :  { %188 = vsyncpa [#allocation9], 1 }
 0x1b9   :  { %189 = vsyncpa [#allocation4], 1 }

// kernel: brain_network_forward.8
= control target key start
LH: loop header
LB: loop body
LE: loop exit
PB: predicated region body
PF: predicated region fallthrough
CT: control target
= control target key end

     0   :  { %8 = vsyncpa [#allocation3], 0  ;;  %s932_s0 = inlined_call_operand.hbm [shape: f32[2,512], index: 0, kind: input, shape index: {}]   ;;  %s933_s1 = inlined_call_operand.hbm [shape: bf16[512,256], index: 1, kind: input, shape index: {}]   ;;  %s934_s2 = inlined_call_operand.hbm [shape: f32[1,256], index: 2, kind: input, shape index: {}]   ;;  %s935_s3 = inlined_call_operand.hbm [shape: f32[2,256], index: 3, kind: output, shape index: {}]  }
   0x1   :  { %9 = vsyncpa [#allocation6], 0 }
   0x2   :  { %10 = vsyncpa [#allocation4], 0  ;;  %s852_s12 = smov [#allocation5]   ;;  %s758_s16 = scalar_lea.hbm %s933_s1, 8192 }
   0x3   :  { %s26_s13 = sshll.u32 %s852_s12, 4  ;;  %p759_p0 = scmp.ne.s32.totalorder %s933_s1, %s758_s16  ;;  %s27_s13 = int_to_ptr.vmem [resolvable:$true] %s26_s13 }
   0x4   :  { %p762_p1 = scmp.lt.u32.totalorder %s758_s16, %s933_s1 }
   0x6   :  { %p764_p2 = pnand %p762_p1, %p759_p0 }
   0x8   :  { %767 = shalt.err (!%p764_p2)
}
   0x9   :  { %s768_s21 = scalar_lea.vmem %s27_s13, 8192  ;;  %p773_p4 = scmp.lt.s32.totalorder %s27_s13, %s27_s13 }
   0xa   :  { %p769_p3 = scmp.ne.s32.totalorder %s27_s13, %s768_s21  ;;  %p774_p5 = scmp.lt.s32.totalorder %s768_s21, %s768_s21 }
   0xc   :  { %p775_p6 = por %p774_p5, %p773_p4 }
   0xe   :  { %p776_p7 = pnand %p775_p6, %p769_p3 }
  0x10   :  { %779 = shalt.err (!%p776_p7)
}
  0x11   :  { %s853_s22 = smov 128   ;;  %s854_s23 = smov 8  }
  0x12   :  { %32 = dma.hbm_to_vmem [thread:$0]  %s933_s1, 8192, %s27_s13, [#allocation6], %s853_s22, %s853_s22, %s854_s23  }
  0x13   :  { %s855_s26 = smov [#allocation2]   ;;  %s856_s28 = smov [#allocation7]  }
  0x14   :  { %s17_s27 = sshll.u32 %s855_s26, 4  ;;  %s39_s29 = sshll.u32 %s856_s28, 4  ;;  %s18_s27 = int_to_ptr.vmem [resolvable:$true] %s17_s27  ;;  %s40_s29 = int_to_ptr.vmem [resolvable:$true] %s39_s29 }
  0x15   :  { %s780_s5 = scalar_lea.hbm %s932_s0, 128 }
  0x16   :  { %p781_p8 = scmp.ne.s32.totalorder %s932_s0, %s780_s5  ;;  %p784_p9 = scmp.lt.u32.totalorder %s780_s5, %s932_s0 }
  0x18   :  { %p786_p10 = pnand %p784_p9, %p781_p8 }
  0x1a   :  { %789 = shalt.err (!%p786_p10)
}
  0x1b   :  { %s790_s1 = scalar_lea.vmem %s18_s27, 128  ;;  %p795_p12 = scmp.lt.s32.totalorder %s18_s27, %s18_s27 }
  0x1c   :  { %p791_p11 = scmp.ne.s32.totalorder %s18_s27, %s790_s1  ;;  %p796_p13 = scmp.lt.s32.totalorder %s790_s1, %s790_s1 }
  0x1e   :  { %p797_p0 = por %p796_p13, %p795_p12 }
  0x20   :  { %p798_p1 = pnand %p797_p0, %p791_p11 }
  0x22   :  { %801 = shalt.err (!%p798_p1)
}
  0x23   :  { %20 = dma.hbm_to_vmem [thread:$0]  %s932_s0, 128, %s18_s27, [#allocation3]  }
  0x24   :  { %s802_s14 = scalar_lea.hbm %s934_s2, 32 }
  0x25   :  { %p803_p2 = scmp.ne.s32.totalorder %s934_s2, %s802_s14  ;;  %p806_p3 = scmp.lt.u32.totalorder %s802_s14, %s934_s2 }
  0x27   :  { %p808_p4 = pnand %p806_p3, %p803_p2 }
  0x29   :  { %811 = shalt.err (!%p808_p4)
}
  0x2a   :  { %s812_s19 = scalar_lea.vmem %s40_s29, 32  ;;  %p817_p6 = scmp.lt.s32.totalorder %s40_s29, %s40_s29 }
  0x2b   :  { %p813_p5 = scmp.ne.s32.totalorder %s40_s29, %s812_s19  ;;  %p818_p7 = scmp.lt.s32.totalorder %s812_s19, %s812_s19 }
  0x2d   :  { %p819_p8 = por %p818_p7, %p817_p6 }
  0x2f   :  { %p820_p9 = pnand %p819_p8, %p813_p5 }
  0x31   :  { %823 = shalt.err (!%p820_p9)
}
  0x32   :  { %42 = dma.hbm_to_vmem [thread:$0]  %s934_s2, 32, %s40_s29, [#allocation6]  }
  0x33   :  { %846 = dma.done.wait [#allocation3], 128  }
  0x34   :  { %847 = vsyncadd [#allocation3], 4294967168 }
  0x35   :  { %848 = dma.done.wait [#allocation6], 8224  }
  0x36   :  { %849 = vsyncadd [#allocation6], 4294959072  ;;  %v661_v0 = vld [vmem:[#allocation5 + $0x4] ss:$8 sps:$4 sm:$0xff]   ;;  %v665_v2 = vld [vmem:[#allocation5] ss:$8 sps:$4 sm:$0xff]   ;;  %v58_v38 = vlaneseq }
  0x37   :  { %v663_v1 = vld [vmem:[#allocation5 + $0x104] ss:$8 sps:$4 sm:$0xff]   ;;  %475 = vmatprep.subr.bf16.mxu1 %v661_v0  ;;  %v666_v3 = vld [vmem:[#allocation5 + $0x100] ss:$8 sps:$4 sm:$0xff]   ;;  %v667_v4 = vld [vmem:[#allocation5 + $0x14] ss:$8 sps:$4 sm:$0xff]  }
  0x38   :  { %516 = vmatprep.subr.bf16.mxu0 %v663_v1  ;;  %476 = vmatpush1.bf16.msra.mxu1 %v665_v2  ;;  %v669_v5 = vld [vmem:[#allocation5 + $0x114] ss:$8 sps:$4 sm:$0xff]   ;;  %v671_v6 = vld [vmem:[#allocation5 + $0x10] ss:$8 sps:$4 sm:$0xff]   ;;  %v673_v8 = vld [vmem:[#allocation5 + $0x24] ss:$8 sps:$4 sm:$0xff]  }
  0x39   :  { %517 = vmatpush1.bf16.msra.mxu0 %v666_v3  ;;  %477 = vmatprep.subr.bf16.mxu1 %v667_v4  ;;  %v672_v7 = vld [vmem:[#allocation5 + $0x110] ss:$8 sps:$4 sm:$0xff]   ;;  %v675_v9 = vld [vmem:[#allocation5 + $0x124] ss:$8 sps:$4 sm:$0xff]   ;;  %v677_v10 = vld [vmem:[#allocation5 + $0x20] ss:$8 sps:$4 sm:$0xff]  }
  0x3a   :  { %518 = vmatprep.subr.bf16.mxu0 %v669_v5  ;;  %v678_v11 = vld [vmem:[#allocation5 + $0x120] ss:$8 sps:$4 sm:$0xff]   ;;  %v679_v12 = vld [vmem:[#allocation5 + $0x34] ss:$8 sps:$4 sm:$0xff]   ;;  %v683_v14 = vld [vmem:[#allocation5 + $0x30] ss:$8 sps:$4 sm:$0xff]  }
  0x3b   :  { %v681_v13 = vld [vmem:[#allocation5 + $0x134] ss:$8 sps:$4 sm:$0xff]   ;;  %v684_v15 = vld [vmem:[#allocation5 + $0x130] ss:$8 sps:$4 sm:$0xff]   ;;  %v685_v16 = vld [vmem:[#allocation5 + $0x44] ss:$8 sps:$4 sm:$0xff]  }
  0x3c   :  { %478 = vmatpush1.bf16.msra.mxu1 %v671_v6  ;;  %v687_v17 = vld [vmem:[#allocation5 + $0x144] ss:$8 sps:$4 sm:$0xff]   ;;  %v689_v18 = vld [vmem:[#allocation5 + $0x40] ss:$8 sps:$4 sm:$0xff]   ;;  %v691_v20 = vld [vmem:[#allocation5 + $0x54] ss:$8 sps:$4 sm:$0xff]  }
  0x3d   :  { %519 = vmatpush1.bf16.msra.mxu0 %v672_v7  ;;  %479 = vmatprep.subr.bf16.mxu1 %v673_v8  ;;  %v690_v19 = vld [vmem:[#allocation5 + $0x140] ss:$8 sps:$4 sm:$0xff]   ;;  %v693_v21 = vld [vmem:[#allocation5 + $0x154] ss:$8 sps:$4 sm:$0xff]   ;;  %v695_v22 = vld [vmem:[#allocation5 + $0x50] ss:$8 sps:$4 sm:$0xff]  }
  0x3e   :  { %520 = vmatprep.subr.bf16.mxu0 %v675_v9  ;;  %v696_v23 = vld [vmem:[#allocation5 + $0x150] ss:$8 sps:$4 sm:$0xff]   ;;  %v697_v24 = vld [vmem:[#allocation5 + $0x64] ss:$8 sps:$4 sm:$0xff]   ;;  %v701_v26 = vld [vmem:[#allocation5 + $0x60] ss:$8 sps:$4 sm:$0xff]  }
  0x3f   :  { %v699_v25 = vld [vmem:[#allocation5 + $0x164] ss:$8 sps:$4 sm:$0xff]   ;;  %v702_v27 = vld [vmem:[#allocation5 + $0x160] ss:$8 sps:$4 sm:$0xff]   ;;  %v703_v28 = vld [vmem:[#allocation5 + $0x74] ss:$8 sps:$4 sm:$0xff]  }
  0x40   :  { %480 = vmatpush1.bf16.msra.mxu1 %v677_v10  ;;  %v705_v29 = vld [vmem:[#allocation5 + $0x174] ss:$8 sps:$4 sm:$0xff]   ;;  %v707_v30 = vld [vmem:[#allocation5 + $0x70] ss:$8 sps:$4 sm:$0xff]   ;;  %v709_v32 = vld [vmem:[#allocation5 + $0x84] ss:$8 sps:$4 sm:$0xff]  }
  0x41   :  { %521 = vmatpush1.bf16.msra.mxu0 %v678_v11  ;;  %481 = vmatprep.subr.bf16.mxu1 %v679_v12  ;;  %v708_v31 = vld [vmem:[#allocation5 + $0x170] ss:$8 sps:$4 sm:$0xff]   ;;  %v711_v33 = vld [vmem:[#allocation5 + $0x184] ss:$8 sps:$4 sm:$0xff]   ;;  %v713_v34 = vld [vmem:[#allocation5 + $0x80] ss:$8 sps:$4 sm:$0xff]  }
  0x42   :  { %522 = vmatprep.subr.bf16.mxu0 %v681_v13  ;;  %v714_v35 = vld [vmem:[#allocation5 + $0x180] ss:$8 sps:$4 sm:$0xff]   ;;  %v857_v36 = vmov 1983009808   ;;  %v715_v39 = vld [vmem:[#allocation5 + $0x94] ss:$8 sps:$4 sm:$0xff]  }
  0x43   :  { %v56_v37 = vunpack.c.l.s4 %v857_v36  ;;  %v717_v40 = vld [vmem:[#allocation5 + $0x194] ss:$8 sps:$4 sm:$0xff]   ;;  %v719_v41 = vld [vmem:[#allocation5 + $0x90] ss:$8 sps:$4 sm:$0xff]   ;;  %v915_v43 = vshrl.u32 %v58_v38, 7  ;;  %s858_s2 = smov [#allocation8]  }
  0x44   :  { %482 = vmatpush1.bf16.msra.mxu1 %v683_v14  ;;  %v720_v44 = vld [vmem:[#allocation5 + $0x190] ss:$8 sps:$4 sm:$0xff]   ;;  %v721_v45 = vld [vmem:[#allocation5 + $0xa4] ss:$8 sps:$4 sm:$0xff]   ;;  %v725_v47 = vld [vmem:[#allocation5 + $0xa0] ss:$8 sps:$4 sm:$0xff]  }
  0x45   :  { %523 = vmatpush1.bf16.msra.mxu0 %v684_v15  ;;  %483 = vmatprep.subr.bf16.mxu1 %v685_v16  ;;  %v57_v42 = vunpack.c.0.s8 %v56_v37  ;;  %v723_v46 = vld [vmem:[#allocation5 + $0x1a4] ss:$8 sps:$4 sm:$0xff]   ;;  %v726_v48 = vld [vmem:[#allocation5 + $0x1a0] ss:$8 sps:$4 sm:$0xff]   ;;  %v727_v50 = vld [vmem:[#allocation5 + $0xb4] ss:$8 sps:$4 sm:$0xff]  }
  0x46   :  { %524 = vmatprep.subr.bf16.mxu0 %v687_v17  ;;  %v729_v51 = vld [vmem:[#allocation5 + $0x1b4] ss:$8 sps:$4 sm:$0xff]   ;;  %v731_v55 = vld [vmem:[#allocation5 + $0xb0] ss:$8 sps:$4 sm:$0xff]   ;;  %v733_v57 = vld [vmem:[#allocation5 + $0xc4] ss:$8 sps:$4 sm:$0xff]  }
  0x47   :  { %v60_v49 = vsub.s32 %v57_v42, %v915_v43  ;;  %v52_v52 = vld [vmem:[#allocation2] sm:$0xff]  ;;  %v735_v58 = vld [vmem:[#allocation5 + $0x1c4] ss:$8 sps:$4 sm:$0xff]   ;;  %v737_v63 = vld [vmem:[#allocation5 + $0xc0] ss:$8 sps:$4 sm:$0xff]   ;;  %v147_v16 = vsub.s32 0, %v915_v43 }
  0x48   :  { %484 = vmatpush1.bf16.msra.mxu1 %v689_v18  ;;  %v54_v54 = vcombine.high %v52_v52, %v52_v52  ;;  %v732_v56 = vld [vmem:[#allocation5 + $0x1b0] ss:$8 sps:$4 sm:$0xff]   ;;  %v738_v0 = vld [vmem:[#allocation5 + $0x1c0] ss:$8 sps:$4 sm:$0xff]   ;;  %v739_v1 = vld [vmem:[#allocation5 + $0xd4] ss:$8 sps:$4 sm:$0xff]  }
  0x49   :  { %525 = vmatpush1.bf16.msra.mxu0 %v690_v19  ;;  %485 = vmatprep.subr.bf16.mxu1 %v691_v20  ;;  %v61_v53 = vrot.slane %v52_v52, %v60_v49  ;;  %v741_v2 = vld [vmem:[#allocation5 + $0x1d4] ss:$8 sps:$4 sm:$0xff]   ;;  %v743_v4 = vld [vmem:[#allocation5 + $0xd0] ss:$8 sps:$4 sm:$0xff]   ;;  %v745_v6 = vld [vmem:[#allocation5 + $0xe4] ss:$8 sps:$4 sm:$0xff]  }
  0x4a   :  { %526 = vmatprep.subr.bf16.mxu0 %v693_v21  ;;  %v68_v60 = vrot.slane %v54_v54, %v60_v49  ;;  %v744_v5 = vld [vmem:[#allocation5 + $0x1d0] ss:$8 sps:$4 sm:$0xff]   ;;  %v747_v7 = vld [vmem:[#allocation5 + $0x1e4] ss:$8 sps:$4 sm:$0xff]   ;;  %v749_v8 = vld [vmem:[#allocation5 + $0xe0] ss:$8 sps:$4 sm:$0xff]  }
  0x4b   :  { %v69_v59 = vcombine.high %v61_v53, %v61_v53  ;;  %v750_v9 = vld [vmem:[#allocation5 + $0x1e0] ss:$8 sps:$4 sm:$0xff]   ;;  %v751_v10 = vld [vmem:[#allocation5 + $0xf4] ss:$8 sps:$4 sm:$0xff]   ;;  %v755_v12 = vld [vmem:[#allocation5 + $0xf0] ss:$8 sps:$4 sm:$0xff]   ;;  %v75_v14 = vpack.c.bf16 %v61_v53, %v61_v53 }
  0x4c   :  { %486 = vmatpush1.bf16.msra.mxu1 %v695_v22  ;;  %v70_v62 = vcombine.high %v68_v60, %v68_v60  ;;  %v753_v11 = vld [vmem:[#allocation5 + $0x1f4] ss:$8 sps:$4 sm:$0xff]   ;;  %v756_v13 = vld [vmem:[#allocation5 + $0x1f0] ss:$8 sps:$4 sm:$0xff]   ;;  %v77_v15 = vpack.c.bf16 %v68_v60, %v68_v60  ;;  %v143_v17 = vld [vmem:[#allocation7] sm:$0x3] }
  0x4d   :  { %527 = vmatpush1.bf16.msra.mxu0 %v696_v23  ;;  %487 = vmatprep.subr.bf16.mxu1 %v697_v24  ;;  %v76_v61 = vpack.c.bf16 %v69_v59, %v69_v59  ;;  %v151_v18 = vsub.s32 1, %v915_v43  ;;  %v148_v19 = vrot.slane %v143_v17, %v147_v16  ;;  %s575_s21 = sshll.u32 %s858_s2, 4  ;;  %s576_s21 = int_to_ptr.vmem [resolvable:$true] %s575_s21 }
  0x4e   :  { %528 = vmatprep.subr.bf16.mxu0 %v699_v25  ;;  %v78_v3 = vpack.c.bf16 %v70_v62, %v70_v62  ;;  %s824_s22 = scalar_lea.vmem %s576_s21, 64  ;;  %p829_p11 = scmp.lt.s32.totalorder %s576_s21, %s576_s21 }
  0x4f   :  { %507 = vmatprep.mubr.bf16.mxu1 %v76_v61  ;;  %v152_v20 = vrot.slane %v143_v17, %v151_v18  ;;  %p825_p10 = scmp.ne.s32.totalorder %s576_s21, %s824_s22  ;;  %p830_p12 = scmp.lt.s32.totalorder %s824_s22, %s824_s22 }
  0x50   :  { %488 = vmatpush1.bf16.msra.mxu1 %v701_v26  ;;  %548 = vmatprep.mubr.bf16.mxu0 %v78_v3 }
  0x51   :  { %529 = vmatpush1.bf16.msra.mxu0 %v702_v27  ;;  %489 = vmatprep.subr.bf16.mxu1 %v703_v28  ;;  %p831_p13 = por %p830_p12, %p829_p11 }
  0x52   :  { %530 = vmatprep.subr.bf16.mxu0 %v705_v29 }
  0x53   :  { %p832_p0 = pnand %p831_p13, %p825_p10 }
  0x54   :  { %490 = vmatpush1.bf16.msra.mxu1 %v707_v30 }
  0x55   :  { %531 = vmatpush1.bf16.msra.mxu0 %v708_v31  ;;  %491 = vmatprep.subr.bf16.mxu1 %v709_v32 }
  0x56   :  { %532 = vmatprep.subr.bf16.mxu0 %v711_v33 }
  0x58   :  { %492 = vmatpush1.bf16.msra.mxu1 %v713_v34 }
  0x59   :  { %533 = vmatpush1.bf16.msra.mxu0 %v714_v35  ;;  %493 = vmatprep.subr.bf16.mxu1 %v715_v39 }
  0x5a   :  { %534 = vmatprep.subr.bf16.mxu0 %v717_v40 }
  0x5c   :  { %494 = vmatpush1.bf16.msra.mxu1 %v719_v41 }
  0x5d   :  { %535 = vmatpush1.bf16.msra.mxu0 %v720_v44  ;;  %495 = vmatprep.subr.bf16.mxu1 %v721_v45 }
  0x5e   :  { %536 = vmatprep.subr.bf16.mxu0 %v723_v46 }
  0x60   :  { %496 = vmatpush1.bf16.msra.mxu1 %v725_v47 }
  0x61   :  { %537 = vmatpush1.bf16.msra.mxu0 %v726_v48  ;;  %497 = vmatprep.subr.bf16.mxu1 %v727_v50 }
  0x62   :  { %538 = vmatprep.subr.bf16.mxu0 %v729_v51 }
  0x64   :  { %498 = vmatpush1.bf16.msra.mxu1 %v731_v55 }
  0x65   :  { %539 = vmatpush1.bf16.msra.mxu0 %v732_v56  ;;  %499 = vmatprep.subr.bf16.mxu1 %v733_v57 }
  0x66   :  { %540 = vmatprep.subr.bf16.mxu0 %v735_v58 }
  0x68   :  { %500 = vmatpush1.bf16.msra.mxu1 %v737_v63 }
  0x69   :  { %541 = vmatpush1.bf16.msra.mxu0 %v738_v0  ;;  %501 = vmatprep.subr.bf16.mxu1 %v739_v1 }
  0x6a   :  { %542 = vmatprep.subr.bf16.mxu0 %v741_v2 }
  0x6c   :  { %502 = vmatpush1.bf16.msra.mxu1 %v743_v4 }
  0x6d   :  { %543 = vmatpush1.bf16.msra.mxu0 %v744_v5  ;;  %503 = vmatprep.subr.bf16.mxu1 %v745_v6 }
  0x6e   :  { %544 = vmatprep.subr.bf16.mxu0 %v747_v7 }
  0x70   :  { %504 = vmatpush1.bf16.msra.mxu1 %v749_v8 }
  0x71   :  { %545 = vmatpush1.bf16.msra.mxu0 %v750_v9  ;;  %505 = vmatprep.subr.bf16.mxu1 %v751_v10 }
  0x72   :  { %546 = vmatprep.subr.bf16.mxu0 %v753_v11 }
  0x74   :  { %506 = vmatpush1.bf16.msra.mxu1 %v755_v12 }
  0x75   :  { %547 = vmatpush1.bf16.msra.mxu0 %v756_v13 }
  0x77   :  { %508 = vmatmul.mubr.bf16.vlgmr.msra.gmra.mrb[0].mxu1 %v75_v14 }
  0x78   :  { %549 = vmatmul.mubr.bf16.vlgmr.msra.gmra.mrb[0].mxu0 %v77_v15 }
 0x14a   :  { %v509_v21 = vpop.f32.mrb[0].mxu1 }
 0x14b   :  { %v550_v22 = vpop.f32.mrb[0].mxu0  ;;  %v510_v23 = vadd.f32 %v509_v21, %v148_v19  ;;  %v511_v24 = vpop.f32.mrb[1].mxu1 }
 0x14c   :  { %v552_v25 = vpop.f32.mrb[1].mxu0  ;;  %v512_v26 = vadd.f32 %v511_v24, %v152_v20  ;;  %v513_v27 = vpop.f32.mrb[2].mxu1 }
 0x14d   :  { %v554_v28 = vpop.f32.mrb[2].mxu0  ;;  %v551_v29 = vadd.f32 %v550_v22, %v510_v23  ;;  %v514_v30 = vpop.f32.mrb[3].mxu1 }
 0x14e   :  { %v555_v31 = vpop.f32.mrb[3].mxu0  ;;  %v553_v32 = vadd.f32 %v552_v25, %v512_v26 }
 0x150   :  { %v559_v33 = vcombine.low %v551_v29, %v553_v32 }
 0x152   :  { %649 = vst.sshfl [vmem:[#allocation8] sm:$0x33 pattern:$0x76325410] %v559_v33 }
 0x153   :  { %835 = shalt.err (!%p832_p0)
}
 0x154   :  { %s836_s25 = scalar_lea.hbm %s935_s3, 64 }
 0x155   :  { %p837_p1 = scmp.ne.s32.totalorder %s935_s3, %s836_s25  ;;  %p840_p2 = scmp.lt.u32.totalorder %s836_s25, %s935_s3 }
 0x157   :  { %p842_p3 = pnand %p840_p2, %p837_p1 }
 0x159   :  { %845 = shalt.err (!%p842_p3)
}
 0x15a   :  { %578 = dma.vmem_to_hbm [thread:$0]  %s576_s21, 64, %s935_s3, [#allocation4]  }
 0x15b   :  { %850 = dma.done.wait [#allocation4], 64  }
 0x15c   :  { %851 = vsyncadd [#allocation4], 4294967232 }
 0x15d   :  { %582 = vsyncpa [#allocation3], 1 }
 0x15e   :  { %583 = vsyncpa [#allocation6], 1 }
 0x15f   :  { %584 = vsyncpa [#allocation4], 1 }

// kernel: brain_network_forward.14
= control target key start
LH: loop header
LB: loop body
LE: loop exit
PB: predicated region body
PF: predicated region fallthrough
CT: control target
= control target key end

     0   :  { %8 = vsyncpa [#allocation3], 0  ;;  %s930_s0 = inlined_call_operand.hbm [shape: f32[2,256], index: 0, kind: input, shape index: {}]   ;;  %s931_s1 = inlined_call_operand.hbm [shape: bf16[256,512], index: 1, kind: input, shape index: {}]   ;;  %s932_s2 = inlined_call_operand.hbm [shape: f32[1,512], index: 2, kind: input, shape index: {}]   ;;  %s933_s3 = inlined_call_operand.hbm [shape: f32[2,512], index: 3, kind: output, shape index: {}]  }
   0x1   :  { %9 = vsyncpa [#allocation6], 0 }
   0x2   :  { %10 = vsyncpa [#allocation4], 0  ;;  %s855_s12 = smov [#allocation5]   ;;  %s761_s16 = scalar_lea.hbm %s931_s1, 8192 }
   0x3   :  { %s26_s13 = sshll.u32 %s855_s12, 4  ;;  %p762_p0 = scmp.ne.s32.totalorder %s931_s1, %s761_s16  ;;  %s27_s13 = int_to_ptr.vmem [resolvable:$true] %s26_s13 }
   0x4   :  { %p765_p1 = scmp.lt.u32.totalorder %s761_s16, %s931_s1 }
   0x6   :  { %p767_p2 = pnand %p765_p1, %p762_p0 }
   0x8   :  { %770 = shalt.err (!%p767_p2)
}
   0x9   :  { %s771_s21 = scalar_lea.vmem %s27_s13, 8192  ;;  %p776_p4 = scmp.lt.s32.totalorder %s27_s13, %s27_s13 }
   0xa   :  { %p772_p3 = scmp.ne.s32.totalorder %s27_s13, %s771_s21  ;;  %p777_p5 = scmp.lt.s32.totalorder %s771_s21, %s771_s21 }
   0xc   :  { %p778_p6 = por %p777_p5, %p776_p4 }
   0xe   :  { %p779_p7 = pnand %p778_p6, %p772_p3 }
  0x10   :  { %782 = shalt.err (!%p779_p7)
}
  0x11   :  { %s856_s22 = smov 256   ;;  %s857_s23 = smov 16  }
  0x12   :  { %32 = dma.hbm_to_vmem [thread:$0]  %s931_s1, 8192, %s27_s13, [#allocation6], %s856_s22, %s856_s22, %s857_s23  }
  0x13   :  { %s858_s26 = smov [#allocation2]   ;;  %s859_s28 = smov [#allocation7]  }
  0x14   :  { %s17_s27 = sshll.u32 %s858_s26, 4  ;;  %s39_s29 = sshll.u32 %s859_s28, 4  ;;  %s18_s27 = int_to_ptr.vmem [resolvable:$true] %s17_s27  ;;  %s40_s29 = int_to_ptr.vmem [resolvable:$true] %s39_s29 }
  0x15   :  { %s783_s5 = scalar_lea.hbm %s930_s0, 64 }
  0x16   :  { %p784_p8 = scmp.ne.s32.totalorder %s930_s0, %s783_s5  ;;  %p787_p9 = scmp.lt.u32.totalorder %s783_s5, %s930_s0 }
  0x18   :  { %p789_p10 = pnand %p787_p9, %p784_p8 }
  0x1a   :  { %792 = shalt.err (!%p789_p10)
}
  0x1b   :  { %s793_s1 = scalar_lea.vmem %s18_s27, 64  ;;  %p798_p12 = scmp.lt.s32.totalorder %s18_s27, %s18_s27 }
  0x1c   :  { %p794_p11 = scmp.ne.s32.totalorder %s18_s27, %s793_s1  ;;  %p799_p13 = scmp.lt.s32.totalorder %s793_s1, %s793_s1 }
  0x1e   :  { %p800_p0 = por %p799_p13, %p798_p12 }
  0x20   :  { %p801_p1 = pnand %p800_p0, %p794_p11 }
  0x22   :  { %804 = shalt.err (!%p801_p1)
}
  0x23   :  { %20 = dma.hbm_to_vmem [thread:$0]  %s930_s0, 64, %s18_s27, [#allocation3]  }
  0x24   :  { %s805_s14 = scalar_lea.hbm %s932_s2, 64 }
  0x25   :  { %p806_p2 = scmp.ne.s32.totalorder %s932_s2, %s805_s14  ;;  %p809_p3 = scmp.lt.u32.totalorder %s805_s14, %s932_s2 }
  0x27   :  { %p811_p4 = pnand %p809_p3, %p806_p2 }
  0x29   :  { %814 = shalt.err (!%p811_p4)
}
  0x2a   :  { %s815_s19 = scalar_lea.vmem %s40_s29, 64  ;;  %p820_p6 = scmp.lt.s32.totalorder %s40_s29, %s40_s29 }
  0x2b   :  { %p816_p5 = scmp.ne.s32.totalorder %s40_s29, %s815_s19  ;;  %p821_p7 = scmp.lt.s32.totalorder %s815_s19, %s815_s19 }
  0x2d   :  { %p822_p8 = por %p821_p7, %p820_p6 }
  0x2f   :  { %p823_p9 = pnand %p822_p8, %p816_p5 }
  0x31   :  { %826 = shalt.err (!%p823_p9)
}
  0x32   :  { %42 = dma.hbm_to_vmem [thread:$0]  %s932_s2, 64, %s40_s29, [#allocation6]  }
  0x33   :  { %849 = dma.done.wait [#allocation3], 64  }
  0x34   :  { %850 = vsyncadd [#allocation3], 4294967232 }
  0x35   :  { %851 = dma.done.wait [#allocation6], 8256  }
  0x36   :  { %852 = vsyncadd [#allocation6], 4294959040  ;;  %v665_v0 = vld [vmem:[#allocation5 + $0x4] ss:$16 sps:$4 sm:$0xff]   ;;  %v667_v1 = vld [vmem:[#allocation5 + $0xc] ss:$16 sps:$4 sm:$0xff]  }
  0x37   :  { %472 = vmatprep.subr.bf16.mxu0 %v665_v0  ;;  %v669_v2 = vld [vmem:[#allocation5] ss:$16 sps:$4 sm:$0xff]   ;;  %v670_v3 = vld [vmem:[#allocation5 + $0x8] ss:$16 sps:$4 sm:$0xff]   ;;  %513 = vmatprep.subr.bf16.mxu1 %v667_v1  ;;  %v671_v4 = vld [vmem:[#allocation5 + $0x24] ss:$16 sps:$4 sm:$0xff]  }
  0x38   :  { %473 = vmatpush1.bf16.msra.mxu0 %v669_v2  ;;  %514 = vmatpush1.bf16.msra.mxu1 %v670_v3  ;;  %v673_v5 = vld [vmem:[#allocation5 + $0x2c] ss:$16 sps:$4 sm:$0xff]   ;;  %v675_v6 = vld [vmem:[#allocation5 + $0x20] ss:$16 sps:$4 sm:$0xff]   ;;  %v676_v7 = vld [vmem:[#allocation5 + $0x28] ss:$16 sps:$4 sm:$0xff]  }
  0x39   :  { %474 = vmatprep.subr.bf16.mxu0 %v671_v4  ;;  %515 = vmatprep.subr.bf16.mxu1 %v673_v5  ;;  %v677_v8 = vld [vmem:[#allocation5 + $0x44] ss:$16 sps:$4 sm:$0xff]   ;;  %v679_v9 = vld [vmem:[#allocation5 + $0x4c] ss:$16 sps:$4 sm:$0xff]   ;;  %v681_v10 = vld [vmem:[#allocation5 + $0x40] ss:$16 sps:$4 sm:$0xff]   ;;  %v132_v4 = vlaneseq }
  0x3a   :  { %v682_v11 = vld [vmem:[#allocation5 + $0x48] ss:$16 sps:$4 sm:$0xff]   ;;  %v683_v12 = vld [vmem:[#allocation5 + $0x64] ss:$16 sps:$4 sm:$0xff]   ;;  %v685_v13 = vld [vmem:[#allocation5 + $0x6c] ss:$16 sps:$4 sm:$0xff]  }
  0x3b   :  { %v687_v14 = vld [vmem:[#allocation5 + $0x60] ss:$16 sps:$4 sm:$0xff]   ;;  %v688_v15 = vld [vmem:[#allocation5 + $0x68] ss:$16 sps:$4 sm:$0xff]   ;;  %v689_v16 = vld [vmem:[#allocation5 + $0x84] ss:$16 sps:$4 sm:$0xff]  }
  0x3c   :  { %475 = vmatpush1.bf16.msra.mxu0 %v675_v6  ;;  %516 = vmatpush1.bf16.msra.mxu1 %v676_v7  ;;  %v691_v17 = vld [vmem:[#allocation5 + $0x8c] ss:$16 sps:$4 sm:$0xff]   ;;  %v693_v18 = vld [vmem:[#allocation5 + $0x80] ss:$16 sps:$4 sm:$0xff]   ;;  %v694_v19 = vld [vmem:[#allocation5 + $0x88] ss:$16 sps:$4 sm:$0xff]  }
  0x3d   :  { %476 = vmatprep.subr.bf16.mxu0 %v677_v8  ;;  %517 = vmatprep.subr.bf16.mxu1 %v679_v9  ;;  %v695_v20 = vld [vmem:[#allocation5 + $0xa4] ss:$16 sps:$4 sm:$0xff]   ;;  %v697_v21 = vld [vmem:[#allocation5 + $0xac] ss:$16 sps:$4 sm:$0xff]   ;;  %v699_v22 = vld [vmem:[#allocation5 + $0xa0] ss:$16 sps:$4 sm:$0xff]  }
  0x3e   :  { %v700_v23 = vld [vmem:[#allocation5 + $0xa8] ss:$16 sps:$4 sm:$0xff]   ;;  %v701_v24 = vld [vmem:[#allocation5 + $0xc4] ss:$16 sps:$4 sm:$0xff]   ;;  %v703_v25 = vld [vmem:[#allocation5 + $0xcc] ss:$16 sps:$4 sm:$0xff]  }
  0x3f   :  { %v705_v26 = vld [vmem:[#allocation5 + $0xc0] ss:$16 sps:$4 sm:$0xff]   ;;  %v706_v27 = vld [vmem:[#allocation5 + $0xc8] ss:$16 sps:$4 sm:$0xff]   ;;  %v707_v28 = vld [vmem:[#allocation5 + $0xe4] ss:$16 sps:$4 sm:$0xff]  }
  0x40   :  { %477 = vmatpush1.bf16.msra.mxu0 %v681_v10  ;;  %518 = vmatpush1.bf16.msra.mxu1 %v682_v11  ;;  %v709_v29 = vld [vmem:[#allocation5 + $0xec] ss:$16 sps:$4 sm:$0xff]   ;;  %v711_v30 = vld [vmem:[#allocation5 + $0xe0] ss:$16 sps:$4 sm:$0xff]   ;;  %v712_v31 = vld [vmem:[#allocation5 + $0xe8] ss:$16 sps:$4 sm:$0xff]  }
  0x41   :  { %478 = vmatprep.subr.bf16.mxu0 %v683_v12  ;;  %519 = vmatprep.subr.bf16.mxu1 %v685_v13  ;;  %v713_v32 = vld [vmem:[#allocation5 + $0x104] ss:$16 sps:$4 sm:$0xff]   ;;  %v715_v33 = vld [vmem:[#allocation5 + $0x10c] ss:$16 sps:$4 sm:$0xff]   ;;  %v717_v34 = vld [vmem:[#allocation5 + $0x100] ss:$16 sps:$4 sm:$0xff]  }
  0x42   :  { %v718_v35 = vld [vmem:[#allocation5 + $0x108] ss:$16 sps:$4 sm:$0xff]   ;;  %v719_v36 = vld [vmem:[#allocation5 + $0x124] ss:$16 sps:$4 sm:$0xff]   ;;  %v721_v37 = vld [vmem:[#allocation5 + $0x12c] ss:$16 sps:$4 sm:$0xff]  }
  0x43   :  { %v723_v38 = vld [vmem:[#allocation5 + $0x120] ss:$16 sps:$4 sm:$0xff]   ;;  %v724_v39 = vld [vmem:[#allocation5 + $0x128] ss:$16 sps:$4 sm:$0xff]   ;;  %v725_v40 = vld [vmem:[#allocation5 + $0x144] ss:$16 sps:$4 sm:$0xff]  }
  0x44   :  { %479 = vmatpush1.bf16.msra.mxu0 %v687_v14  ;;  %520 = vmatpush1.bf16.msra.mxu1 %v688_v15  ;;  %v727_v41 = vld [vmem:[#allocation5 + $0x14c] ss:$16 sps:$4 sm:$0xff]   ;;  %v729_v42 = vld [vmem:[#allocation5 + $0x140] ss:$16 sps:$4 sm:$0xff]   ;;  %v730_v43 = vld [vmem:[#allocation5 + $0x148] ss:$16 sps:$4 sm:$0xff]  }
  0x45   :  { %480 = vmatprep.subr.bf16.mxu0 %v689_v16  ;;  %521 = vmatprep.subr.bf16.mxu1 %v691_v17  ;;  %v731_v44 = vld [vmem:[#allocation5 + $0x164] ss:$16 sps:$4 sm:$0xff]   ;;  %v733_v45 = vld [vmem:[#allocation5 + $0x16c] ss:$16 sps:$4 sm:$0xff]   ;;  %v735_v47 = vld [vmem:[#allocation5 + $0x160] ss:$16 sps:$4 sm:$0xff]  }
  0x46   :  { %v593_v46 = vld.sshfl [vmem:[#allocation2] sm:$0x33 pattern:$0x76325410]  ;;  %v736_v48 = vld [vmem:[#allocation5 + $0x168] ss:$16 sps:$4 sm:$0xff]  }
  0x47   :  { %v61_v49 = vcombine.high %v593_v46, %v593_v46  ;;  %v737_v50 = vld [vmem:[#allocation5 + $0x184] ss:$16 sps:$4 sm:$0xff]   ;;  %v739_v51 = vld [vmem:[#allocation5 + $0x18c] ss:$16 sps:$4 sm:$0xff]   ;;  %v741_v53 = vld [vmem:[#allocation5 + $0x180] ss:$16 sps:$4 sm:$0xff]   ;;  %v64_v3 = vpack.c.bf16 %v593_v46, %v593_v46 }
  0x48   :  { %481 = vmatpush1.bf16.msra.mxu0 %v693_v18  ;;  %522 = vmatpush1.bf16.msra.mxu1 %v694_v19  ;;  %v742_v54 = vld [vmem:[#allocation5 + $0x188] ss:$16 sps:$4 sm:$0xff]   ;;  %v743_v55 = vld [vmem:[#allocation5 + $0x1a4] ss:$16 sps:$4 sm:$0xff]   ;;  %v745_v56 = vld [vmem:[#allocation5 + $0x1ac] ss:$16 sps:$4 sm:$0xff]  }
  0x49   :  { %482 = vmatprep.subr.bf16.mxu0 %v695_v20  ;;  %523 = vmatprep.subr.bf16.mxu1 %v697_v21  ;;  %v65_v52 = vpack.c.bf16 %v61_v49, %v61_v49  ;;  %v747_v57 = vld [vmem:[#allocation5 + $0x1a0] ss:$16 sps:$4 sm:$0xff]   ;;  %v748_v58 = vld [vmem:[#allocation5 + $0x1a8] ss:$16 sps:$4 sm:$0xff]   ;;  %v749_v59 = vld [vmem:[#allocation5 + $0x1c4] ss:$16 sps:$4 sm:$0xff]  }
  0x4a   :  { %v751_v60 = vld [vmem:[#allocation5 + $0x1cc] ss:$16 sps:$4 sm:$0xff]   ;;  %v753_v61 = vld [vmem:[#allocation5 + $0x1c0] ss:$16 sps:$4 sm:$0xff]   ;;  %v754_v62 = vld [vmem:[#allocation5 + $0x1c8] ss:$16 sps:$4 sm:$0xff]  }
  0x4b   :  { %504 = vmatprep.mubr.bf16.mxu0 %v65_v52  ;;  %545 = vmatprep.mubr.bf16.mxu1 %v65_v52  ;;  %v755_v63 = vld [vmem:[#allocation5 + $0x1e4] ss:$16 sps:$4 sm:$0xff]   ;;  %v757_v0 = vld [vmem:[#allocation5 + $0x1ec] ss:$16 sps:$4 sm:$0xff]   ;;  %v759_v1 = vld [vmem:[#allocation5 + $0x1e0] ss:$16 sps:$4 sm:$0xff]  }
  0x4c   :  { %483 = vmatpush1.bf16.msra.mxu0 %v699_v22  ;;  %524 = vmatpush1.bf16.msra.mxu1 %v700_v23  ;;  %v760_v2 = vld [vmem:[#allocation5 + $0x1e8] ss:$16 sps:$4 sm:$0xff]   ;;  %v133_v5 = vshrl.u32 %v132_v4, 7  ;;  %v130_v8 = vld [vmem:[#allocation7] sm:$0xf]  ;;  %s861_s2 = smov [#allocation8]  }
  0x4d   :  { %484 = vmatprep.subr.bf16.mxu0 %v701_v24  ;;  %525 = vmatprep.subr.bf16.mxu1 %v703_v25  ;;  %v860_v10 = vmov 1983009808   ;;  %s583_s21 = sshll.u32 %s861_s2, 4  ;;  %s584_s21 = int_to_ptr.vmem [resolvable:$true] %s583_s21 }
  0x4e   :  { %v134_v6 = vsub.s32 0, %v133_v5  ;;  %v142_v7 = vsub.s32 2, %v133_v5  ;;  %v138_v9 = vsub.s32 1, %v133_v5  ;;  %v561_v11 = vunpack.c.l.s4 %v860_v10  ;;  %s827_s22 = scalar_lea.vmem %s584_s21, 128  ;;  %p832_p11 = scmp.lt.s32.totalorder %s584_s21, %s584_s21 }
  0x4f   :  { %v146_v12 = vsub.s32 3, %v133_v5  ;;  %p828_p10 = scmp.ne.s32.totalorder %s584_s21, %s827_s22  ;;  %p833_p12 = scmp.lt.s32.totalorder %s827_s22, %s827_s22 }
  0x50   :  { %485 = vmatpush1.bf16.msra.mxu0 %v705_v26  ;;  %526 = vmatpush1.bf16.msra.mxu1 %v706_v27  ;;  %v135_v13 = vrot.slane %v130_v8, %v134_v6  ;;  %v143_v14 = vrot.slane %v130_v8, %v142_v7  ;;  %v139_v15 = vrot.slane %v130_v8, %v138_v9  ;;  %v562_v16 = vunpack.c.0.s8 %v561_v11 }
  0x51   :  { %486 = vmatprep.subr.bf16.mxu0 %v707_v28  ;;  %527 = vmatprep.subr.bf16.mxu1 %v709_v29  ;;  %v147_v17 = vrot.slane %v130_v8, %v146_v12  ;;  %p834_p13 = por %p833_p12, %p832_p11 }
  0x52   :  { %v565_v25 = vsub.s32 %v562_v16, %v133_v5 }
  0x53   :  { %p835_p0 = pnand %p834_p13, %p828_p10 }
  0x54   :  { %487 = vmatpush1.bf16.msra.mxu0 %v711_v30  ;;  %528 = vmatpush1.bf16.msra.mxu1 %v712_v31 }
  0x55   :  { %488 = vmatprep.subr.bf16.mxu0 %v713_v32  ;;  %529 = vmatprep.subr.bf16.mxu1 %v715_v33 }
  0x58   :  { %489 = vmatpush1.bf16.msra.mxu0 %v717_v34  ;;  %530 = vmatpush1.bf16.msra.mxu1 %v718_v35 }
  0x59   :  { %490 = vmatprep.subr.bf16.mxu0 %v719_v36  ;;  %531 = vmatprep.subr.bf16.mxu1 %v721_v37 }
  0x5c   :  { %491 = vmatpush1.bf16.msra.mxu0 %v723_v38  ;;  %532 = vmatpush1.bf16.msra.mxu1 %v724_v39 }
  0x5d   :  { %492 = vmatprep.subr.bf16.mxu0 %v725_v40  ;;  %533 = vmatprep.subr.bf16.mxu1 %v727_v41 }
  0x60   :  { %493 = vmatpush1.bf16.msra.mxu0 %v729_v42  ;;  %534 = vmatpush1.bf16.msra.mxu1 %v730_v43 }
  0x61   :  { %494 = vmatprep.subr.bf16.mxu0 %v731_v44  ;;  %535 = vmatprep.subr.bf16.mxu1 %v733_v45 }
  0x64   :  { %495 = vmatpush1.bf16.msra.mxu0 %v735_v47  ;;  %536 = vmatpush1.bf16.msra.mxu1 %v736_v48 }
  0x65   :  { %496 = vmatprep.subr.bf16.mxu0 %v737_v50  ;;  %537 = vmatprep.subr.bf16.mxu1 %v739_v51 }
  0x68   :  { %497 = vmatpush1.bf16.msra.mxu0 %v741_v53  ;;  %538 = vmatpush1.bf16.msra.mxu1 %v742_v54 }
  0x69   :  { %498 = vmatprep.subr.bf16.mxu0 %v743_v55  ;;  %539 = vmatprep.subr.bf16.mxu1 %v745_v56 }
  0x6c   :  { %499 = vmatpush1.bf16.msra.mxu0 %v747_v57  ;;  %540 = vmatpush1.bf16.msra.mxu1 %v748_v58 }
  0x6d   :  { %500 = vmatprep.subr.bf16.mxu0 %v749_v59  ;;  %541 = vmatprep.subr.bf16.mxu1 %v751_v60 }
  0x70   :  { %501 = vmatpush1.bf16.msra.mxu0 %v753_v61  ;;  %542 = vmatpush1.bf16.msra.mxu1 %v754_v62 }
  0x71   :  { %502 = vmatprep.subr.bf16.mxu0 %v755_v63  ;;  %543 = vmatprep.subr.bf16.mxu1 %v757_v0 }
  0x74   :  { %503 = vmatpush1.bf16.msra.mxu0 %v759_v1  ;;  %544 = vmatpush1.bf16.msra.mxu1 %v760_v2 }
  0x77   :  { %505 = vmatmul.mubr.bf16.vlgmr.msra.gmra.mrb[0].mxu0 %v64_v3  ;;  %546 = vmatmul.mubr.bf16.vlgmr.msra.gmra.mrb[0].mxu1 %v64_v3 }
 0x14a   :  { %v506_v18 = vpop.f32.mrb[0].mxu0  ;;  %v547_v19 = vpop.f32.mrb[0].mxu1 }
 0x14b   :  { %v507_v20 = vadd.f32 %v506_v18, %v135_v13  ;;  %v548_v21 = vadd.f32 %v547_v19, %v143_v14  ;;  %v508_v22 = vpop.f32.mrb[1].mxu0  ;;  %v549_v23 = vpop.f32.mrb[1].mxu1 }
 0x14c   :  { %v509_v24 = vadd.f32 %v508_v22, %v139_v15  ;;  %v550_v26 = vadd.f32 %v549_v23, %v147_v17  ;;  %v510_v27 = vpop.f32.mrb[2].mxu0  ;;  %v551_v28 = vpop.f32.mrb[2].mxu1 }
 0x14d   :  { %v511_v29 = vpop.f32.mrb[3].mxu0  ;;  %v552_v30 = vpop.f32.mrb[3].mxu1 }
 0x14e   :  { %v558_v31 = vcombine.low %v507_v20, %v509_v24  ;;  %v559_v32 = vcombine.low %v548_v21, %v550_v26 }
 0x150   :  { %v566_v33 = vrot.slane %v558_v31, %v565_v25  ;;  %v573_v34 = vrot.slane %v559_v32, %v565_v25 }
 0x152   :  { %v574_v35 = vcombine.low %v566_v33, %v573_v34 }
 0x154   :  { %576 = vst [vmem:[#allocation8] sm:$0xff] %v574_v35 }
 0x155   :  { %838 = shalt.err (!%p835_p0)
}
 0x156   :  { %s839_s25 = scalar_lea.hbm %s933_s3, 128 }
 0x157   :  { %p840_p1 = scmp.ne.s32.totalorder %s933_s3, %s839_s25  ;;  %p843_p2 = scmp.lt.u32.totalorder %s839_s25, %s933_s3 }
 0x159   :  { %p845_p3 = pnand %p843_p2, %p840_p1 }
 0x15b   :  { %848 = shalt.err (!%p845_p3)
}
 0x15c   :  { %586 = dma.vmem_to_hbm [thread:$0]  %s584_s21, 128, %s933_s3, [#allocation4]  }
 0x15d   :  { %853 = dma.done.wait [#allocation4], 128  }
 0x15e   :  { %854 = vsyncadd [#allocation4], 4294967168 }
 0x15f   :  { %590 = vsyncpa [#allocation3], 1 }
 0x160   :  { %591 = vsyncpa [#allocation6], 1 }
 0x161   :  { %592 = vsyncpa [#allocation4], 1 }

// kernel: brain_network_forward.15
= control target key start
LH: loop header
LB: loop body
LE: loop exit
PB: predicated region body
PF: predicated region fallthrough
CT: control target
= control target key end

     0   :  { %18 = vsyncpa [#allocation3], 0  ;;  %s1777_s0 = inlined_call_operand.hbm [shape: f32[8,128], index: 0, kind: input, shape index: {}]   ;;  %s1778_s1 = inlined_call_operand.hbm [shape: f32[1,128], index: 1, kind: input, shape index: {}]   ;;  %s1779_s2 = inlined_call_operand.hbm [shape: f32[1,128], index: 2, kind: input, shape index: {}]   ;;  %s1780_s3 = inlined_call_operand.hbm [shape: bf16[128,256], index: 3, kind: input, shape index: {}]   ;;  %s1781_s4 = inlined_call_operand.hbm [shape: f32[1,256], index: 4, kind: input, shape index: {}]   ;;  %s1782_s5 = inlined_call_operand.hbm [shape: f32[1,256], index: 5, kind: input, shape index: {}]   ;;  %s1783_s6 = inlined_call_operand.hbm [shape: f32[1,256], index: 6, kind: input, shape index: {}]   ;;  %s1784_s7 = inlined_call_operand.hbm [shape: bf16[256,256], index: 7, kind: input, shape index: {}]   ;;  %s1785_s8 = inlined_call_operand.hbm [shape: f32[1,256], index: 8, kind: input, shape index: {}]   ;;  %s1786_s9 = inlined_call_operand.hbm [shape: f32[1,256], index: 9, kind: input, shape index: {}]   ;;  %s1787_s10 = inlined_call_operand.hbm [shape: f32[1,256], index: 10, kind: input, shape index: {}]   ;;  %s1788_s11 = inlined_call_operand.hbm [shape: bf16[256,128], index: 11, kind: input, shape index: {}]   ;;  %s1789_s12 = inlined_call_operand.hbm [shape: f32[1,128], index: 12, kind: input, shape index: {}]   ;;  %s1790_s13 = inlined_call_operand.hbm [shape: f32[8,128], index: 13, kind: output, shape index: {}]  }
   0x1   :  { %19 = vsyncpa [#allocation6], 0 }
   0x2   :  { %20 = vsyncpa [#allocation9], 0 }
   0x3   :  { %21 = vsyncpa [#allocation12], 0 }
   0x4   :  { %22 = vsyncpa [#allocation15], 0 }
   0x5   :  { %23 = vsyncpa [#allocation18], 0 }
   0x6   :  { %24 = vsyncpa [#allocation21], 0 }
   0x7   :  { %25 = vsyncpa [#allocation4], 0  ;;  %s1477_s25 = smov [#allocation5]   ;;  %s1478_s27 = smov [#allocation8]  }
   0x8   :  { %s42_s26 = sshll.u32 %s1477_s25, 4  ;;  %s61_s28 = sshll.u32 %s1478_s27, 4  ;;  %s43_s26 = int_to_ptr.vmem [resolvable:$true] %s42_s26  ;;  %s1566_s28 = int_to_ptr.vmem [resolvable:$true] %s61_s28 }
   0x9   :  { %s1153_s14 = scalar_lea.hbm %s1778_s1, 16 }
   0xa   :  { %p1154_p0 = scmp.ne.s32.totalorder %s1778_s1, %s1153_s14  ;;  %p1157_p1 = scmp.lt.u32.totalorder %s1153_s14, %s1778_s1 }
   0xc   :  { %p1159_p2 = pnand %p1157_p1, %p1154_p0 }
   0xe   :  { %1162 = shalt.err (!%p1159_p2)
}
   0xf   :  { %s1163_s19 = scalar_lea.vmem %s43_s26, 16  ;;  %s1167_s20 = scalar_lea.vmem %s43_s26, 32 }
  0x10   :  { %p1164_p3 = scmp.ne.s32.totalorder %s43_s26, %s1163_s19  ;;  %p1168_p4 = scmp.lt.s32.totalorder %s43_s26, %s43_s26 }
  0x11   :  { %p1169_p5 = scmp.lt.s32.totalorder %s1167_s20, %s1163_s19 }
  0x13   :  { %p1170_p6 = por %p1169_p5, %p1168_p4 }
  0x15   :  { %p1171_p7 = pnand %p1170_p6, %p1164_p3 }
  0x17   :  { %1174 = shalt.err (!%p1171_p7)
}
  0x18   :  { %45 = dma.hbm_to_vmem [thread:$0]  %s1778_s1, 16, %s43_s26, [#allocation6]  }
  0x19   :  { %s1175_s25 = scalar_lea.hbm %s1780_s3, 2048 }
  0x1a   :  { %p1176_p8 = scmp.ne.s32.totalorder %s1780_s3, %s1175_s25  ;;  %p1179_p9 = scmp.lt.u32.totalorder %s1175_s25, %s1780_s3 }
  0x1c   :  { %p1181_p10 = pnand %p1179_p9, %p1176_p8 }
  0x1e   :  { %1184 = shalt.err (!%p1181_p10)
}
  0x1f   :  { %s1185_s15 = scalar_lea.vmem %s1566_s28, 2048  ;;  %p1190_p12 = scmp.lt.s32.totalorder %s1566_s28, %s1566_s28 }
  0x20   :  { %p1186_p11 = scmp.ne.s32.totalorder %s1566_s28, %s1185_s15  ;;  %p1191_p13 = scmp.lt.s32.totalorder %s1185_s15, %s1185_s15 }
  0x22   :  { %p1192_p0 = por %p1191_p13, %p1190_p12 }
  0x24   :  { %p1193_p1 = pnand %p1192_p0, %p1186_p11 }
  0x26   :  { %1196 = shalt.err (!%p1193_p1)
}
  0x27   :  { %s1479_s1 = smov 128   ;;  %s1480_s26 = smov 8  }
  0x28   :  { %67 = dma.hbm_to_vmem [thread:$0]  %s1780_s3, 2048, %s1566_s28, [#allocation9], %s1479_s1, %s1479_s1, %s1480_s26  }
  0x29   :  { %s1481_s18 = smov [#allocation11]   ;;  %s1482_s20 = smov [#allocation14]  }
  0x2a   :  { %s84_s19 = sshll.u32 %s1481_s18, 4  ;;  %s103_s21 = sshll.u32 %s1482_s20, 4  ;;  %s85_s19 = int_to_ptr.vmem [resolvable:$true] %s84_s19  ;;  %s1600_s21 = int_to_ptr.vmem [resolvable:$true] %s103_s21 }
  0x2b   :  { %s1197_s24 = scalar_lea.hbm %s1782_s5, 32 }
  0x2c   :  { %p1198_p2 = scmp.ne.s32.totalorder %s1782_s5, %s1197_s24  ;;  %p1201_p3 = scmp.lt.u32.totalorder %s1197_s24, %s1782_s5 }
  0x2e   :  { %p1203_p4 = pnand %p1201_p3, %p1198_p2 }
  0x30   :  { %1206 = shalt.err (!%p1203_p4)
}
  0x31   :  { %s1207_s3 = scalar_lea.vmem %s85_s19, 32  ;;  %p1212_p6 = scmp.lt.s32.totalorder %s85_s19, %s85_s19 }
  0x32   :  { %p1208_p5 = scmp.ne.s32.totalorder %s85_s19, %s1207_s3  ;;  %p1213_p7 = scmp.lt.s32.totalorder %s1207_s3, %s1207_s3 }
  0x34   :  { %p1214_p8 = por %p1213_p7, %p1212_p6 }
  0x36   :  { %p1215_p9 = pnand %p1214_p8, %p1208_p5 }
  0x38   :  { %1218 = shalt.err (!%p1215_p9)
}
  0x39   :  { %87 = dma.hbm_to_vmem [thread:$0]  %s1782_s5, 32, %s85_s19, [#allocation12]  }
  0x3a   :  { %s1219_s17 = scalar_lea.hbm %s1784_s7, 4096 }
  0x3b   :  { %p1220_p10 = scmp.ne.s32.totalorder %s1784_s7, %s1219_s17  ;;  %p1223_p11 = scmp.lt.u32.totalorder %s1219_s17, %s1784_s7 }
  0x3d   :  { %p1225_p12 = pnand %p1223_p11, %p1220_p10 }
  0x3f   :  { %1228 = shalt.err (!%p1225_p12)
}
  0x40   :  { %s1229_s24 = scalar_lea.vmem %s1600_s21, 4096  ;;  %p1234_p0 = scmp.lt.s32.totalorder %s1600_s21, %s1600_s21 }
  0x41   :  { %p1230_p13 = scmp.ne.s32.totalorder %s1600_s21, %s1229_s24  ;;  %p1235_p1 = scmp.lt.s32.totalorder %s1229_s24, %s1229_s24 }
  0x43   :  { %p1236_p2 = por %p1235_p1, %p1234_p0 }
  0x45   :  { %p1237_p3 = pnand %p1236_p2, %p1230_p13 }
  0x47   :  { %1240 = shalt.err (!%p1237_p3)
}
  0x48   :  { %109 = dma.hbm_to_vmem [thread:$0]  %s1784_s7, 4096, %s1600_s21, [#allocation15], %s1479_s1, %s1479_s1, %s1480_s26  }
  0x49   :  { %s1483_s25 = smov [#allocation17]   ;;  %s1484_s29 = smov [#allocation20]  }
  0x4a   :  { %s126_s27 = sshll.u32 %s1483_s25, 4  ;;  %s145_s30 = sshll.u32 %s1484_s29, 4  ;;  %s127_s27 = int_to_ptr.vmem [resolvable:$true] %s126_s27  ;;  %s1634_s30 = int_to_ptr.vmem [resolvable:$true] %s145_s30 }
  0x4b   :  { %s1241_s14 = scalar_lea.hbm %s1786_s9, 32 }
  0x4c   :  { %p1242_p4 = scmp.ne.s32.totalorder %s1786_s9, %s1241_s14  ;;  %p1245_p5 = scmp.lt.u32.totalorder %s1241_s14, %s1786_s9 }
  0x4e   :  { %p1247_p6 = pnand %p1245_p5, %p1242_p4 }
  0x50   :  { %1250 = shalt.err (!%p1247_p6)
}
  0x51   :  { %s1251_s7 = scalar_lea.vmem %s127_s27, 32  ;;  %p1256_p8 = scmp.lt.s32.totalorder %s127_s27, %s127_s27 }
  0x52   :  { %p1252_p7 = scmp.ne.s32.totalorder %s127_s27, %s1251_s7  ;;  %p1257_p9 = scmp.lt.s32.totalorder %s1251_s7, %s1251_s7 }
  0x54   :  { %p1258_p10 = por %p1257_p9, %p1256_p8 }
  0x56   :  { %p1259_p11 = pnand %p1258_p10, %p1252_p7 }
  0x58   :  { %1262 = shalt.err (!%p1259_p11)
}
  0x59   :  { %129 = dma.hbm_to_vmem [thread:$0]  %s1786_s9, 32, %s127_s27, [#allocation18]  }
  0x5a   :  { %s1263_s22 = scalar_lea.hbm %s1788_s11, 2048 }
  0x5b   :  { %p1264_p12 = scmp.ne.s32.totalorder %s1788_s11, %s1263_s22  ;;  %p1267_p13 = scmp.lt.u32.totalorder %s1263_s22, %s1788_s11 }
  0x5d   :  { %p1269_p0 = pnand %p1267_p13, %p1264_p12 }
  0x5f   :  { %1272 = shalt.err (!%p1269_p0)
}
  0x60   :  { %s1273_s25 = scalar_lea.vmem %s1634_s30, 2048  ;;  %p1278_p2 = scmp.lt.s32.totalorder %s1634_s30, %s1634_s30 }
  0x61   :  { %p1274_p1 = scmp.ne.s32.totalorder %s1634_s30, %s1273_s25  ;;  %p1279_p3 = scmp.lt.s32.totalorder %s1273_s25, %s1273_s25 }
  0x63   :  { %p1280_p4 = por %p1279_p3, %p1278_p2 }
  0x65   :  { %p1281_p5 = pnand %p1280_p4, %p1274_p1 }
  0x67   :  { %1284 = shalt.err (!%p1281_p5)
}
  0x68   :  { %s1485_s9 = smov 64   ;;  %s1486_s27 = smov 4  }
  0x69   :  { %151 = dma.hbm_to_vmem [thread:$0]  %s1788_s11, 2048, %s1634_s30, [#allocation21], %s1485_s9, %s1485_s9, %s1486_s27  }
  0x6a   :  { %s1487_s28 = smov [#allocation2]   ;;  %s1488_s15 = smov [#allocation7]  }
  0x6b   :  { %s32_s14 = sshll.u32 %s1487_s28, 4  ;;  %s52_s16 = sshll.u32 %s1488_s15, 4  ;;  %s33_s14 = int_to_ptr.vmem [resolvable:$true] %s32_s14  ;;  %s53_s16 = int_to_ptr.vmem [resolvable:$true] %s52_s16 }
  0x6c   :  { %s1285_s7 = scalar_lea.hbm %s1777_s0, 128 }
  0x6d   :  { %p1286_p6 = scmp.ne.s32.totalorder %s1777_s0, %s1285_s7  ;;  %p1289_p7 = scmp.lt.u32.totalorder %s1285_s7, %s1777_s0 }
  0x6f   :  { %p1291_p8 = pnand %p1289_p7, %p1286_p6 }
  0x71   :  { %1294 = shalt.err (!%p1291_p8)
}
  0x72   :  { %s1295_s11 = scalar_lea.vmem %s33_s14, 128  ;;  %p1300_p10 = scmp.lt.s32.totalorder %s33_s14, %s33_s14 }
  0x73   :  { %p1296_p9 = scmp.ne.s32.totalorder %s33_s14, %s1295_s11  ;;  %p1301_p11 = scmp.lt.s32.totalorder %s1295_s11, %s1295_s11 }
  0x75   :  { %p1302_p12 = por %p1301_p11, %p1300_p10 }
  0x77   :  { %p1303_p13 = pnand %p1302_p12, %p1296_p9 }
  0x79   :  { %1306 = shalt.err (!%p1303_p13)
}
  0x7a   :  { %35 = dma.hbm_to_vmem [thread:$0]  %s1777_s0, 128, %s33_s14, [#allocation3]  }
  0x7b   :  { %s1307_s5 = scalar_lea.hbm %s1779_s2, 16 }
  0x7c   :  { %p1308_p0 = scmp.ne.s32.totalorder %s1779_s2, %s1307_s5  ;;  %p1311_p1 = scmp.lt.u32.totalorder %s1307_s5, %s1779_s2 }
  0x7e   :  { %p1313_p2 = pnand %p1311_p1, %p1308_p0 }
  0x80   :  { %1316 = shalt.err (!%p1313_p2)
}
  0x81   :  { %s1317_s29 = scalar_lea.vmem %s53_s16, 16  ;;  %s1321_s3 = scalar_lea.vmem %s53_s16, 32 }
  0x82   :  { %p1318_p3 = scmp.ne.s32.totalorder %s53_s16, %s1317_s29  ;;  %p1322_p4 = scmp.lt.s32.totalorder %s53_s16, %s53_s16 }
  0x83   :  { %p1323_p5 = scmp.lt.s32.totalorder %s1321_s3, %s1317_s29 }
  0x85   :  { %p1324_p6 = por %p1323_p5, %p1322_p4 }
  0x87   :  { %p1325_p7 = pnand %p1324_p6, %p1318_p3 }
  0x89   :  { %1328 = shalt.err (!%p1325_p7)
}
  0x8a   :  { %55 = dma.hbm_to_vmem [thread:$0]  %s1779_s2, 16, %s53_s16, [#allocation6]  }
  0x8b   :  { %s1489_s14 = smov [#allocation10]   ;;  %s1490_s17 = smov [#allocation13]  }
  0x8c   :  { %s74_s15 = sshll.u32 %s1489_s14, 4  ;;  %s94_s18 = sshll.u32 %s1490_s17, 4  ;;  %s75_s15 = int_to_ptr.vmem [resolvable:$true] %s74_s15  ;;  %s95_s18 = int_to_ptr.vmem [resolvable:$true] %s94_s18 }
  0x8d   :  { %s1329_s26 = scalar_lea.hbm %s1781_s4, 32 }
  0x8e   :  { %p1330_p8 = scmp.ne.s32.totalorder %s1781_s4, %s1329_s26  ;;  %p1333_p9 = scmp.lt.u32.totalorder %s1329_s26, %s1781_s4 }
  0x90   :  { %p1335_p10 = pnand %p1333_p9, %p1330_p8 }
  0x92   :  { %1338 = shalt.err (!%p1335_p10)
}
  0x93   :  { %s1339_s2 = scalar_lea.vmem %s75_s15, 32  ;;  %p1344_p12 = scmp.lt.s32.totalorder %s75_s15, %s75_s15 }
  0x94   :  { %p1340_p11 = scmp.ne.s32.totalorder %s75_s15, %s1339_s2  ;;  %p1345_p13 = scmp.lt.s32.totalorder %s1339_s2, %s1339_s2 }
  0x96   :  { %p1346_p0 = por %p1345_p13, %p1344_p12 }
  0x98   :  { %p1347_p1 = pnand %p1346_p0, %p1340_p11 }
  0x9a   :  { %1350 = shalt.err (!%p1347_p1)
}
  0x9b   :  { %77 = dma.hbm_to_vmem [thread:$0]  %s1781_s4, 32, %s75_s15, [#allocation9]  }
  0x9c   :  { %s1351_s5 = scalar_lea.hbm %s1783_s6, 32 }
  0x9d   :  { %p1352_p2 = scmp.ne.s32.totalorder %s1783_s6, %s1351_s5  ;;  %p1355_p3 = scmp.lt.u32.totalorder %s1351_s5, %s1783_s6 }
  0x9f   :  { %p1357_p4 = pnand %p1355_p3, %p1352_p2 }
  0xa1   :  { %1360 = shalt.err (!%p1357_p4)
}
  0xa2   :  { %s1361_s29 = scalar_lea.vmem %s95_s18, 32  ;;  %p1366_p6 = scmp.lt.s32.totalorder %s95_s18, %s95_s18 }
  0xa3   :  { %p1362_p5 = scmp.ne.s32.totalorder %s95_s18, %s1361_s29  ;;  %p1367_p7 = scmp.lt.s32.totalorder %s1361_s29, %s1361_s29 }
  0xa5   :  { %p1368_p8 = por %p1367_p7, %p1366_p6 }
  0xa7   :  { %p1369_p9 = pnand %p1368_p8, %p1362_p5 }
  0xa9   :  { %1372 = shalt.err (!%p1369_p9)
}
  0xaa   :  { %97 = dma.hbm_to_vmem [thread:$0]  %s1783_s6, 32, %s95_s18, [#allocation12]  }
  0xab   :  { %s1491_s0 = smov [#allocation16]   ;;  %s1492_s14 = smov [#allocation19]  }
  0xac   :  { %s116_s28 = sshll.u32 %s1491_s0, 4  ;;  %s136_s15 = sshll.u32 %s1492_s14, 4  ;;  %s117_s28 = int_to_ptr.vmem [resolvable:$true] %s116_s28  ;;  %s137_s15 = int_to_ptr.vmem [resolvable:$true] %s136_s15 }
  0xad   :  { %s1373_s1 = scalar_lea.hbm %s1785_s8, 32 }
  0xae   :  { %p1374_p10 = scmp.ne.s32.totalorder %s1785_s8, %s1373_s1  ;;  %p1377_p11 = scmp.lt.u32.totalorder %s1373_s1, %s1785_s8 }
  0xb0   :  { %p1379_p12 = pnand %p1377_p11, %p1374_p10 }
  0xb2   :  { %1382 = shalt.err (!%p1379_p12)
}
  0xb3   :  { %s1383_s6 = scalar_lea.vmem %s117_s28, 32  ;;  %p1388_p0 = scmp.lt.s32.totalorder %s117_s28, %s117_s28 }
  0xb4   :  { %p1384_p13 = scmp.ne.s32.totalorder %s117_s28, %s1383_s6  ;;  %p1389_p1 = scmp.lt.s32.totalorder %s1383_s6, %s1383_s6 }
  0xb6   :  { %p1390_p2 = por %p1389_p1, %p1388_p0 }
  0xb8   :  { %p1391_p3 = pnand %p1390_p2, %p1384_p13 }
  0xba   :  { %1394 = shalt.err (!%p1391_p3)
}
  0xbb   :  { %119 = dma.hbm_to_vmem [thread:$0]  %s1785_s8, 32, %s117_s28, [#allocation15]  }
  0xbc   :  { %s1395_s22 = scalar_lea.hbm %s1787_s10, 32 }
  0xbd   :  { %p1396_p4 = scmp.ne.s32.totalorder %s1787_s10, %s1395_s22  ;;  %p1399_p5 = scmp.lt.u32.totalorder %s1395_s22, %s1787_s10 }
  0xbf   :  { %p1401_p6 = pnand %p1399_p5, %p1396_p4 }
  0xc1   :  { %1404 = shalt.err (!%p1401_p6)
}
  0xc2   :  { %s1405_s25 = scalar_lea.vmem %s137_s15, 32  ;;  %p1410_p8 = scmp.lt.s32.totalorder %s137_s15, %s137_s15 }
  0xc3   :  { %p1406_p7 = scmp.ne.s32.totalorder %s137_s15, %s1405_s25  ;;  %p1411_p9 = scmp.lt.s32.totalorder %s1405_s25, %s1405_s25 }
  0xc5   :  { %p1412_p10 = por %p1411_p9, %p1410_p8 }
  0xc7   :  { %p1413_p11 = pnand %p1412_p10, %p1406_p7 }
  0xc9   :  { %1416 = shalt.err (!%p1413_p11)
}
  0xca   :  { %139 = dma.hbm_to_vmem [thread:$0]  %s1787_s10, 32, %s137_s15, [#allocation18]  }
  0xcb   :  { %s1493_s27 = smov [#allocation22]   ;;  %s1417_s0 = scalar_lea.hbm %s1789_s12, 16 }
  0xcc   :  { %s158_s29 = sshll.u32 %s1493_s27, 4  ;;  %p1418_p12 = scmp.ne.s32.totalorder %s1789_s12, %s1417_s0  ;;  %s159_s29 = int_to_ptr.vmem [resolvable:$true] %s158_s29 }
  0xcd   :  { %p1421_p13 = scmp.lt.u32.totalorder %s1417_s0, %s1789_s12 }
  0xcf   :  { %p1423_p0 = pnand %p1421_p13, %p1418_p12 }
  0xd1   :  { %1426 = shalt.err (!%p1423_p0)
}
  0xd2   :  { %s1427_s1 = scalar_lea.vmem %s159_s29, 16  ;;  %s1431_s10 = scalar_lea.vmem %s159_s29, 32 }
  0xd3   :  { %p1428_p1 = scmp.ne.s32.totalorder %s159_s29, %s1427_s1  ;;  %p1432_p2 = scmp.lt.s32.totalorder %s159_s29, %s159_s29 }
  0xd4   :  { %p1433_p3 = scmp.lt.s32.totalorder %s1431_s10, %s1427_s1 }
  0xd6   :  { %p1434_p4 = por %p1433_p3, %p1432_p2 }
  0xd8   :  { %p1435_p5 = pnand %p1434_p4, %p1428_p1 }
  0xda   :  { %1438 = shalt.err (!%p1435_p5)
}
  0xdb   :  { %161 = dma.hbm_to_vmem [thread:$0]  %s1789_s12, 16, %s159_s29, [#allocation21]  }
  0xdc   :  { %1461 = dma.done.wait [#allocation3], 128  }
  0xdd   :  { %1462 = vsyncadd [#allocation3], 4294967168 }
  0xde   :  { %1463 = dma.done.wait [#allocation6], 32  }
  0xdf   :  { %1464 = vsyncadd [#allocation6], 4294967264 }
  0xe0   :  { %1465 = dma.done.wait [#allocation9], 2080  }
  0xe1   :  { %1466 = vsyncadd [#allocation9], 4294965216 }
  0xe2   :  { %1467 = dma.done.wait [#allocation12], 64  }
  0xe3   :  { %1468 = vsyncadd [#allocation12], 4294967232 }
  0xe4   :  { %1469 = dma.done.wait [#allocation15], 4128  }
  0xe5   :  { %1470 = vsyncadd [#allocation15], 4294963168 }
  0xe6   :  { %1471 = dma.done.wait [#allocation18], 64  }
  0xe7   :  { %1472 = vsyncadd [#allocation18], 4294967232 }
  0xe8   :  { %1473 = dma.done.wait [#allocation21], 2064  }
  0xe9   :  { %1474 = vsyncadd [#allocation21], 4294965232  ;;  %v202_v0 = vld [vmem:[#allocation2] sm:$0xff]  ;;  %v1049_v5 = vld [vmem:[#allocation8 + $0x4] ss:$8 sps:$4 sm:$0xff]   ;;  %v1494_v10 = vmov 0   ;;  %v255_v37 = vlaneseq }
  0xea   :  { %205 = vadd.xlane.f32.xlu0 %v202_v0  ;;  %v1051_v6 = vld [vmem:[#allocation8] ss:$8 sps:$4 sm:$0xff]   ;;  %v1052_v7 = vld [vmem:[#allocation8 + $0x14] ss:$8 sps:$4 sm:$0xff]   ;;  %345 = vmatprep.subr.bf16.mxu0 %v1049_v5  ;;  %v1054_v8 = vld [vmem:[#allocation8 + $0x10] ss:$8 sps:$4 sm:$0xff]  }
  0xeb   :  { %346 = vmatpush1.bf16.msra.mxu0 %v1051_v6  ;;  %v1055_v9 = vld [vmem:[#allocation8 + $0x24] ss:$8 sps:$4 sm:$0xff]   ;;  %377 = vmatprep.mubr.bf16.mxu0 %v1494_v10  ;;  %v1057_v11 = vld [vmem:[#allocation8 + $0x20] ss:$8 sps:$4 sm:$0xff]   ;;  %v1058_v12 = vld [vmem:[#allocation8 + $0x34] ss:$8 sps:$4 sm:$0xff]  }
  0xec   :  { %347 = vmatprep.subr.bf16.mxu0 %v1052_v7  ;;  %v1060_v13 = vld [vmem:[#allocation8 + $0x30] ss:$8 sps:$4 sm:$0xff]   ;;  %v1061_v14 = vld [vmem:[#allocation8 + $0x44] ss:$8 sps:$4 sm:$0xff]   ;;  %v1063_v15 = vld [vmem:[#allocation8 + $0x40] ss:$8 sps:$4 sm:$0xff]  }
  0xed   :  { %v1064_v16 = vld [vmem:[#allocation8 + $0x54] ss:$8 sps:$4 sm:$0xff]   ;;  %v1066_v17 = vld [vmem:[#allocation8 + $0x50] ss:$8 sps:$4 sm:$0xff]   ;;  %v1067_v18 = vld [vmem:[#allocation8 + $0x64] ss:$8 sps:$4 sm:$0xff]  }
  0xee   :  { %v1069_v19 = vld [vmem:[#allocation8 + $0x60] ss:$8 sps:$4 sm:$0xff]   ;;  %v1070_v20 = vld [vmem:[#allocation8 + $0x74] ss:$8 sps:$4 sm:$0xff]   ;;  %v1072_v21 = vld [vmem:[#allocation8 + $0x70] ss:$8 sps:$4 sm:$0xff]  }
  0xef   :  { %348 = vmatpush1.bf16.msra.mxu0 %v1054_v8  ;;  %v941_v26 = vld [vmem:[#allocation5] ss:$0 sm:$0xff]  ;;  %v942_v28 = vld [vmem:[#allocation7] ss:$0 sm:$0xff]  ;;  %v256_v38 = vshrl.u32 %v255_v37, 7  ;;  %s1495_s12 = smov [#allocation23]  }
  0xf0   :  { %349 = vmatprep.subr.bf16.mxu0 %v1055_v9  ;;  %v253_v40 = vld [vmem:[#allocation10] sm:$0x3]  ;;  %v1073_v51 = vld [vmem:[#allocation14 + $0x4] ss:$8 sps:$4 sm:$0xff]   ;;  %v1075_v52 = vld [vmem:[#allocation14] ss:$8 sps:$4 sm:$0xff]  }
  0xf1   :  { %v1749_v39 = vsub.s32 0, %v256_v38  ;;  %v1751_v41 = vsub.s32 1, %v256_v38  ;;  %v1076_v53 = vld [vmem:[#allocation14 + $0x14] ss:$8 sps:$4 sm:$0xff]   ;;  %647 = vmatprep.subr.bf16.mxu1 %v1073_v51  ;;  %v1078_v54 = vld [vmem:[#allocation14 + $0x10] ss:$8 sps:$4 sm:$0xff]  }
  0xf2   :  { %648 = vmatpush1.bf16.msra.mxu1 %v1075_v52  ;;  %v1079_v55 = vld [vmem:[#allocation14 + $0x24] ss:$8 sps:$4 sm:$0xff]   ;;  %v1081_v56 = vld [vmem:[#allocation14 + $0x20] ss:$8 sps:$4 sm:$0xff]   ;;  %v1082_v57 = vld [vmem:[#allocation14 + $0x34] ss:$8 sps:$4 sm:$0xff]  }
  0xf3   :  { %350 = vmatpush1.bf16.msra.mxu0 %v1057_v11  ;;  %v258_v42 = vrot.slane %v253_v40, %v1749_v39  ;;  %v262_v43 = vrot.slane %v253_v40, %v1751_v41  ;;  %649 = vmatprep.subr.bf16.mxu1 %v1076_v53  ;;  %v1084_v58 = vld [vmem:[#allocation14 + $0x30] ss:$8 sps:$4 sm:$0xff]   ;;  %v1085_v59 = vld [vmem:[#allocation14 + $0x44] ss:$8 sps:$4 sm:$0xff]   ;;  %v1087_v60 = vld [vmem:[#allocation14 + $0x40] ss:$8 sps:$4 sm:$0xff]  }
  0xf4   :  { %351 = vmatprep.subr.bf16.mxu0 %v1058_v12  ;;  %v1088_v61 = vld [vmem:[#allocation14 + $0x54] ss:$8 sps:$4 sm:$0xff]   ;;  %v1090_v62 = vld [vmem:[#allocation14 + $0x50] ss:$8 sps:$4 sm:$0xff]   ;;  %v1091_v6 = vld [vmem:[#allocation14 + $0x64] ss:$8 sps:$4 sm:$0xff]  }
  0xf5   :  { %v1093_v7 = vld [vmem:[#allocation14 + $0x60] ss:$8 sps:$4 sm:$0xff]   ;;  %v1094_v8 = vld [vmem:[#allocation14 + $0x74] ss:$8 sps:$4 sm:$0xff]   ;;  %v1096_v9 = vld [vmem:[#allocation14 + $0x70] ss:$8 sps:$4 sm:$0xff]  }
  0xf6   :  { %650 = vmatpush1.bf16.msra.mxu1 %v1078_v54  ;;  %v1097_v10 = vld [vmem:[#allocation14 + $0x84] ss:$8 sps:$4 sm:$0xff]   ;;  %v1099_v11 = vld [vmem:[#allocation14 + $0x80] ss:$8 sps:$4 sm:$0xff]   ;;  %v1100_v12 = vld [vmem:[#allocation14 + $0x94] ss:$8 sps:$4 sm:$0xff]  }
  0xf7   :  { %352 = vmatpush1.bf16.msra.mxu0 %v1060_v13  ;;  %651 = vmatprep.subr.bf16.mxu1 %v1079_v55  ;;  %v1102_v13 = vld [vmem:[#allocation14 + $0x90] ss:$8 sps:$4 sm:$0xff]   ;;  %s926_s21 = sshll.u32 %s1495_s12, 4  ;;  %s927_s21 = int_to_ptr.vmem [resolvable:$true] %s926_s21 }
  0xf8   :  { %353 = vmatprep.subr.bf16.mxu0 %v1061_v14  ;;  %v1103_v14 = vld [vmem:[#allocation14 + $0xa4] ss:$8 sps:$4 sm:$0xff]   ;;  %s1439_s20 = scalar_lea.vmem %s927_s21, 128  ;;  %p1444_p7 = scmp.lt.s32.totalorder %s927_s21, %s927_s21 }
  0xf9   :  { %p1440_p6 = scmp.ne.s32.totalorder %s927_s21, %s1439_s20  ;;  %p1445_p8 = scmp.lt.s32.totalorder %s1439_s20, %s1439_s20 }
  0xfa   :  { %652 = vmatpush1.bf16.msra.mxu1 %v1081_v56  ;;  %v475_v56 = vld [vmem:[#allocation16] sm:$0x3] }
  0xfb   :  { %354 = vmatpush1.bf16.msra.mxu0 %v1063_v15  ;;  %653 = vmatprep.subr.bf16.mxu1 %v1082_v57  ;;  %v1105_v15 = vld [vmem:[#allocation14 + $0xa0] ss:$8 sps:$4 sm:$0xff]   ;;  %v480_v57 = vrot.slane %v475_v56, %v1749_v39  ;;  %p1446_p9 = por %p1445_p8, %p1444_p7 }
  0xfc   :  { %355 = vmatprep.subr.bf16.mxu0 %v1064_v16  ;;  %v1106_v16 = vld [vmem:[#allocation14 + $0xb4] ss:$8 sps:$4 sm:$0xff]  }
  0xfd   :  { %p1447_p10 = pnand %p1446_p9, %p1440_p6 }
  0xfe   :  { %654 = vmatpush1.bf16.msra.mxu1 %v1084_v58  ;;  %v484_v58 = vrot.slane %v475_v56, %v1751_v41 }
  0xff   :  { %356 = vmatpush1.bf16.msra.mxu0 %v1066_v17  ;;  %655 = vmatprep.subr.bf16.mxu1 %v1085_v59  ;;  %v1108_v17 = vld [vmem:[#allocation14 + $0xb0] ss:$8 sps:$4 sm:$0xff]  }
 0x100   :  { %357 = vmatprep.subr.bf16.mxu0 %v1067_v18  ;;  %v1109_v18 = vld [vmem:[#allocation14 + $0xc4] ss:$8 sps:$4 sm:$0xff]  }
 0x102   :  { %656 = vmatpush1.bf16.msra.mxu1 %v1087_v60 }
 0x103   :  { %358 = vmatpush1.bf16.msra.mxu0 %v1069_v19  ;;  %657 = vmatprep.subr.bf16.mxu1 %v1088_v61  ;;  %v1111_v19 = vld [vmem:[#allocation14 + $0xc0] ss:$8 sps:$4 sm:$0xff]  }
 0x104   :  { %359 = vmatprep.subr.bf16.mxu0 %v1070_v20  ;;  %v1112_v20 = vld [vmem:[#allocation14 + $0xd4] ss:$8 sps:$4 sm:$0xff]  }
 0x106   :  { %658 = vmatpush1.bf16.msra.mxu1 %v1090_v62 }
 0x107   :  { %360 = vmatpush1.bf16.msra.mxu0 %v1072_v21  ;;  %659 = vmatprep.subr.bf16.mxu1 %v1091_v6  ;;  %v1114_v21 = vld [vmem:[#allocation14 + $0xd0] ss:$8 sps:$4 sm:$0xff]  }
 0x10a   :  { %660 = vmatpush1.bf16.msra.mxu1 %v1093_v7 }
 0x10b   :  { %661 = vmatprep.subr.bf16.mxu1 %v1094_v8 }
 0x10e   :  { %662 = vmatpush1.bf16.msra.mxu1 %v1096_v9  ;;  %v1121_v9 = vld [vmem:[#allocation20 + $0x40] sm:$0xff]  }
 0x10f   :  { %663 = vmatprep.subr.bf16.mxu1 %v1097_v10  ;;  %v1122_v10 = vld [vmem:[#allocation20] sm:$0xff]   ;;  %1008 = vmatprep.subr.bf16.mxu0 %v1121_v9 }
 0x112   :  { %664 = vmatpush1.bf16.msra.mxu1 %v1099_v11  ;;  %v1123_v11 = vld [vmem:[#allocation20 + $0x48] sm:$0xff]  }
 0x113   :  { %665 = vmatprep.subr.bf16.mxu1 %v1100_v12  ;;  %v1124_v12 = vld [vmem:[#allocation20 + $0x8] sm:$0xff]  }
 0x116   :  { %666 = vmatpush1.bf16.msra.mxu1 %v1102_v13  ;;  %v1125_v13 = vld [vmem:[#allocation20 + $0x50] sm:$0xff]  }
 0x117   :  { %667 = vmatprep.subr.bf16.mxu1 %v1103_v14  ;;  %v1126_v14 = vld [vmem:[#allocation20 + $0x10] sm:$0xff]  }
 0x11a   :  { %668 = vmatpush1.bf16.msra.mxu1 %v1105_v15  ;;  %v1127_v15 = vld [vmem:[#allocation20 + $0x58] sm:$0xff]  }
 0x11b   :  { %669 = vmatprep.subr.bf16.mxu1 %v1106_v16  ;;  %v1128_v16 = vld [vmem:[#allocation20 + $0x18] sm:$0xff]  }
 0x11e   :  { %670 = vmatpush1.bf16.msra.mxu1 %v1108_v17  ;;  %v1129_v17 = vld [vmem:[#allocation20 + $0x60] sm:$0xff]  }
 0x11f   :  { %671 = vmatprep.subr.bf16.mxu1 %v1109_v18  ;;  %v1130_v18 = vld [vmem:[#allocation20 + $0x20] sm:$0xff]  }
 0x122   :  { %672 = vmatpush1.bf16.msra.mxu1 %v1111_v19  ;;  %v1131_v19 = vld [vmem:[#allocation20 + $0x68] sm:$0xff]  }
 0x123   :  { %673 = vmatprep.subr.bf16.mxu1 %v1112_v20  ;;  %v1132_v20 = vld [vmem:[#allocation20 + $0x28] sm:$0xff]  }
 0x126   :  { %674 = vmatpush1.bf16.msra.mxu1 %v1114_v21  ;;  %v1133_v21 = vld [vmem:[#allocation20 + $0x70] sm:$0xff]  }
 0x177   :  { %v206_v1 = vpop.xlane.xlu0 %205 }
 0x178   :  { %v208_v2 = vmul.f32 0.0078125, %v206_v1 }
 0x17a   :  { %v209_v3 = vsub.f32 %v202_v0, %v208_v2 }
 0x17c   :  { %v210_v4 = vmul.f32 %v209_v3, %v209_v3 }
 0x17e   :  { %211 = vadd.xlane.f32.xlu0 %v210_v4 }
 0x20b   :  { %v212_v22 = vpop.xlane.xlu0 %211 }
 0x20c   :  { %v213_v23 = vmul.f32 0.0078125, %v212_v22  ;;  %v1115_v22 = vld [vmem:[#allocation14 + $0xe4] ss:$8 sps:$4 sm:$0xff]  }
 0x20d   :  { %675 = vmatprep.subr.bf16.mxu1 %v1115_v22  ;;  %v1134_v22 = vld [vmem:[#allocation20 + $0x30] sm:$0xff]  }
 0x20e   :  { %v214_v24 = vadd.f32 1e-05, %v213_v23  ;;  %v1117_v23 = vld [vmem:[#allocation14 + $0xe0] ss:$8 sps:$4 sm:$0xff]  }
 0x20f   :  { %676 = vmatpush1.bf16.msra.mxu1 %v1117_v23  ;;  %v1135_v23 = vld [vmem:[#allocation20 + $0x78] sm:$0xff]  }
 0x210   :  { %1137 = vrsqrt.f32 %v214_v24  ;;  %v1118_v24 = vld [vmem:[#allocation14 + $0xf4] ss:$8 sps:$4 sm:$0xff]  }
 0x211   :  { %677 = vmatprep.subr.bf16.mxu1 %v1118_v24  ;;  %v1136_v24 = vld [vmem:[#allocation20 + $0x38] sm:$0xff]  }
 0x21a   :  { %v1138_v25 = vpop.eup %1137 }
 0x21b   :  { %v216_v27 = vmul.f32 %v1138_v25, %v209_v3  ;;  %v1120_v25 = vld [vmem:[#allocation14 + $0xf0] ss:$8 sps:$4 sm:$0xff]  }
 0x21c   :  { %678 = vmatpush1.bf16.msra.mxu1 %v1120_v25 }
 0x21d   :  { %v223_v29 = vmul.f32 %v941_v26, %v216_v27 }
 0x21f   :  { %v230_v30 = vadd.f32 %v942_v28, %v223_v29  ;;  %v386_v29 = vld [vmem:[#allocation11] sm:$0x3] }
 0x221   :  { %v232_v31 = vmul.f32 0.70710677, %v230_v30  ;;  %v231_v33 = vmul.f32 0.5, %v230_v30  ;;  %v387_v30 = vld [vmem:[#allocation13] sm:$0x3] }
 0x223   :  { %1139 = verf.f32 %v232_v31  ;;  %v409_v31 = vrot.slane %v386_v29, %v1749_v39 }
 0x22d   :  { %v1140_v32 = vpop.eup %1139 }
 0x22e   :  { %v234_v34 = vadd.f32 1.0, %v1140_v32  ;;  %v413_v32 = vrot.slane %v386_v29, %v1751_v41  ;;  %v689_v29 = vld [vmem:[#allocation19] sm:$0x3] }
 0x230   :  { %v235_v35 = vmul.f32 %v234_v34, %v231_v33 }
 0x232   :  { %v236_v36 = vpack.c.bf16 %v235_v35, %v235_v35  ;;  %v422_v35 = vrot.slane %v387_v30, %v1749_v39 }
 0x234   :  { %378 = vmatmul.mubr.bf16.vlgmr.msra.gmra.mrb[0].mxu0 %v236_v36  ;;  %v426_v36 = vrot.slane %v387_v30, %v1751_v41 }
 0x235   :  { %1009 = vmatpush3.bf16.msra.mxu0 %v1122_v10 }
 0x236   :  { %1010 = vmatprep.subr.bf16.mxu0 %v1123_v11 }
 0x239   :  { %1011 = vmatpush3.bf16.msra.mxu0 %v1124_v12 }
 0x23a   :  { %1012 = vmatprep.subr.bf16.mxu0 %v1125_v13 }
 0x23d   :  { %1013 = vmatpush3.bf16.msra.mxu0 %v1126_v14 }
 0x23e   :  { %1014 = vmatprep.subr.bf16.mxu0 %v1127_v15 }
 0x241   :  { %1015 = vmatpush3.bf16.msra.mxu0 %v1128_v16 }
 0x242   :  { %1016 = vmatprep.subr.bf16.mxu0 %v1129_v17 }
 0x245   :  { %1017 = vmatpush3.bf16.msra.mxu0 %v1130_v18 }
 0x246   :  { %1018 = vmatprep.subr.bf16.mxu0 %v1131_v19 }
 0x249   :  { %1019 = vmatpush3.bf16.msra.mxu0 %v1132_v20 }
 0x24a   :  { %1020 = vmatprep.subr.bf16.mxu0 %v1133_v21 }
 0x24d   :  { %1021 = vmatpush3.bf16.msra.mxu0 %v1134_v22 }
 0x24e   :  { %1022 = vmatprep.subr.bf16.mxu0 %v1135_v23 }
 0x251   :  { %1023 = vmatpush3.bf16.msra.mxu0 %v1136_v24 }
 0x307   :  { %v379_v44 = vpop.f32.mrb[0].mxu0 }
 0x308   :  { %v380_v45 = vadd.f32 %v379_v44, %v258_v42  ;;  %v381_v46 = vpop.f32.mrb[1].mxu0 }
 0x309   :  { %v382_v47 = vadd.f32 %v381_v46, %v262_v43  ;;  %v383_v48 = vpop.f32.mrb[2].mxu0 }
 0x30a   :  { %v384_v49 = vpop.f32.mrb[3].mxu0 }
 0x30b   :  { %v388_v50 = vadd.f32 %v382_v47, %v380_v45 }
 0x30d   :  { %389 = vadd.xlane.f32.xlu1 %v388_v50 }
 0x39a   :  { %v390_v63 = vpop.xlane.xlu1 %389 }
 0x39b   :  { %v392_v0 = vmul.f32 0.00390625, %v390_v63 }
 0x39d   :  { %v393_v1 = vsub.f32 %v380_v45, %v392_v0  ;;  %v394_v2 = vsub.f32 %v382_v47, %v392_v0 }
 0x39f   :  { %v395_v3 = vmul.f32 %v393_v1, %v393_v1  ;;  %v396_v4 = vmul.f32 %v394_v2, %v394_v2 }
 0x3a1   :  { %v397_v5 = vadd.f32 %v396_v4, %v395_v3 }
 0x3a3   :  { %398 = vadd.xlane.f32.xlu1 %v397_v5 }
 0x430   :  { %v399_v26 = vpop.xlane.xlu1 %398 }
 0x431   :  { %v400_v27 = vmul.f32 0.00390625, %v399_v26 }
 0x433   :  { %v401_v28 = vadd.f32 1e-05, %v400_v27 }
 0x435   :  { %1141 = vrsqrt.f32 %v401_v28  ;;  %v688_v28 = vld [vmem:[#allocation17] sm:$0x3] }
 0x436   :  { %v710_v30 = vrot.slane %v688_v28, %v1749_v39 }
 0x43f   :  { %v1142_v33 = vpop.eup %1141 }
 0x440   :  { %v404_v34 = vmul.f32 %v1142_v33, %v394_v2  ;;  %v403_v37 = vmul.f32 %v1142_v33, %v393_v1 }
 0x442   :  { %v417_v38 = vmul.f32 %v413_v32, %v404_v34  ;;  %v416_v40 = vmul.f32 %v409_v31, %v403_v37  ;;  %v714_v31 = vrot.slane %v688_v28, %v1751_v41 }
 0x444   :  { %v430_v42 = vadd.f32 %v426_v36, %v417_v38  ;;  %v429_v43 = vadd.f32 %v422_v35, %v416_v40  ;;  %v723_v35 = vrot.slane %v689_v29, %v1749_v39  ;;  %v727_v36 = vrot.slane %v689_v29, %v1751_v41 }
 0x446   :  { %v434_v44 = vmul.f32 0.70710677, %v430_v42  ;;  %v433_v45 = vmul.f32 0.70710677, %v429_v43  ;;  %v432_v48 = vmul.f32 0.5, %v430_v42  ;;  %v431_v50 = vmul.f32 0.5, %v429_v43 }
 0x448   :  { %1143 = verf.f32 %v434_v44 }
 0x449   :  { %1145 = verf.f32 %v433_v45 }
 0x452   :  { %v1144_v46 = vpop.eup %1143 }
 0x453   :  { %v1146_v47 = vpop.eup %1145  ;;  %v438_v49 = vadd.f32 1.0, %v1144_v46 }
 0x454   :  { %v437_v51 = vadd.f32 1.0, %v1146_v47 }
 0x455   :  { %v440_v52 = vmul.f32 %v438_v49, %v432_v48 }
 0x456   :  { %v439_v53 = vmul.f32 %v437_v51, %v431_v50 }
 0x457   :  { %v442_v54 = vpack.c.bf16 %v440_v52, %v440_v52 }
 0x458   :  { %v441_v55 = vpack.c.bf16 %v439_v53, %v439_v53 }
 0x459   :  { %679 = vmatprep.mubr.bf16.mxu1 %v442_v54  ;;  %v991_v54 = vld [vmem:[#allocation22] ss:$0 sm:$0xff] }
 0x45a   :  { %680 = vmatmul.mubr.bf16.vlgmr.msra.gmra.mrb[0].mxu1 %v441_v55 }
 0x52d   :  { %v681_v59 = vpop.f32.mrb[0].mxu1 }
 0x52e   :  { %v682_v60 = vadd.f32 %v681_v59, %v480_v57  ;;  %v683_v61 = vpop.f32.mrb[1].mxu1 }
 0x52f   :  { %v684_v62 = vadd.f32 %v683_v61, %v484_v58  ;;  %v685_v63 = vpop.f32.mrb[2].mxu1 }
 0x530   :  { %v686_v0 = vpop.f32.mrb[3].mxu1 }
 0x531   :  { %v690_v1 = vadd.f32 %v684_v62, %v682_v60 }
 0x533   :  { %691 = vadd.xlane.f32.xlu0 %v690_v1 }
 0x5c0   :  { %v692_v2 = vpop.xlane.xlu0 %691 }
 0x5c1   :  { %v693_v3 = vmul.f32 0.00390625, %v692_v2 }
 0x5c3   :  { %v694_v4 = vsub.f32 %v682_v60, %v693_v3  ;;  %v695_v5 = vsub.f32 %v684_v62, %v693_v3 }
 0x5c5   :  { %v696_v6 = vmul.f32 %v694_v4, %v694_v4  ;;  %v697_v7 = vmul.f32 %v695_v5, %v695_v5 }
 0x5c7   :  { %v698_v8 = vadd.f32 %v697_v7, %v696_v6 }
 0x5c9   :  { %699 = vadd.xlane.f32.xlu1 %v698_v8 }
 0x656   :  { %v700_v25 = vpop.xlane.xlu1 %699 }
 0x657   :  { %v701_v26 = vmul.f32 0.00390625, %v700_v25 }
 0x659   :  { %v702_v27 = vadd.f32 1e-05, %v701_v26 }
 0x65b   :  { %1147 = vrsqrt.f32 %v702_v27 }
 0x665   :  { %v1148_v32 = vpop.eup %1147 }
 0x666   :  { %v704_v33 = vmul.f32 %v1148_v32, %v694_v4  ;;  %v705_v34 = vmul.f32 %v1148_v32, %v695_v5 }
 0x668   :  { %v718_v37 = vmul.f32 %v714_v31, %v705_v34  ;;  %v717_v38 = vmul.f32 %v710_v30, %v704_v33 }
 0x66a   :  { %v731_v40 = vadd.f32 %v727_v36, %v718_v37  ;;  %v730_v42 = vadd.f32 %v723_v35, %v717_v38 }
 0x66c   :  { %v735_v43 = vmul.f32 0.70710677, %v731_v40  ;;  %v734_v44 = vmul.f32 0.70710677, %v730_v42  ;;  %v733_v47 = vmul.f32 0.5, %v731_v40  ;;  %v732_v49 = vmul.f32 0.5, %v730_v42 }
 0x66e   :  { %1149 = verf.f32 %v735_v43 }
 0x66f   :  { %1151 = verf.f32 %v734_v44 }
 0x678   :  { %v1150_v45 = vpop.eup %1149 }
 0x679   :  { %v1152_v46 = vpop.eup %1151  ;;  %v739_v48 = vadd.f32 1.0, %v1150_v45 }
 0x67a   :  { %v738_v50 = vadd.f32 1.0, %v1152_v46 }
 0x67b   :  { %v741_v51 = vmul.f32 %v739_v48, %v733_v47 }
 0x67c   :  { %v740_v52 = vmul.f32 %v738_v50, %v732_v49 }
 0x67d   :  { %v743_v53 = vpack.c.bf16 %v741_v51, %v741_v51 }
 0x67e   :  { %v742_v39 = vpack.c.bf16 %v740_v52, %v740_v52 }
 0x67f   :  { %911 = vmatprep.mubr.bf16.mxu0 %v743_v53 }
 0x680   :  { %912 = vmatmul.mubr.bf16.vlgmr.msra.gmra.mrb[4].mxu0 %v742_v39 }
 0x753   :  { %v1024_v41 = vpop.f32.mrb[4].mxu0 }
 0x754   :  { %v1025_v55 = vpop.f32.mrb[5].mxu0 }
 0x755   :  { %v1026_v56 = vadd.f32 %v1025_v55, %v1024_v41  ;;  %v1027_v57 = vpop.f32.mrb[6].mxu0 }
 0x756   :  { %v1028_v58 = vpop.f32.mrb[7].mxu0 }
 0x757   :  { %v914_v59 = vadd.f32 %v1026_v56, %v991_v54 }
 0x759   :  { %919 = vst [vmem:[#allocation23] sm:$0xff] %v914_v59 }
 0x75a   :  { %1450 = shalt.err (!%p1447_p10)
}
 0x75b   :  { %s1451_s18 = scalar_lea.hbm %s1790_s13, 128 }
 0x75c   :  { %p1452_p11 = scmp.ne.s32.totalorder %s1790_s13, %s1451_s18  ;;  %p1455_p12 = scmp.lt.u32.totalorder %s1451_s18, %s1790_s13 }
 0x75e   :  { %p1457_p13 = pnand %p1455_p12, %p1452_p11 }
 0x760   :  { %1460 = shalt.err (!%p1457_p13)
}
 0x761   :  { %929 = dma.vmem_to_hbm [thread:$0]  %s927_s21, 128, %s1790_s13, [#allocation4]  }
 0x762   :  { %1475 = dma.done.wait [#allocation4], 128  }
 0x763   :  { %1476 = vsyncadd [#allocation4], 4294967168 }
 0x764   :  { %933 = vsyncpa [#allocation3], 1 }
 0x765   :  { %934 = vsyncpa [#allocation6], 1 }
 0x766   :  { %935 = vsyncpa [#allocation9], 1 }
 0x767   :  { %936 = vsyncpa [#allocation12], 1 }
 0x768   :  { %937 = vsyncpa [#allocation15], 1 }
 0x769   :  { %938 = vsyncpa [#allocation18], 1 }
 0x76a   :  { %939 = vsyncpa [#allocation21], 1 }
 0x76b   :  { %940 = vsyncpa [#allocation4], 1 }

</bundles_post_ra>
